<compile_context>
chip_gen: v5e
topology: v5e:2x2
jax: 0.10.0
libtpu: 0.0.40
codegen_flags: <defaults>
</compile_context>

<pallas_src>
import functools

import jax
import jax.numpy as jnp
from jax import lax
from jax.experimental import pallas as pl
from jax.experimental.pallas import tpu as pltpu  # noqa: F401  (TPU backend import)

# ----------------------------- config (small, synthetic) ---------------------
PATCH = 4         # vision patch size (surrogate for ViT patch-embed conv stride)
DV = 128          # vision hidden dim
DL = 128          # language hidden dim
V_CAP = 256       # caption vocab (surrogate)
DT = 128          # translation hidden dim
V_TR = 256        # translation vocab (surrogate)
T_GEN = 8         # TODO(synk): surrogate for max_new_tokens=100 (kept small & static)
PREFIX_TOKEN = 7  # surrogate token id for the "there " string prefix
B_PAD = 8         # batch padded to a full sublane group
S_VALID = T_GEN + 1  # prefix + generated tokens pooled by the translation stage


# ----------------------------- in-kernel helpers ------------------------------
def _argmax_lanes(x, n):
    """First-occurrence argmax along the last (lane) axis; int32 iota + int sentinel."""
    lane = lax.broadcasted_iota(jnp.int32, x.shape, x.ndim - 1)
    m = jnp.max(x, axis=-1, keepdims=True)
    return jnp.min(jnp.where(x == m, lane, n), axis=-1, keepdims=True)


# ----------------------------- the single fused kernel ------------------------
def _image2translation_kernel(
    patches_ref,               # [B_PAD*P, patch_dim] f32
    wp_ref, bp_ref,            # [patch_dim, DV] bf16 , [1, DV] f32
    wv_ref, bv_ref,            # [DV, DL]       bf16 , [1, DL] f32
    wlmrec_ref,                # [DL, V_CAP+DL] bf16   (fused [w_lm | w_rec])
    blm_ref, brec_ref,         # [1, V_CAP] f32 , [1, DL] f32
    ecapin_ref,                # [V_CAP, DL] bf16      (precomputed e_cap @ w_in)
    etr_ref,                   # [V_CAP, DT] bf16
    wenc_ref, benc_ref,        # [DT, DT] bf16 , [1, DT] f32
    wout_ref, bout_ref,        # [DT, V_TR] bf16 , [1, V_TR] f32
    cap_ref,                   # out: [B_PAD, T_GEN] int32
    out_ref,                   # out: [B_PAD, 1] int32
    *, n_patch):
    # ---- stage A: vision frontend (patch-embed + gelu + mean-pool + proj) ----
    feats = jnp.dot(patches_ref[...].astype(jnp.bfloat16), wp_ref[...],
                    preferred_element_type=jnp.float32)
    feats = jax.nn.gelu(feats + bp_ref[...], approximate=True)          # [B*P, DV]
    pooled_v = jnp.mean(feats.reshape(B_PAD, n_patch, DV), axis=1)      # [B, DV]
    h = jnp.dot(pooled_v.astype(jnp.bfloat16), wv_ref[...],
                preferred_element_type=jnp.float32) + bv_ref[...]       # [B, DL] f32

    # ---- hoisted loop invariants (JAX does not CSE broadcast_in_dim) ----
    w_lmrec = wlmrec_ref[...]                                           # bf16
    e_cap_in = ecapin_ref[...]                                          # bf16
    e_tr = etr_ref[...]                                                 # bf16
    w_enc = wenc_ref[...]                                               # bf16
    b_lm = jnp.broadcast_to(blm_ref[...], (B_PAD, V_CAP))
    b_rec = jnp.broadcast_to(brec_ref[...], (B_PAD, DL))
    b_enc = jnp.broadcast_to(benc_ref[...], (B_PAD, DT))
    vocab_iota = lax.broadcasted_iota(jnp.int32, (B_PAD, V_CAP), 1)
    step_iota = lax.broadcasted_iota(jnp.int32, (B_PAD, T_GEN), 1)

    def encode_pos(onehot_bf16):
        # translation "pipeline2" per-position path: embed -> encoder -> gelu
        emb = jnp.dot(onehot_bf16, e_tr, preferred_element_type=jnp.float32)
        return jax.nn.gelu(
            jnp.dot(emb.astype(jnp.bfloat16), w_enc,
                    preferred_element_type=jnp.float32) + b_enc,
            approximate=True)                                           # [B, DT] f32

    # "there " prefix position encoded once, before the decode loop.
    prefix_onehot = (vocab_iota == PREFIX_TOKEN).astype(jnp.bfloat16)
    pool0 = encode_pos(prefix_onehot)                                   # [B, DT] f32

    # ---- stage B + C: greedy decode with the translation encoder fused in ----
    def body(t, carry):
        h, toks, pool_acc = carry
        # ONE fused matmul for LM head + recurrence: h @ [w_lm | w_rec]
        hw = jnp.dot(h.astype(jnp.bfloat16), w_lmrec,
                     preferred_element_type=jnp.float32)                # [B, V+DL]
        logits = hw[:, :V_CAP] + b_lm
        h_rec = hw[:, V_CAP:]                                           # off crit-path
        tok = _argmax_lanes(logits, V_CAP)                              # [B, 1] int32
        toks = jnp.where(step_iota == t, tok, toks)                     # record token t
        # one-hot on the MXU (no cross-lane gather); reused by BOTH embeddings
        onehot = (vocab_iota == tok).astype(jnp.bfloat16)               # [B, V_CAP]
        # recurrence: h = tanh(h @ w_rec + onehot @ (e_cap @ w_in) + b)
        emb_rec = jnp.dot(onehot, e_cap_in, preferred_element_type=jnp.float32)
        h = jnp.tanh(h_rec + emb_rec + b_rec)
        # translation encoder contribution for this token (off the recurrence path)
        pool_acc = pool_acc + encode_pos(onehot)
        return h, toks, pool_acc

    toks0 = jnp.zeros((B_PAD, T_GEN), jnp.int32)
    _, toks, pool_acc = lax.fori_loop(0, T_GEN, body, (h, toks0, pool0),
                                      unroll=True)

    cap_ref[...] = toks                                                 # caption ids

    # ---- translation output head over the mean-pooled 9 real positions ----
    pooled_t = pool_acc * (1.0 / S_VALID)                               # [B, DT]
    tr_logits = jnp.dot(pooled_t.astype(jnp.bfloat16), wout_ref[...],
                        preferred_element_type=jnp.float32) + bout_ref[...]
    out_ref[...] = _argmax_lanes(tr_logits, V_TR)                       # [B, 1]


# ----------------------------- pallas_call plumbing ----------------------------
def _full_spec(shape):
    nd = len(shape)
    # Full-array blocks (legal regardless of (8,128) since block == array dims).
    return pl.BlockSpec(shape, lambda *_: (0,) * nd)


# ----------------------------- parameters (deterministic) ---------------------
def init_params(key, c_in):
    patch_dim = c_in * PATCH * PATCH
    ks = jax.random.split(key, 12)
    f32 = lambda k, shp, s=0.05: jax.random.normal(k, shp, jnp.float32) * s
    # f32 masters; matmul operands cast to bf16 once, biases stay f32 (v5e VPU).
    w_lm = f32(ks[4], (DL, V_CAP))
    w_rec = f32(ks[7], (DL, DL))
    w_in = f32(ks[8], (DL, DL))
    e_cap = f32(ks[6], (V_CAP, DL))
    return {
        # vision patch embedding (== Conv2d(C, DV, kernel=PATCH, stride=PATCH) flattened)
        "w_patch": f32(ks[0], (patch_dim, DV)).astype(jnp.bfloat16),
        "b_patch": f32(ks[1], (1, DV)),
        # vision -> language projection (applied on mean-pooled patch features)
        "w_vproj": f32(ks[2], (DV, DL)).astype(jnp.bfloat16),
        "b_vproj": f32(ks[3], (1, DL)),
        # fused LM head + recurrence weight  [w_lm | w_rec]  (one N=384 matmul/step)
        "w_lmrec": jnp.concatenate([w_lm, w_rec], axis=1).astype(jnp.bfloat16),
        "b_lm": f32(ks[5], (1, V_CAP)),
        "b_rec": jnp.zeros((1, DL), jnp.float32),
        # precomputed e_cap @ w_in (f32 accumulate at init, single bf16 cast)
        "e_cap_in": (e_cap @ w_in).astype(jnp.bfloat16),
        # translation "pipeline2": source embedding, encoder layer, output head
        "e_tr": f32(ks[9], (V_CAP, DT)).astype(jnp.bfloat16),
        "w_enc": f32(ks[10], (DT, DT)).astype(jnp.bfloat16),
        "b_enc": jnp.zeros((1, DT), jnp.float32),
        "w_out": f32(ks[11], (DT, V_TR)).astype(jnp.bfloat16),
        "b_out": jnp.zeros((1, V_TR), jnp.float32),
    }


# ----------------------------- forward ----------------------------------------
def forward(params, x):
    """Surrogate of Image2Translation.forward: NCHW image -> translated token ids."""
    B, C, H, W = x.shape
    assert B <= B_PAD
    patch_dim = C * PATCH * PATCH
    assert (C * H * W) % patch_dim == 0
    n_patch = (C * H * W) // patch_dim

    # pad batch to a full sublane group (padded rows are independent & sliced off).
    xp = jnp.pad(x, ((0, B_PAD - B), (0, 0), (0, 0), (0, 0)))
    # Surrogate patch grouping: contiguous patch_dim-element chunks of the flat
    # NCHW image — a PURE reshape (no HBM transpose op). With random surrogate
    # weights this is equivalent to square patches up to a fixed permutation.
    # TODO(synk): a real ViT patch-embed would need the NCHW->patch transpose.
    patches = xp.reshape(B_PAD * n_patch, patch_dim)

    args = (patches,
            params["w_patch"], params["b_patch"],
            params["w_vproj"], params["b_vproj"],
            params["w_lmrec"], params["b_lm"], params["b_rec"],
            params["e_cap_in"], params["e_tr"],
            params["w_enc"], params["b_enc"],
            params["w_out"], params["b_out"])

    # ONE gridless pallas_call: vision tower, greedy generate, "there " prefix,
    # and the translation pipeline all stay VMEM-resident.
    cap_tokens, out_tok = pl.pallas_call(
        functools.partial(_image2translation_kernel, n_patch=n_patch),
        out_shape=(jax.ShapeDtypeStruct((B_PAD, T_GEN), jnp.int32),
                   jax.ShapeDtypeStruct((B_PAD, 1), jnp.int32)),
        in_specs=[_full_spec(a.shape) for a in args],
        out_specs=(_full_spec((B_PAD, T_GEN)), _full_spec((B_PAD, 1))),
    )(*args)

    # Original module returns `translation_text` (a string); return the surrogate
    # translated token ids plus the generated caption token ids (real batch only).
    return out_tok[:B, 0], cap_tokens[:B]


# ----------------------------- main --------------------------------------------
if __name__ == "__main__":
    key = jax.random.PRNGKey(0)
    k_x, k_p = jax.random.split(key)
    # x corresponds to processor(image) pixel_values: NCHW, small synthetic shape.
    x = jax.random.normal(k_x, (2, 4, 16, 16), dtype=jnp.float32)
    params = init_params(k_p, c_in=4)

    fwd = jax.jit(forward)
    out_tokens, cap_tokens = fwd(params, x)
    jax.block_until_ready((out_tokens, cap_tokens))

    assert out_tokens.shape == (2,)
    assert cap_tokens.shape == (2, T_GEN)
    print("KERNEL_OK")
</pallas_src>

<mosaic_0001>
module attributes {stable_mosaic.version = 11 : i64} {
  func.func @_image2translation_kernel(%arg0: memref<128x64xf32, #tpu.memory_space<vmem>>, %arg1: memref<64x128xbf16, #tpu.memory_space<vmem>>, %arg2: memref<1x128xf32, #tpu.memory_space<vmem>>, %arg3: memref<128x128xbf16, #tpu.memory_space<vmem>>, %arg4: memref<1x128xf32, #tpu.memory_space<vmem>>, %arg5: memref<128x384xbf16, #tpu.memory_space<vmem>>, %arg6: memref<1x256xf32, #tpu.memory_space<vmem>>, %arg7: memref<1x128xf32, #tpu.memory_space<vmem>>, %arg8: memref<256x128xbf16, #tpu.memory_space<vmem>>, %arg9: memref<256x128xbf16, #tpu.memory_space<vmem>>, %arg10: memref<128x128xbf16, #tpu.memory_space<vmem>>, %arg11: memref<1x128xf32, #tpu.memory_space<vmem>>, %arg12: memref<128x256xbf16, #tpu.memory_space<vmem>>, %arg13: memref<1x256xf32, #tpu.memory_space<vmem>>, %arg14: memref<8x8xi32, #tpu.memory_space<vmem>>, %arg15: memref<8x1xi32, #tpu.memory_space<vmem>>) attributes {dimension_semantics = [], scalar_prefetch = 0 : i64, scratch_operands = 0 : i64, tpu.core_type = #tpu.core_type<tc>} {
    %c0 = arith.constant 0 : index
    %c0_0 = arith.constant 0 : index
    %0 = vector.load %arg0[%c0, %c0_0] : memref<128x64xf32, #tpu.memory_space<vmem>>, vector<128x64xf32>
    %1 = arith.truncf %0 : vector<128x64xf32> to vector<128x64xbf16>
    %c0_1 = arith.constant 0 : index
    %c0_2 = arith.constant 0 : index
    %2 = vector.load %arg1[%c0_1, %c0_2] : memref<64x128xbf16, #tpu.memory_space<vmem>>, vector<64x128xbf16>
    %cst = arith.constant dense<0.000000e+00> : vector<128x128xf32>
    %3 = tpu.matmul %1, %2, %cst {dimension_numbers = #tpu.dot_dimension_numbers<[1], [0], [0], [1], [0, 0, 1, 1], [], []>} : vector<128x64xbf16>, vector<64x128xbf16>, vector<128x128xf32> -> vector<128x128xf32>
    %c0_3 = arith.constant 0 : index
    %c0_4 = arith.constant 0 : index
    %4 = vector.load %arg2[%c0_3, %c0_4] : memref<1x128xf32, #tpu.memory_space<vmem>>, vector<1x128xf32>
    %5 = vector.broadcast %4 : vector<1x128xf32> to vector<128x128xf32>
    %6 = arith.addf %3, %5 : vector<128x128xf32>
    %7 = arith.mulf %6, %6 : vector<128x128xf32>
    %8 = arith.mulf %6, %7 : vector<128x128xf32>
    %cst_5 = arith.constant 4.471500e-02 : f32
    %9 = vector.broadcast %cst_5 : f32 to vector<128x128xf32>
    %10 = arith.mulf %9, %8 : vector<128x128xf32>
    %11 = arith.addf %6, %10 : vector<128x128xf32>
    %cst_6 = arith.constant 0.797884583 : f32
    %12 = vector.broadcast %cst_6 : f32 to vector<128x128xf32>
    %13 = arith.mulf %12, %11 : vector<128x128xf32>
    %14 = math.tanh %13 : vector<128x128xf32>
    %cst_7 = arith.constant 1.000000e+00 : f32
    %15 = vector.broadcast %cst_7 : f32 to vector<128x128xf32>
    %16 = arith.addf %15, %14 : vector<128x128xf32>
    %cst_8 = arith.constant 5.000000e-01 : f32
    %17 = vector.broadcast %cst_8 : f32 to vector<128x128xf32>
    %18 = arith.mulf %17, %16 : vector<128x128xf32>
    %19 = arith.mulf %6, %18 : vector<128x128xf32>
    %20 = vector.shape_cast %19 : vector<128x128xf32> to vector<8x16x128xf32>
    %cst_9 = arith.constant dense<0.000000e+00> : vector<8x128xf32>
    %21 = vector.multi_reduction <add>, %20, %cst_9 [1] : vector<8x16x128xf32> to vector<8x128xf32>
    %cst_10 = arith.constant 1.600000e+01 : f32
    %22 = vector.broadcast %cst_10 : f32 to vector<8x128xf32>
    %23 = arith.divf %21, %22 : vector<8x128xf32>
    %24 = arith.truncf %23 : vector<8x128xf32> to vector<8x128xbf16>
    %c0_11 = arith.constant 0 : index
    %c0_12 = arith.constant 0 : index
    %25 = vector.load %arg3[%c0_11, %c0_12] : memref<128x128xbf16, #tpu.memory_space<vmem>>, vector<128x128xbf16>
    %cst_13 = arith.constant dense<0.000000e+00> : vector<8x128xf32>
    %26 = tpu.matmul %24, %25, %cst_13 {dimension_numbers = #tpu.dot_dimension_numbers<[1], [0], [0], [1], [0, 0, 1, 1], [], []>} : vector<8x128xbf16>, vector<128x128xbf16>, vector<8x128xf32> -> vector<8x128xf32>
    %c0_14 = arith.constant 0 : index
    %c0_15 = arith.constant 0 : index
    %27 = vector.load %arg4[%c0_14, %c0_15] : memref<1x128xf32, #tpu.memory_space<vmem>>, vector<1x128xf32>
    %28 = vector.broadcast %27 : vector<1x128xf32> to vector<8x128xf32>
    %29 = arith.addf %26, %28 : vector<8x128xf32>
    %c0_16 = arith.constant 0 : index
    %c0_17 = arith.constant 0 : index
    %30 = vector.load %arg5[%c0_16, %c0_17] : memref<128x384xbf16, #tpu.memory_space<vmem>>, vector<128x384xbf16>
    %c0_18 = arith.constant 0 : index
    %c0_19 = arith.constant 0 : index
    %31 = vector.load %arg8[%c0_18, %c0_19] : memref<256x128xbf16, #tpu.memory_space<vmem>>, vector<256x128xbf16>
    %c0_20 = arith.constant 0 : index
    %c0_21 = arith.constant 0 : index
    %32 = vector.load %arg9[%c0_20, %c0_21] : memref<256x128xbf16, #tpu.memory_space<vmem>>, vector<256x128xbf16>
    %c0_22 = arith.constant 0 : index
    %c0_23 = arith.constant 0 : index
    %33 = vector.load %arg10[%c0_22, %c0_23] : memref<128x128xbf16, #tpu.memory_space<vmem>>, vector<128x128xbf16>
    %c0_24 = arith.constant 0 : index
    %c0_25 = arith.constant 0 : index
    %34 = vector.load %arg6[%c0_24, %c0_25] : memref<1x256xf32, #tpu.memory_space<vmem>>, vector<1x256xf32>
    %35 = vector.shape_cast %34 : vector<1x256xf32> to vector<1x256xf32>
    %36 = vector.broadcast %35 : vector<1x256xf32> to vector<8x256xf32>
    %c0_26 = arith.constant 0 : index
    %c0_27 = arith.constant 0 : index
    %37 = vector.load %arg7[%c0_26, %c0_27] : memref<1x128xf32, #tpu.memory_space<vmem>>, vector<1x128xf32>
    %38 = vector.shape_cast %37 : vector<1x128xf32> to vector<1x128xf32>
    %39 = vector.broadcast %38 : vector<1x128xf32> to vector<8x128xf32>
    %c0_28 = arith.constant 0 : index
    %c0_29 = arith.constant 0 : index
    %40 = vector.load %arg11[%c0_28, %c0_29] : memref<1x128xf32, #tpu.memory_space<vmem>>, vector<1x128xf32>
    %41 = vector.shape_cast %40 : vector<1x128xf32> to vector<1x128xf32>
    %42 = vector.broadcast %41 : vector<1x128xf32> to vector<8x128xf32>
    %43 = tpu.iota {dimensions = array<i32: 1>} : vector<8x256xi32>
    %44 = tpu.iota {dimensions = array<i32: 1>} : vector<8x8xi32>
    %c7_i32 = arith.constant 7 : i32
    %45 = vector.broadcast %c7_i32 : i32 to vector<8x256xi32>
    %46 = arith.cmpi eq, %43, %45 : vector<8x256xi32>
    %47 = arith.extui %46 : vector<8x256xi1> to vector<8x256xi32>
    %48 = arith.sitofp %47 : vector<8x256xi32> to vector<8x256xf32>
    %49 = arith.truncf %48 : vector<8x256xf32> to vector<8x256xbf16>
    %cst_30 = arith.constant dense<0.000000e+00> : vector<8x128xf32>
    %50 = tpu.matmul %49, %32, %cst_30 {dimension_numbers = #tpu.dot_dimension_numbers<[1], [0], [0], [1], [0, 0, 1, 1], [], []>} : vector<8x256xbf16>, vector<256x128xbf16>, vector<8x128xf32> -> vector<8x128xf32>
    %51 = arith.truncf %50 : vector<8x128xf32> to vector<8x128xbf16>
    %cst_31 = arith.constant dense<0.000000e+00> : vector<8x128xf32>
    %52 = tpu.matmul %51, %33, %cst_31 {dimension_numbers = #tpu.dot_dimension_numbers<[1], [0], [0], [1], [0, 0, 1, 1], [], []>} : vector<8x128xbf16>, vector<128x128xbf16>, vector<8x128xf32> -> vector<8x128xf32>
    %53 = arith.addf %52, %42 : vector<8x128xf32>
    %54 = arith.mulf %53, %53 : vector<8x128xf32>
    %55 = arith.mulf %53, %54 : vector<8x128xf32>
    %cst_32 = arith.constant 4.471500e-02 : f32
    %56 = vector.broadcast %cst_32 : f32 to vector<8x128xf32>
    %57 = arith.mulf %56, %55 : vector<8x128xf32>
    %58 = arith.addf %53, %57 : vector<8x128xf32>
    %cst_33 = arith.constant 0.797884583 : f32
    %59 = vector.broadcast %cst_33 : f32 to vector<8x128xf32>
    %60 = arith.mulf %59, %58 : vector<8x128xf32>
    %61 = math.tanh %60 : vector<8x128xf32>
    %cst_34 = arith.constant 1.000000e+00 : f32
    %62 = vector.broadcast %cst_34 : f32 to vector<8x128xf32>
    %63 = arith.addf %62, %61 : vector<8x128xf32>
    %cst_35 = arith.constant 5.000000e-01 : f32
    %64 = vector.broadcast %cst_35 : f32 to vector<8x128xf32>
    %65 = arith.mulf %64, %63 : vector<8x128xf32>
    %66 = arith.mulf %53, %65 : vector<8x128xf32>
    %c0_i32 = arith.constant 0 : i32
    %67 = vector.broadcast %c0_i32 : i32 to vector<8x8xi32>
    %c0_i32_36 = arith.constant 0 : i32
    %68 = arith.truncf %29 : vector<8x128xf32> to vector<8x128xbf16>
    %cst_37 = arith.constant dense<0.000000e+00> : vector<8x384xf32>
    %69 = tpu.matmul %68, %30, %cst_37 {dimension_numbers = #tpu.dot_dimension_numbers<[1], [0], [0], [1], [0, 0, 1, 1], [], []>} : vector<8x128xbf16>, vector<128x384xbf16>, vector<8x384xf32> -> vector<8x384xf32>
    %70 = vector.extract_strided_slice %69 {offsets = [0, 0], sizes = [8, 256], strides = [1, 1]} : vector<8x384xf32> to vector<8x256xf32>
    %71 = arith.addf %70, %36 : vector<8x256xf32>
    %72 = vector.extract_strided_slice %69 {offsets = [0, 256], sizes = [8, 128], strides = [1, 1]} : vector<8x384xf32> to vector<8x128xf32>
    %73 = tpu.iota {dimensions = array<i32: 1>} : vector<8x256xi32>
    %cst_38 = arith.constant dense<0xFF800000> : vector<8xf32>
    %74 = vector.multi_reduction <maximumf>, %71, %cst_38 [1] : vector<8x256xf32> to vector<8xf32>
    %75 = vector.shape_cast %74 : vector<8xf32> to vector<8x1xf32>
    %76 = vector.broadcast %75 : vector<8x1xf32> to vector<8x256xf32>
    %77 = arith.cmpf oeq, %71, %76 : vector<8x256xf32>
    %c256_i32 = arith.constant 256 : i32
    %78 = vector.broadcast %c256_i32 : i32 to vector<8x256xi32>
    %79 = arith.select %77, %73, %78 : vector<8x256xi1>, vector<8x256xi32>
    %cst_39 = arith.constant dense<2147483647> : vector<8xi32>
    %80 = vector.multi_reduction <minsi>, %79, %cst_39 [1] : vector<8x256xi32> to vector<8xi32>
    %81 = vector.shape_cast %80 : vector<8xi32> to vector<8x1xi32>
    %82 = vector.broadcast %c0_i32_36 : i32 to vector<8x8xi32>
    %83 = arith.cmpi eq, %44, %82 : vector<8x8xi32>
    %84 = vector.shape_cast %81 : vector<8x1xi32> to vector<8x1xi32>
    %85 = vector.broadcast %84 : vector<8x1xi32> to vector<8x8xi32>
    %86 = arith.select %83, %85, %67 : vector<8x8xi1>, vector<8x8xi32>
    %87 = vector.broadcast %81 : vector<8x1xi32> to vector<8x256xi32>
    %88 = arith.cmpi eq, %43, %87 : vector<8x256xi32>
    %89 = arith.extui %88 : vector<8x256xi1> to vector<8x256xi32>
    %90 = arith.sitofp %89 : vector<8x256xi32> to vector<8x256xf32>
    %91 = arith.truncf %90 : vector<8x256xf32> to vector<8x256xbf16>
    %cst_40 = arith.constant dense<0.000000e+00> : vector<8x128xf32>
    %92 = tpu.matmul %91, %31, %cst_40 {dimension_numbers = #tpu.dot_dimension_numbers<[1], [0], [0], [1], [0, 0, 1, 1], [], []>} : vector<8x256xbf16>, vector<256x128xbf16>, vector<8x128xf32> -> vector<8x128xf32>
    %93 = arith.addf %72, %92 : vector<8x128xf32>
    %94 = arith.addf %93, %39 : vector<8x128xf32>
    %95 = math.tanh %94 : vector<8x128xf32>
    %cst_41 = arith.constant dense<0.000000e+00> : vector<8x128xf32>
    %96 = tpu.matmul %91, %32, %cst_41 {dimension_numbers = #tpu.dot_dimension_numbers<[1], [0], [0], [1], [0, 0, 1, 1], [], []>} : vector<8x256xbf16>, vector<256x128xbf16>, vector<8x128xf32> -> vector<8x128xf32>
    %97 = arith.truncf %96 : vector<8x128xf32> to vector<8x128xbf16>
    %cst_42 = arith.constant dense<0.000000e+00> : vector<8x128xf32>
    %98 = tpu.matmul %97, %33, %cst_42 {dimension_numbers = #tpu.dot_dimension_numbers<[1], [0], [0], [1], [0, 0, 1, 1], [], []>} : vector<8x128xbf16>, vector<128x128xbf16>, vector<8x128xf32> -> vector<8x128xf32>
    %99 = arith.addf %98, %42 : vector<8x128xf32>
    %100 = arith.mulf %99, %99 : vector<8x128xf32>
    %101 = arith.mulf %99, %100 : vector<8x128xf32>
    %cst_43 = arith.constant 4.471500e-02 : f32
    %102 = vector.broadcast %cst_43 : f32 to vector<8x128xf32>
    %103 = arith.mulf %102, %101 : vector<8x128xf32>
    %104 = arith.addf %99, %103 : vector<8x128xf32>
    %cst_44 = arith.constant 0.797884583 : f32
    %105 = vector.broadcast %cst_44 : f32 to vector<8x128xf32>
    %106 = arith.mulf %105, %104 : vector<8x128xf32>
    %107 = math.tanh %106 : vector<8x128xf32>
    %cst_45 = arith.constant 1.000000e+00 : f32
    %108 = vector.broadcast %cst_45 : f32 to vector<8x128xf32>
    %109 = arith.addf %108, %107 : vector<8x128xf32>
    %cst_46 = arith.constant 5.000000e-01 : f32
    %110 = vector.broadcast %cst_46 : f32 to vector<8x128xf32>
    %111 = arith.mulf %110, %109 : vector<8x128xf32>
    %112 = arith.mulf %99, %111 : vector<8x128xf32>
    %113 = arith.addf %66, %112 : vector<8x128xf32>
    %c1_i32 = arith.constant 1 : i32
    %114 = arith.truncf %95 : vector<8x128xf32> to vector<8x128xbf16>
    %cst_47 = arith.constant dense<0.000000e+00> : vector<8x384xf32>
    %115 = tpu.matmul %114, %30, %cst_47 {dimension_numbers = #tpu.dot_dimension_numbers<[1], [0], [0], [1], [0, 0, 1, 1], [], []>} : vector<8x128xbf16>, vector<128x384xbf16>, vector<8x384xf32> -> vector<8x384xf32>
    %116 = vector.extract_strided_slice %115 {offsets = [0, 0], sizes = [8, 256], strides = [1, 1]} : vector<8x384xf32> to vector<8x256xf32>
    %117 = arith.addf %116, %36 : vector<8x256xf32>
    %118 = vector.extract_strided_slice %115 {offsets = [0, 256], sizes = [8, 128], strides = [1, 1]} : vector<8x384xf32> to vector<8x128xf32>
    %119 = tpu.iota {dimensions = array<i32: 1>} : vector<8x256xi32>
    %cst_48 = arith.constant dense<0xFF800000> : vector<8xf32>
    %120 = vector.multi_reduction <maximumf>, %117, %cst_48 [1] : vector<8x256xf32> to vector<8xf32>
    %121 = vector.shape_cast %120 : vector<8xf32> to vector<8x1xf32>
    %122 = vector.broadcast %121 : vector<8x1xf32> to vector<8x256xf32>
    %123 = arith.cmpf oeq, %117, %122 : vector<8x256xf32>
    %c256_i32_49 = arith.constant 256 : i32
    %124 = vector.broadcast %c256_i32_49 : i32 to vector<8x256xi32>
    %125 = arith.select %123, %119, %124 : vector<8x256xi1>, vector<8x256xi32>
    %cst_50 = arith.constant dense<2147483647> : vector<8xi32>
    %126 = vector.multi_reduction <minsi>, %125, %cst_50 [1] : vector<8x256xi32> to vector<8xi32>
    %127 = vector.shape_cast %126 : vector<8xi32> to vector<8x1xi32>
    %128 = vector.broadcast %c1_i32 : i32 to vector<8x8xi32>
    %129 = arith.cmpi eq, %44, %128 : vector<8x8xi32>
    %130 = vector.shape_cast %127 : vector<8x1xi32> to vector<8x1xi32>
    %131 = vector.broadcast %130 : vector<8x1xi32> to vector<8x8xi32>
    %132 = arith.select %129, %131, %86 : vector<8x8xi1>, vector<8x8xi32>
    %133 = vector.broadcast %127 : vector<8x1xi32> to vector<8x256xi32>
    %134 = arith.cmpi eq, %43, %133 : vector<8x256xi32>
    %135 = arith.extui %134 : vector<8x256xi1> to vector<8x256xi32>
    %136 = arith.sitofp %135 : vector<8x256xi32> to vector<8x256xf32>
    %137 = arith.truncf %136 : vector<8x256xf32> to vector<8x256xbf16>
    %cst_51 = arith.constant dense<0.000000e+00> : vector<8x128xf32>
    %138 = tpu.matmul %137, %31, %cst_51 {dimension_numbers = #tpu.dot_dimension_numbers<[1], [0], [0], [1], [0, 0, 1, 1], [], []>} : vector<8x256xbf16>, vector<256x128xbf16>, vector<8x128xf32> -> vector<8x128xf32>
    %139 = arith.addf %118, %138 : vector<8x128xf32>
    %140 = arith.addf %139, %39 : vector<8x128xf32>
    %141 = math.tanh %140 : vector<8x128xf32>
    %cst_52 = arith.constant dense<0.000000e+00> : vector<8x128xf32>
    %142 = tpu.matmul %137, %32, %cst_52 {dimension_numbers = #tpu.dot_dimension_numbers<[1], [0], [0], [1], [0, 0, 1, 1], [], []>} : vector<8x256xbf16>, vector<256x128xbf16>, vector<8x128xf32> -> vector<8x128xf32>
    %143 = arith.truncf %142 : vector<8x128xf32> to vector<8x128xbf16>
    %cst_53 = arith.constant dense<0.000000e+00> : vector<8x128xf32>
    %144 = tpu.matmul %143, %33, %cst_53 {dimension_numbers = #tpu.dot_dimension_numbers<[1], [0], [0], [1], [0, 0, 1, 1], [], []>} : vector<8x128xbf16>, vector<128x128xbf16>, vector<8x128xf32> -> vector<8x128xf32>
    %145 = arith.addf %144, %42 : vector<8x128xf32>
    %146 = arith.mulf %145, %145 : vector<8x128xf32>
    %147 = arith.mulf %145, %146 : vector<8x128xf32>
    %cst_54 = arith.constant 4.471500e-02 : f32
    %148 = vector.broadcast %cst_54 : f32 to vector<8x128xf32>
    %149 = arith.mulf %148, %147 : vector<8x128xf32>
    %150 = arith.addf %145, %149 : vector<8x128xf32>
    %cst_55 = arith.constant 0.797884583 : f32
    %151 = vector.broadcast %cst_55 : f32 to vector<8x128xf32>
    %152 = arith.mulf %151, %150 : vector<8x128xf32>
    %153 = math.tanh %152 : vector<8x128xf32>
    %cst_56 = arith.constant 1.000000e+00 : f32
    %154 = vector.broadcast %cst_56 : f32 to vector<8x128xf32>
    %155 = arith.addf %154, %153 : vector<8x128xf32>
    %cst_57 = arith.constant 5.000000e-01 : f32
    %156 = vector.broadcast %cst_57 : f32 to vector<8x128xf32>
    %157 = arith.mulf %156, %155 : vector<8x128xf32>
    %158 = arith.mulf %145, %157 : vector<8x128xf32>
    %159 = arith.addf %113, %158 : vector<8x128xf32>
    %c2_i32 = arith.constant 2 : i32
    %160 = arith.truncf %141 : vector<8x128xf32> to vector<8x128xbf16>
    %cst_58 = arith.constant dense<0.000000e+00> : vector<8x384xf32>
    %161 = tpu.matmul %160, %30, %cst_58 {dimension_numbers = #tpu.dot_dimension_numbers<[1], [0], [0], [1], [0, 0, 1, 1], [], []>} : vector<8x128xbf16>, vector<128x384xbf16>, vector<8x384xf32> -> vector<8x384xf32>
    %162 = vector.extract_strided_slice %161 {offsets = [0, 0], sizes = [8, 256], strides = [1, 1]} : vector<8x384xf32> to vector<8x256xf32>
    %163 = arith.addf %162, %36 : vector<8x256xf32>
    %164 = vector.extract_strided_slice %161 {offsets = [0, 256], sizes = [8, 128], strides = [1, 1]} : vector<8x384xf32> to vector<8x128xf32>
    %165 = tpu.iota {dimensions = array<i32: 1>} : vector<8x256xi32>
    %cst_59 = arith.constant dense<0xFF800000> : vector<8xf32>
    %166 = vector.multi_reduction <maximumf>, %163, %cst_59 [1] : vector<8x256xf32> to vector<8xf32>
    %167 = vector.shape_cast %166 : vector<8xf32> to vector<8x1xf32>
    %168 = vector.broadcast %167 : vector<8x1xf32> to vector<8x256xf32>
    %169 = arith.cmpf oeq, %163, %168 : vector<8x256xf32>
    %c256_i32_60 = arith.constant 256 : i32
    %170 = vector.broadcast %c256_i32_60 : i32 to vector<8x256xi32>
    %171 = arith.select %169, %165, %170 : vector<8x256xi1>, vector<8x256xi32>
    %cst_61 = arith.constant dense<2147483647> : vector<8xi32>
    %172 = vector.multi_reduction <minsi>, %171, %cst_61 [1] : vector<8x256xi32> to vector<8xi32>
    %173 = vector.shape_cast %172 : vector<8xi32> to vector<8x1xi32>
    %174 = vector.broadcast %c2_i32 : i32 to vector<8x8xi32>
    %175 = arith.cmpi eq, %44, %174 : vector<8x8xi32>
    %176 = vector.shape_cast %173 : vector<8x1xi32> to vector<8x1xi32>
    %177 = vector.broadcast %176 : vector<8x1xi32> to vector<8x8xi32>
    %178 = arith.select %175, %177, %132 : vector<8x8xi1>, vector<8x8xi32>
    %179 = vector.broadcast %173 : vector<8x1xi32> to vector<8x256xi32>
    %180 = arith.cmpi eq, %43, %179 : vector<8x256xi32>
    %181 = arith.extui %180 : vector<8x256xi1> to vector<8x256xi32>
    %182 = arith.sitofp %181 : vector<8x256xi32> to vector<8x256xf32>
    %183 = arith.truncf %182 : vector<8x256xf32> to vector<8x256xbf16>
    %cst_62 = arith.constant dense<0.000000e+00> : vector<8x128xf32>
    %184 = tpu.matmul %183, %31, %cst_62 {dimension_numbers = #tpu.dot_dimension_numbers<[1], [0], [0], [1], [0, 0, 1, 1], [], []>} : vector<8x256xbf16>, vector<256x128xbf16>, vector<8x128xf32> -> vector<8x128xf32>
    %185 = arith.addf %164, %184 : vector<8x128xf32>
    %186 = arith.addf %185, %39 : vector<8x128xf32>
    %187 = math.tanh %186 : vector<8x128xf32>
    %cst_63 = arith.constant dense<0.000000e+00> : vector<8x128xf32>
    %188 = tpu.matmul %183, %32, %cst_63 {dimension_numbers = #tpu.dot_dimension_numbers<[1], [0], [0], [1], [0, 0, 1, 1], [], []>} : vector<8x256xbf16>, vector<256x128xbf16>, vector<8x128xf32> -> vector<8x128xf32>
    %189 = arith.truncf %188 : vector<8x128xf32> to vector<8x128xbf16>
    %cst_64 = arith.constant dense<0.000000e+00> : vector<8x128xf32>
    %190 = tpu.matmul %189, %33, %cst_64 {dimension_numbers = #tpu.dot_dimension_numbers<[1], [0], [0], [1], [0, 0, 1, 1], [], []>} : vector<8x128xbf16>, vector<128x128xbf16>, vector<8x128xf32> -> vector<8x128xf32>
    %191 = arith.addf %190, %42 : vector<8x128xf32>
    %192 = arith.mulf %191, %191 : vector<8x128xf32>
    %193 = arith.mulf %191, %192 : vector<8x128xf32>
    %cst_65 = arith.constant 4.471500e-02 : f32
    %194 = vector.broadcast %cst_65 : f32 to vector<8x128xf32>
    %195 = arith.mulf %194, %193 : vector<8x128xf32>
    %196 = arith.addf %191, %195 : vector<8x128xf32>
    %cst_66 = arith.constant 0.797884583 : f32
    %197 = vector.broadcast %cst_66 : f32 to vector<8x128xf32>
    %198 = arith.mulf %197, %196 : vector<8x128xf32>
    %199 = math.tanh %198 : vector<8x128xf32>
    %cst_67 = arith.constant 1.000000e+00 : f32
    %200 = vector.broadcast %cst_67 : f32 to vector<8x128xf32>
    %201 = arith.addf %200, %199 : vector<8x128xf32>
    %cst_68 = arith.constant 5.000000e-01 : f32
    %202 = vector.broadcast %cst_68 : f32 to vector<8x128xf32>
    %203 = arith.mulf %202, %201 : vector<8x128xf32>
    %204 = arith.mulf %191, %203 : vector<8x128xf32>
    %205 = arith.addf %159, %204 : vector<8x128xf32>
    %c3_i32 = arith.constant 3 : i32
    %206 = arith.truncf %187 : vector<8x128xf32> to vector<8x128xbf16>
    %cst_69 = arith.constant dense<0.000000e+00> : vector<8x384xf32>
    %207 = tpu.matmul %206, %30, %cst_69 {dimension_numbers = #tpu.dot_dimension_numbers<[1], [0], [0], [1], [0, 0, 1, 1], [], []>} : vector<8x128xbf16>, vector<128x384xbf16>, vector<8x384xf32> -> vector<8x384xf32>
    %208 = vector.extract_strided_slice %207 {offsets = [0, 0], sizes = [8, 256], strides = [1, 1]} : vector<8x384xf32> to vector<8x256xf32>
    %209 = arith.addf %208, %36 : vector<8x256xf32>
    %210 = vector.extract_strided_slice %207 {offsets = [0, 256], sizes = [8, 128], strides = [1, 1]} : vector<8x384xf32> to vector<8x128xf32>
    %211 = tpu.iota {dimensions = array<i32: 1>} : vector<8x256xi32>
    %cst_70 = arith.constant dense<0xFF800000> : vector<8xf32>
    %212 = vector.multi_reduction <maximumf>, %209, %cst_70 [1] : vector<8x256xf32> to vector<8xf32>
    %213 = vector.shape_cast %212 : vector<8xf32> to vector<8x1xf32>
    %214 = vector.broadcast %213 : vector<8x1xf32> to vector<8x256xf32>
    %215 = arith.cmpf oeq, %209, %214 : vector<8x256xf32>
    %c256_i32_71 = arith.constant 256 : i32
    %216 = vector.broadcast %c256_i32_71 : i32 to vector<8x256xi32>
    %217 = arith.select %215, %211, %216 : vector<8x256xi1>, vector<8x256xi32>
    %cst_72 = arith.constant dense<2147483647> : vector<8xi32>
    %218 = vector.multi_reduction <minsi>, %217, %cst_72 [1] : vector<8x256xi32> to vector<8xi32>
    %219 = vector.shape_cast %218 : vector<8xi32> to vector<8x1xi32>
    %220 = vector.broadcast %c3_i32 : i32 to vector<8x8xi32>
    %221 = arith.cmpi eq, %44, %220 : vector<8x8xi32>
    %222 = vector.shape_cast %219 : vector<8x1xi32> to vector<8x1xi32>
    %223 = vector.broadcast %222 : vector<8x1xi32> to vector<8x8xi32>
    %224 = arith.select %221, %223, %178 : vector<8x8xi1>, vector<8x8xi32>
    %225 = vector.broadcast %219 : vector<8x1xi32> to vector<8x256xi32>
    %226 = arith.cmpi eq, %43, %225 : vector<8x256xi32>
    %227 = arith.extui %226 : vector<8x256xi1> to vector<8x256xi32>
    %228 = arith.sitofp %227 : vector<8x256xi32> to vector<8x256xf32>
    %229 = arith.truncf %228 : vector<8x256xf32> to vector<8x256xbf16>
    %cst_73 = arith.constant dense<0.000000e+00> : vector<8x128xf32>
    %230 = tpu.matmul %229, %31, %cst_73 {dimension_numbers = #tpu.dot_dimension_numbers<[1], [0], [0], [1], [0, 0, 1, 1], [], []>} : vector<8x256xbf16>, vector<256x128xbf16>, vector<8x128xf32> -> vector<8x128xf32>
    %231 = arith.addf %210, %230 : vector<8x128xf32>
    %232 = arith.addf %231, %39 : vector<8x128xf32>
    %233 = math.tanh %232 : vector<8x128xf32>
    %cst_74 = arith.constant dense<0.000000e+00> : vector<8x128xf32>
    %234 = tpu.matmul %229, %32, %cst_74 {dimension_numbers = #tpu.dot_dimension_numbers<[1], [0], [0], [1], [0, 0, 1, 1], [], []>} : vector<8x256xbf16>, vector<256x128xbf16>, vector<8x128xf32> -> vector<8x128xf32>
    %235 = arith.truncf %234 : vector<8x128xf32> to vector<8x128xbf16>
    %cst_75 = arith.constant dense<0.000000e+00> : vector<8x128xf32>
    %236 = tpu.matmul %235, %33, %cst_75 {dimension_numbers = #tpu.dot_dimension_numbers<[1], [0], [0], [1], [0, 0, 1, 1], [], []>} : vector<8x128xbf16>, vector<128x128xbf16>, vector<8x128xf32> -> vector<8x128xf32>
    %237 = arith.addf %236, %42 : vector<8x128xf32>
    %238 = arith.mulf %237, %237 : vector<8x128xf32>
    %239 = arith.mulf %237, %238 : vector<8x128xf32>
    %cst_76 = arith.constant 4.471500e-02 : f32
    %240 = vector.broadcast %cst_76 : f32 to vector<8x128xf32>
    %241 = arith.mulf %240, %239 : vector<8x128xf32>
    %242 = arith.addf %237, %241 : vector<8x128xf32>
    %cst_77 = arith.constant 0.797884583 : f32
    %243 = vector.broadcast %cst_77 : f32 to vector<8x128xf32>
    %244 = arith.mulf %243, %242 : vector<8x128xf32>
    %245 = math.tanh %244 : vector<8x128xf32>
    %cst_78 = arith.constant 1.000000e+00 : f32
    %246 = vector.broadcast %cst_78 : f32 to vector<8x128xf32>
    %247 = arith.addf %246, %245 : vector<8x128xf32>
    %cst_79 = arith.constant 5.000000e-01 : f32
    %248 = vector.broadcast %cst_79 : f32 to vector<8x128xf32>
    %249 = arith.mulf %248, %247 : vector<8x128xf32>
    %250 = arith.mulf %237, %249 : vector<8x128xf32>
    %251 = arith.addf %205, %250 : vector<8x128xf32>
    %c4_i32 = arith.constant 4 : i32
    %252 = arith.truncf %233 : vector<8x128xf32> to vector<8x128xbf16>
    %cst_80 = arith.constant dense<0.000000e+00> : vector<8x384xf32>
    %253 = tpu.matmul %252, %30, %cst_80 {dimension_numbers = #tpu.dot_dimension_numbers<[1], [0], [0], [1], [0, 0, 1, 1], [], []>} : vector<8x128xbf16>, vector<128x384xbf16>, vector<8x384xf32> -> vector<8x384xf32>
    %254 = vector.extract_strided_slice %253 {offsets = [0, 0], sizes = [8, 256], strides = [1, 1]} : vector<8x384xf32> to vector<8x256xf32>
    %255 = arith.addf %254, %36 : vector<8x256xf32>
    %256 = vector.extract_strided_slice %253 {offsets = [0, 256], sizes = [8, 128], strides = [1, 1]} : vector<8x384xf32> to vector<8x128xf32>
    %257 = tpu.iota {dimensions = array<i32: 1>} : vector<8x256xi32>
    %cst_81 = arith.constant dense<0xFF800000> : vector<8xf32>
    %258 = vector.multi_reduction <maximumf>, %255, %cst_81 [1] : vector<8x256xf32> to vector<8xf32>
    %259 = vector.shape_cast %258 : vector<8xf32> to vector<8x1xf32>
    %260 = vector.broadcast %259 : vector<8x1xf32> to vector<8x256xf32>
    %261 = arith.cmpf oeq, %255, %260 : vector<8x256xf32>
    %c256_i32_82 = arith.constant 256 : i32
    %262 = vector.broadcast %c256_i32_82 : i32 to vector<8x256xi32>
    %263 = arith.select %261, %257, %262 : vector<8x256xi1>, vector<8x256xi32>
    %cst_83 = arith.constant dense<2147483647> : vector<8xi32>
    %264 = vector.multi_reduction <minsi>, %263, %cst_83 [1] : vector<8x256xi32> to vector<8xi32>
    %265 = vector.shape_cast %264 : vector<8xi32> to vector<8x1xi32>
    %266 = vector.broadcast %c4_i32 : i32 to vector<8x8xi32>
    %267 = arith.cmpi eq, %44, %266 : vector<8x8xi32>
    %268 = vector.shape_cast %265 : vector<8x1xi32> to vector<8x1xi32>
    %269 = vector.broadcast %268 : vector<8x1xi32> to vector<8x8xi32>
    %270 = arith.select %267, %269, %224 : vector<8x8xi1>, vector<8x8xi32>
    %271 = vector.broadcast %265 : vector<8x1xi32> to vector<8x256xi32>
    %272 = arith.cmpi eq, %43, %271 : vector<8x256xi32>
    %273 = arith.extui %272 : vector<8x256xi1> to vector<8x256xi32>
    %274 = arith.sitofp %273 : vector<8x256xi32> to vector<8x256xf32>
    %275 = arith.truncf %274 : vector<8x256xf32> to vector<8x256xbf16>
    %cst_84 = arith.constant dense<0.000000e+00> : vector<8x128xf32>
    %276 = tpu.matmul %275, %31, %cst_84 {dimension_numbers = #tpu.dot_dimension_numbers<[1], [0], [0], [1], [0, 0, 1, 1], [], []>} : vector<8x256xbf16>, vector<256x128xbf16>, vector<8x128xf32> -> vector<8x128xf32>
    %277 = arith.addf %256, %276 : vector<8x128xf32>
    %278 = arith.addf %277, %39 : vector<8x128xf32>
    %279 = math.tanh %278 : vector<8x128xf32>
    %cst_85 = arith.constant dense<0.000000e+00> : vector<8x128xf32>
    %280 = tpu.matmul %275, %32, %cst_85 {dimension_numbers = #tpu.dot_dimension_numbers<[1], [0], [0], [1], [0, 0, 1, 1], [], []>} : vector<8x256xbf16>, vector<256x128xbf16>, vector<8x128xf32> -> vector<8x128xf32>
    %281 = arith.truncf %280 : vector<8x128xf32> to vector<8x128xbf16>
    %cst_86 = arith.constant dense<0.000000e+00> : vector<8x128xf32>
    %282 = tpu.matmul %281, %33, %cst_86 {dimension_numbers = #tpu.dot_dimension_numbers<[1], [0], [0], [1], [0, 0, 1, 1], [], []>} : vector<8x128xbf16>, vector<128x128xbf16>, vector<8x128xf32> -> vector<8x128xf32>
    %283 = arith.addf %282, %42 : vector<8x128xf32>
    %284 = arith.mulf %283, %283 : vector<8x128xf32>
    %285 = arith.mulf %283, %284 : vector<8x128xf32>
    %cst_87 = arith.constant 4.471500e-02 : f32
    %286 = vector.broadcast %cst_87 : f32 to vector<8x128xf32>
    %287 = arith.mulf %286, %285 : vector<8x128xf32>
    %288 = arith.addf %283, %287 : vector<8x128xf32>
    %cst_88 = arith.constant 0.797884583 : f32
    %289 = vector.broadcast %cst_88 : f32 to vector<8x128xf32>
    %290 = arith.mulf %289, %288 : vector<8x128xf32>
    %291 = math.tanh %290 : vector<8x128xf32>
    %cst_89 = arith.constant 1.000000e+00 : f32
    %292 = vector.broadcast %cst_89 : f32 to vector<8x128xf32>
    %293 = arith.addf %292, %291 : vector<8x128xf32>
    %cst_90 = arith.constant 5.000000e-01 : f32
    %294 = vector.broadcast %cst_90 : f32 to vector<8x128xf32>
    %295 = arith.mulf %294, %293 : vector<8x128xf32>
    %296 = arith.mulf %283, %295 : vector<8x128xf32>
    %297 = arith.addf %251, %296 : vector<8x128xf32>
    %c5_i32 = arith.constant 5 : i32
    %298 = arith.truncf %279 : vector<8x128xf32> to vector<8x128xbf16>
    %cst_91 = arith.constant dense<0.000000e+00> : vector<8x384xf32>
    %299 = tpu.matmul %298, %30, %cst_91 {dimension_numbers = #tpu.dot_dimension_numbers<[1], [0], [0], [1], [0, 0, 1, 1], [], []>} : vector<8x128xbf16>, vector<128x384xbf16>, vector<8x384xf32> -> vector<8x384xf32>
    %300 = vector.extract_strided_slice %299 {offsets = [0, 0], sizes = [8, 256], strides = [1, 1]} : vector<8x384xf32> to vector<8x256xf32>
    %301 = arith.addf %300, %36 : vector<8x256xf32>
    %302 = vector.extract_strided_slice %299 {offsets = [0, 256], sizes = [8, 128], strides = [1, 1]} : vector<8x384xf32> to vector<8x128xf32>
    %303 = tpu.iota {dimensions = array<i32: 1>} : vector<8x256xi32>
    %cst_92 = arith.constant dense<0xFF800000> : vector<8xf32>
    %304 = vector.multi_reduction <maximumf>, %301, %cst_92 [1] : vector<8x256xf32> to vector<8xf32>
    %305 = vector.shape_cast %304 : vector<8xf32> to vector<8x1xf32>
    %306 = vector.broadcast %305 : vector<8x1xf32> to vector<8x256xf32>
    %307 = arith.cmpf oeq, %301, %306 : vector<8x256xf32>
    %c256_i32_93 = arith.constant 256 : i32
    %308 = vector.broadcast %c256_i32_93 : i32 to vector<8x256xi32>
    %309 = arith.select %307, %303, %308 : vector<8x256xi1>, vector<8x256xi32>
    %cst_94 = arith.constant dense<2147483647> : vector<8xi32>
    %310 = vector.multi_reduction <minsi>, %309, %cst_94 [1] : vector<8x256xi32> to vector<8xi32>
    %311 = vector.shape_cast %310 : vector<8xi32> to vector<8x1xi32>
    %312 = vector.broadcast %c5_i32 : i32 to vector<8x8xi32>
    %313 = arith.cmpi eq, %44, %312 : vector<8x8xi32>
    %314 = vector.shape_cast %311 : vector<8x1xi32> to vector<8x1xi32>
    %315 = vector.broadcast %314 : vector<8x1xi32> to vector<8x8xi32>
    %316 = arith.select %313, %315, %270 : vector<8x8xi1>, vector<8x8xi32>
    %317 = vector.broadcast %311 : vector<8x1xi32> to vector<8x256xi32>
    %318 = arith.cmpi eq, %43, %317 : vector<8x256xi32>
    %319 = arith.extui %318 : vector<8x256xi1> to vector<8x256xi32>
    %320 = arith.sitofp %319 : vector<8x256xi32> to vector<8x256xf32>
    %321 = arith.truncf %320 : vector<8x256xf32> to vector<8x256xbf16>
    %cst_95 = arith.constant dense<0.000000e+00> : vector<8x128xf32>
    %322 = tpu.matmul %321, %31, %cst_95 {dimension_numbers = #tpu.dot_dimension_numbers<[1], [0], [0], [1], [0, 0, 1, 1], [], []>} : vector<8x256xbf16>, vector<256x128xbf16>, vector<8x128xf32> -> vector<8x128xf32>
    %323 = arith.addf %302, %322 : vector<8x128xf32>
    %324 = arith.addf %323, %39 : vector<8x128xf32>
    %325 = math.tanh %324 : vector<8x128xf32>
    %cst_96 = arith.constant dense<0.000000e+00> : vector<8x128xf32>
    %326 = tpu.matmul %321, %32, %cst_96 {dimension_numbers = #tpu.dot_dimension_numbers<[1], [0], [0], [1], [0, 0, 1, 1], [], []>} : vector<8x256xbf16>, vector<256x128xbf16>, vector<8x128xf32> -> vector<8x128xf32>
    %327 = arith.truncf %326 : vector<8x128xf32> to vector<8x128xbf16>
    %cst_97 = arith.constant dense<0.000000e+00> : vector<8x128xf32>
    %328 = tpu.matmul %327, %33, %cst_97 {dimension_numbers = #tpu.dot_dimension_numbers<[1], [0], [0], [1], [0, 0, 1, 1], [], []>} : vector<8x128xbf16>, vector<128x128xbf16>, vector<8x128xf32> -> vector<8x128xf32>
    %329 = arith.addf %328, %42 : vector<8x128xf32>
    %330 = arith.mulf %329, %329 : vector<8x128xf32>
    %331 = arith.mulf %329, %330 : vector<8x128xf32>
    %cst_98 = arith.constant 4.471500e-02 : f32
    %332 = vector.broadcast %cst_98 : f32 to vector<8x128xf32>
    %333 = arith.mulf %332, %331 : vector<8x128xf32>
    %334 = arith.addf %329, %333 : vector<8x128xf32>
    %cst_99 = arith.constant 0.797884583 : f32
    %335 = vector.broadcast %cst_99 : f32 to vector<8x128xf32>
    %336 = arith.mulf %335, %334 : vector<8x128xf32>
    %337 = math.tanh %336 : vector<8x128xf32>
    %cst_100 = arith.constant 1.000000e+00 : f32
    %338 = vector.broadcast %cst_100 : f32 to vector<8x128xf32>
    %339 = arith.addf %338, %337 : vector<8x128xf32>
    %cst_101 = arith.constant 5.000000e-01 : f32
    %340 = vector.broadcast %cst_101 : f32 to vector<8x128xf32>
    %341 = arith.mulf %340, %339 : vector<8x128xf32>
    %342 = arith.mulf %329, %341 : vector<8x128xf32>
    %343 = arith.addf %297, %342 : vector<8x128xf32>
    %c6_i32 = arith.constant 6 : i32
    %344 = arith.truncf %325 : vector<8x128xf32> to vector<8x128xbf16>
    %cst_102 = arith.constant dense<0.000000e+00> : vector<8x384xf32>
    %345 = tpu.matmul %344, %30, %cst_102 {dimension_numbers = #tpu.dot_dimension_numbers<[1], [0], [0], [1], [0, 0, 1, 1], [], []>} : vector<8x128xbf16>, vector<128x384xbf16>, vector<8x384xf32> -> vector<8x384xf32>
    %346 = vector.extract_strided_slice %345 {offsets = [0, 0], sizes = [8, 256], strides = [1, 1]} : vector<8x384xf32> to vector<8x256xf32>
    %347 = arith.addf %346, %36 : vector<8x256xf32>
    %348 = vector.extract_strided_slice %345 {offsets = [0, 256], sizes = [8, 128], strides = [1, 1]} : vector<8x384xf32> to vector<8x128xf32>
    %349 = tpu.iota {dimensions = array<i32: 1>} : vector<8x256xi32>
    %cst_103 = arith.constant dense<0xFF800000> : vector<8xf32>
    %350 = vector.multi_reduction <maximumf>, %347, %cst_103 [1] : vector<8x256xf32> to vector<8xf32>
    %351 = vector.shape_cast %350 : vector<8xf32> to vector<8x1xf32>
    %352 = vector.broadcast %351 : vector<8x1xf32> to vector<8x256xf32>
    %353 = arith.cmpf oeq, %347, %352 : vector<8x256xf32>
    %c256_i32_104 = arith.constant 256 : i32
    %354 = vector.broadcast %c256_i32_104 : i32 to vector<8x256xi32>
    %355 = arith.select %353, %349, %354 : vector<8x256xi1>, vector<8x256xi32>
    %cst_105 = arith.constant dense<2147483647> : vector<8xi32>
    %356 = vector.multi_reduction <minsi>, %355, %cst_105 [1] : vector<8x256xi32> to vector<8xi32>
    %357 = vector.shape_cast %356 : vector<8xi32> to vector<8x1xi32>
    %358 = vector.broadcast %c6_i32 : i32 to vector<8x8xi32>
    %359 = arith.cmpi eq, %44, %358 : vector<8x8xi32>
    %360 = vector.shape_cast %357 : vector<8x1xi32> to vector<8x1xi32>
    %361 = vector.broadcast %360 : vector<8x1xi32> to vector<8x8xi32>
    %362 = arith.select %359, %361, %316 : vector<8x8xi1>, vector<8x8xi32>
    %363 = vector.broadcast %357 : vector<8x1xi32> to vector<8x256xi32>
    %364 = arith.cmpi eq, %43, %363 : vector<8x256xi32>
    %365 = arith.extui %364 : vector<8x256xi1> to vector<8x256xi32>
    %366 = arith.sitofp %365 : vector<8x256xi32> to vector<8x256xf32>
    %367 = arith.truncf %366 : vector<8x256xf32> to vector<8x256xbf16>
    %cst_106 = arith.constant dense<0.000000e+00> : vector<8x128xf32>
    %368 = tpu.matmul %367, %31, %cst_106 {dimension_numbers = #tpu.dot_dimension_numbers<[1], [0], [0], [1], [0, 0, 1, 1], [], []>} : vector<8x256xbf16>, vector<256x128xbf16>, vector<8x128xf32> -> vector<8x128xf32>
    %369 = arith.addf %348, %368 : vector<8x128xf32>
    %370 = arith.addf %369, %39 : vector<8x128xf32>
    %371 = math.tanh %370 : vector<8x128xf32>
    %cst_107 = arith.constant dense<0.000000e+00> : vector<8x128xf32>
    %372 = tpu.matmul %367, %32, %cst_107 {dimension_numbers = #tpu.dot_dimension_numbers<[1], [0], [0], [1], [0, 0, 1, 1], [], []>} : vector<8x256xbf16>, vector<256x128xbf16>, vector<8x128xf32> -> vector<8x128xf32>
    %373 = arith.truncf %372 : vector<8x128xf32> to vector<8x128xbf16>
    %cst_108 = arith.constant dense<0.000000e+00> : vector<8x128xf32>
    %374 = tpu.matmul %373, %33, %cst_108 {dimension_numbers = #tpu.dot_dimension_numbers<[1], [0], [0], [1], [0, 0, 1, 1], [], []>} : vector<8x128xbf16>, vector<128x128xbf16>, vector<8x128xf32> -> vector<8x128xf32>
    %375 = arith.addf %374, %42 : vector<8x128xf32>
    %376 = arith.mulf %375, %375 : vector<8x128xf32>
    %377 = arith.mulf %375, %376 : vector<8x128xf32>
    %cst_109 = arith.constant 4.471500e-02 : f32
    %378 = vector.broadcast %cst_109 : f32 to vector<8x128xf32>
    %379 = arith.mulf %378, %377 : vector<8x128xf32>
    %380 = arith.addf %375, %379 : vector<8x128xf32>
    %cst_110 = arith.constant 0.797884583 : f32
    %381 = vector.broadcast %cst_110 : f32 to vector<8x128xf32>
    %382 = arith.mulf %381, %380 : vector<8x128xf32>
    %383 = math.tanh %382 : vector<8x128xf32>
    %cst_111 = arith.constant 1.000000e+00 : f32
    %384 = vector.broadcast %cst_111 : f32 to vector<8x128xf32>
    %385 = arith.addf %384, %383 : vector<8x128xf32>
    %cst_112 = arith.constant 5.000000e-01 : f32
    %386 = vector.broadcast %cst_112 : f32 to vector<8x128xf32>
    %387 = arith.mulf %386, %385 : vector<8x128xf32>
    %388 = arith.mulf %375, %387 : vector<8x128xf32>
    %389 = arith.addf %343, %388 : vector<8x128xf32>
    %c7_i32_113 = arith.constant 7 : i32
    %390 = arith.truncf %371 : vector<8x128xf32> to vector<8x128xbf16>
    %cst_114 = arith.constant dense<0.000000e+00> : vector<8x384xf32>
    %391 = tpu.matmul %390, %30, %cst_114 {dimension_numbers = #tpu.dot_dimension_numbers<[1], [0], [0], [1], [0, 0, 1, 1], [], []>} : vector<8x128xbf16>, vector<128x384xbf16>, vector<8x384xf32> -> vector<8x384xf32>
    %392 = vector.extract_strided_slice %391 {offsets = [0, 0], sizes = [8, 256], strides = [1, 1]} : vector<8x384xf32> to vector<8x256xf32>
    %393 = arith.addf %392, %36 : vector<8x256xf32>
    %394 = vector.extract_strided_slice %391 {offsets = [0, 256], sizes = [8, 128], strides = [1, 1]} : vector<8x384xf32> to vector<8x128xf32>
    %395 = tpu.iota {dimensions = array<i32: 1>} : vector<8x256xi32>
    %cst_115 = arith.constant dense<0xFF800000> : vector<8xf32>
    %396 = vector.multi_reduction <maximumf>, %393, %cst_115 [1] : vector<8x256xf32> to vector<8xf32>
    %397 = vector.shape_cast %396 : vector<8xf32> to vector<8x1xf32>
    %398 = vector.broadcast %397 : vector<8x1xf32> to vector<8x256xf32>
    %399 = arith.cmpf oeq, %393, %398 : vector<8x256xf32>
    %c256_i32_116 = arith.constant 256 : i32
    %400 = vector.broadcast %c256_i32_116 : i32 to vector<8x256xi32>
    %401 = arith.select %399, %395, %400 : vector<8x256xi1>, vector<8x256xi32>
    %cst_117 = arith.constant dense<2147483647> : vector<8xi32>
    %402 = vector.multi_reduction <minsi>, %401, %cst_117 [1] : vector<8x256xi32> to vector<8xi32>
    %403 = vector.shape_cast %402 : vector<8xi32> to vector<8x1xi32>
    %404 = vector.broadcast %c7_i32_113 : i32 to vector<8x8xi32>
    %405 = arith.cmpi eq, %44, %404 : vector<8x8xi32>
    %406 = vector.shape_cast %403 : vector<8x1xi32> to vector<8x1xi32>
    %407 = vector.broadcast %406 : vector<8x1xi32> to vector<8x8xi32>
    %408 = arith.select %405, %407, %362 : vector<8x8xi1>, vector<8x8xi32>
    %409 = vector.broadcast %403 : vector<8x1xi32> to vector<8x256xi32>
    %410 = arith.cmpi eq, %43, %409 : vector<8x256xi32>
    %411 = arith.extui %410 : vector<8x256xi1> to vector<8x256xi32>
    %412 = arith.sitofp %411 : vector<8x256xi32> to vector<8x256xf32>
    %413 = arith.truncf %412 : vector<8x256xf32> to vector<8x256xbf16>
    %cst_118 = arith.constant dense<0.000000e+00> : vector<8x128xf32>
    %414 = tpu.matmul %413, %31, %cst_118 {dimension_numbers = #tpu.dot_dimension_numbers<[1], [0], [0], [1], [0, 0, 1, 1], [], []>} : vector<8x256xbf16>, vector<256x128xbf16>, vector<8x128xf32> -> vector<8x128xf32>
    %415 = arith.addf %394, %414 : vector<8x128xf32>
    %416 = arith.addf %415, %39 : vector<8x128xf32>
    %417 = math.tanh %416 : vector<8x128xf32>
    %cst_119 = arith.constant dense<0.000000e+00> : vector<8x128xf32>
    %418 = tpu.matmul %413, %32, %cst_119 {dimension_numbers = #tpu.dot_dimension_numbers<[1], [0], [0], [1], [0, 0, 1, 1], [], []>} : vector<8x256xbf16>, vector<256x128xbf16>, vector<8x128xf32> -> vector<8x128xf32>
    %419 = arith.truncf %418 : vector<8x128xf32> to vector<8x128xbf16>
    %cst_120 = arith.constant dense<0.000000e+00> : vector<8x128xf32>
    %420 = tpu.matmul %419, %33, %cst_120 {dimension_numbers = #tpu.dot_dimension_numbers<[1], [0], [0], [1], [0, 0, 1, 1], [], []>} : vector<8x128xbf16>, vector<128x128xbf16>, vector<8x128xf32> -> vector<8x128xf32>
    %421 = arith.addf %420, %42 : vector<8x128xf32>
    %422 = arith.mulf %421, %421 : vector<8x128xf32>
    %423 = arith.mulf %421, %422 : vector<8x128xf32>
    %cst_121 = arith.constant 4.471500e-02 : f32
    %424 = vector.broadcast %cst_121 : f32 to vector<8x128xf32>
    %425 = arith.mulf %424, %423 : vector<8x128xf32>
    %426 = arith.addf %421, %425 : vector<8x128xf32>
    %cst_122 = arith.constant 0.797884583 : f32
    %427 = vector.broadcast %cst_122 : f32 to vector<8x128xf32>
    %428 = arith.mulf %427, %426 : vector<8x128xf32>
    %429 = math.tanh %428 : vector<8x128xf32>
    %cst_123 = arith.constant 1.000000e+00 : f32
    %430 = vector.broadcast %cst_123 : f32 to vector<8x128xf32>
    %431 = arith.addf %430, %429 : vector<8x128xf32>
    %cst_124 = arith.constant 5.000000e-01 : f32
    %432 = vector.broadcast %cst_124 : f32 to vector<8x128xf32>
    %433 = arith.mulf %432, %431 : vector<8x128xf32>
    %434 = arith.mulf %421, %433 : vector<8x128xf32>
    %435 = arith.addf %389, %434 : vector<8x128xf32>
    %c8_i32 = arith.constant 8 : i32
    %c0_125 = arith.constant 0 : index
    %c0_126 = arith.constant 0 : index
    %436 = vector.load %arg14[%c0_125, %c0_126] : memref<8x8xi32, #tpu.memory_space<vmem>>, vector<8x8xi32>
    tpu.vector_store %arg14[%c0_125, %c0_126], %408 {strides = array<i32>} : memref<8x8xi32, #tpu.memory_space<vmem>>, vector<8x8xi32>,
    %cst_127 = arith.constant 0.111111112 : f32
    %437 = vector.broadcast %cst_127 : f32 to vector<8x128xf32>
    %438 = arith.mulf %435, %437 : vector<8x128xf32>
    %439 = arith.truncf %438 : vector<8x128xf32> to vector<8x128xbf16>
    %c0_128 = arith.constant 0 : index
    %c0_129 = arith.constant 0 : index
    %440 = vector.load %arg12[%c0_128, %c0_129] : memref<128x256xbf16, #tpu.memory_space<vmem>>, vector<128x256xbf16>
    %cst_130 = arith.constant dense<0.000000e+00> : vector<8x256xf32>
    %441 = tpu.matmul %439, %440, %cst_130 {dimension_numbers = #tpu.dot_dimension_numbers<[1], [0], [0], [1], [0, 0, 1, 1], [], []>} : vector<8x128xbf16>, vector<128x256xbf16>, vector<8x256xf32> -> vector<8x256xf32>
    %c0_131 = arith.constant 0 : index
    %c0_132 = arith.constant 0 : index
    %442 = vector.load %arg13[%c0_131, %c0_132] : memref<1x256xf32, #tpu.memory_space<vmem>>, vector<1x256xf32>
    %443 = vector.broadcast %442 : vector<1x256xf32> to vector<8x256xf32>
    %444 = arith.addf %441, %443 : vector<8x256xf32>
    %445 = tpu.iota {dimensions = array<i32: 1>} : vector<8x256xi32>
    %cst_133 = arith.constant dense<0xFF800000> : vector<8xf32>
    %446 = vector.multi_reduction <maximumf>, %444, %cst_133 [1] : vector<8x256xf32> to vector<8xf32>
    %447 = vector.shape_cast %446 : vector<8xf32> to vector<8x1xf32>
    %448 = vector.broadcast %447 : vector<8x1xf32> to vector<8x256xf32>
    %449 = arith.cmpf oeq, %444, %448 : vector<8x256xf32>
    %c256_i32_134 = arith.constant 256 : i32
    %450 = vector.broadcast %c256_i32_134 : i32 to vector<8x256xi32>
    %451 = arith.select %449, %445, %450 : vector<8x256xi1>, vector<8x256xi32>
    %cst_135 = arith.constant dense<2147483647> : vector<8xi32>
    %452 = vector.multi_reduction <minsi>, %451, %cst_135 [1] : vector<8x256xi32> to vector<8xi32>
    %453 = vector.shape_cast %452 : vector<8xi32> to vector<8x1xi32>
    %c0_136 = arith.constant 0 : index
    %c0_137 = arith.constant 0 : index
    %454 = vector.load %arg15[%c0_136, %c0_137] : memref<8x1xi32, #tpu.memory_space<vmem>>, vector<8x1xi32>
    tpu.vector_store %arg15[%c0_136, %c0_137], %453 {strides = array<i32>} : memref<8x1xi32, #tpu.memory_space<vmem>>, vector<8x1xi32>,
    return
  }
}

</mosaic_0001>

<bundles_post_ra>
// kernel: forward.1
= control target key start
LH: loop header
LB: loop body
LE: loop exit
PB: predicated region body
PF: predicated region fallthrough
CT: control target
= control target key end

     0   :  { %vm110_vm0 = vcmask 523264   ;;  %v3107_v63 = vmov 16.0   ;;  %vm443_vm2 = vcmask 1041409   ;;  %vm445_vm3 = vcmask 1042434   ;;  %s4875_s1 = inlined_call_operand.vmem [shape: bf16[64,128], index: 1, kind: input, shape index: {}]   ;;  %s4876_s2 = inlined_call_operand.vmem [shape: f32[1,128], index: 2, kind: input, shape index: {}]   ;;  %s4877_s0 = inlined_call_operand.vmem [shape: f32[128,64], index: 0, kind: input, shape index: {}]   ;;  %s4878_s9 = inlined_call_operand.vmem [shape: bf16[256,128], index: 9, kind: input, shape index: {}]   ;;  %s4879_s3 = inlined_call_operand.vmem [shape: bf16[128,128], index: 3, kind: input, shape index: {}]   ;;  %s4880_s4 = inlined_call_operand.vmem [shape: f32[1,128], index: 4, kind: input, shape index: {}]   ;;  %s4881_s10 = inlined_call_operand.vmem [shape: bf16[128,128], index: 10, kind: input, shape index: {}]   ;;  %s4882_s5 = inlined_call_operand.vmem [shape: bf16[128,384], index: 5, kind: input, shape index: {}]   ;;  %s4883_s11 = inlined_call_operand.vmem [shape: f32[1,128], index: 11, kind: input, shape index: {}]   ;;  %s4884_s6 = inlined_call_operand.vmem [shape: f32[1,256], index: 6, kind: input, shape index: {}]   ;;  %s4885_s8 = inlined_call_operand.vmem [shape: bf16[256,128], index: 8, kind: input, shape index: {}]   ;;  %s4886_s7 = inlined_call_operand.vmem [shape: f32[1,128], index: 7, kind: input, shape index: {}]   ;;  %s4887_s14 = inlined_call_operand.vmem [shape: s32[8,8], index: 14, kind: output, shape index: {0}]   ;;  %s4888_s12 = inlined_call_operand.vmem [shape: bf16[128,256], index: 12, kind: input, shape index: {}]   ;;  %s4889_s13 = inlined_call_operand.vmem [shape: f32[1,256], index: 13, kind: input, shape index: {}]   ;;  %s4890_s15 = inlined_call_operand.vmem [shape: s32[8,1], index: 15, kind: output, shape index: {1}]  }
   0x1   :  { %v2886_v0 = vld [vmem:[%s4875_s1 + $0x18] sm:$0xff]  ;;  %v2885_v1 = vld [vmem:[%s4875_s1 + $0x10] sm:$0xff]  ;;  %v2884_v2 = vld [vmem:[%s4875_s1 + $0x8] sm:$0xff]  ;;  %vm447_vm4 = vcmask 1043459   ;;  %vm449_vm7 = vcmask 1044484   ;;  %vm451_vm8 = vcmask 1045509  }
   0x2   :  { %139 = vmatpush.bf16.msra.mxu0 %v2886_v0  ;;  %v2883_v3 = vld [vmem:[%s4875_s1] sm:$0xff]  ;;  %v51_v5 = vld [vmem:[%s4877_s0 + $0x8] sm:$0xff]  ;;  %v52_v7 = vld [vmem:[%s4877_s0 + $0x10] sm:$0xff]  ;;  %vm453_vm9 = vcmask 1046534   ;;  %vm455_vm10 = vcmask 1047559  }
   0x3   :  { %v50_v4 = vld [vmem:[%s4877_s0] sm:$0xff]  ;;  %v53_v8 = vld [vmem:[%s4877_s0 + $0x18] sm:$0xff]  ;;  %v55_v11 = vld [vmem:[%s4877_s0 + $0x28] sm:$0xff] }
   0x4   :  { %v66_v6 = vpack.c.bf16 %v51_v5, %v50_v4  ;;  %v67_v9 = vpack.c.bf16 %v53_v8, %v52_v7  ;;  %v54_v10 = vld [vmem:[%s4877_s0 + $0x20] sm:$0xff]  ;;  %v56_v13 = vld [vmem:[%s4877_s0 + $0x30] sm:$0xff]  ;;  %v57_v14 = vld [vmem:[%s4877_s0 + $0x38] sm:$0xff] }
   0x5   :  { %v68_v12 = vpack.c.bf16 %v55_v11, %v54_v10  ;;  %v69_v15 = vpack.c.bf16 %v57_v14, %v56_v13  ;;  %v58_v16 = vld [vmem:[%s4877_s0 + $0x40] sm:$0xff]  ;;  %v59_v17 = vld [vmem:[%s4877_s0 + $0x48] sm:$0xff]  ;;  %v60_v19 = vld [vmem:[%s4877_s0 + $0x50] sm:$0xff] }
   0x6   :  { %140 = vmatpush.bf16.msra.mxu0 %v2885_v1  ;;  %v70_v18 = vpack.c.bf16 %v59_v17, %v58_v16  ;;  %v61_v20 = vld [vmem:[%s4877_s0 + $0x58] sm:$0xff]  ;;  %v62_v22 = vld [vmem:[%s4877_s0 + $0x60] sm:$0xff]  ;;  %v63_v23 = vld [vmem:[%s4877_s0 + $0x68] sm:$0xff] }
   0x7   :  { %v71_v21 = vpack.c.bf16 %v61_v20, %v60_v19  ;;  %v72_v24 = vpack.c.bf16 %v63_v23, %v62_v22  ;;  %v64_v25 = vld [vmem:[%s4877_s0 + $0x70] sm:$0xff]  ;;  %v65_v26 = vld [vmem:[%s4877_s0 + $0x78] sm:$0xff]  ;;  %v3261_v28 = vld [vmem:[%s4876_s2] ss:$0 sm:$0xff] }
   0x8   :  { %v73_v27 = vpack.c.bf16 %v65_v26, %v64_v25 }
   0xa   :  { %141 = vmatpush.bf16.msra.mxu0 %v2884_v2 }
   0xe   :  { %142 = vmatpush.bf16.msra.mxu0 %v2883_v3 }
  0x11   :  { %2444 = vmatmul.msk.bf16.vlgmr.msra.gmra.mxu0 %vm110_vm0, %v66_v6 }
  0x21   :  { %2445 = vmatmul.msk.bf16.gmra.mxu0 %vm110_vm0, %v67_v9 }
  0x31   :  { %2446 = vmatmul.msk.bf16.gmra.mxu0 %vm110_vm0, %v68_v12 }
  0x41   :  { %2447 = vmatmul.msk.bf16.gmra.mxu0 %vm110_vm0, %v69_v15 }
  0x51   :  { %2448 = vmatmul.msk.bf16.gmra.mxu0 %vm110_vm0, %v70_v18 }
  0x61   :  { %2449 = vmatmul.msk.bf16.gmra.mxu0 %vm110_vm0, %v71_v21 }
  0x71   :  { %2450 = vmatmul.msk.bf16.gmra.mxu0 %vm110_vm0, %v72_v24 }
  0x81   :  { %2451 = vmatmul.msk.bf16.gmra.mxu0 %vm110_vm0, %v73_v27 }
  0x8e   :  { %v144_v29 = vpop.f32.mrf.mxu0 }
  0x8f   :  { %v145_v30 = vadd.f32 %v3261_v28, %v144_v29 }
  0x91   :  { %v184_v31 = vmul.f32 %v145_v30, %v145_v30 }
  0x93   :  { %v200_v32 = vmul.f32 %v184_v31, %v145_v30 }
  0x95   :  { %v216_v33 = vmul.f32 0.044715, %v200_v32 }
  0x96   :  { %v146_v34 = vpop.f32.mrf.mxu0 }
  0x97   :  { %v232_v35 = vadd.f32 %v216_v33, %v145_v30  ;;  %v147_v36 = vadd.f32 %v3261_v28, %v146_v34 }
  0x99   :  { %v248_v37 = vmul.f32 0.7978846, %v232_v35  ;;  %v185_v38 = vmul.f32 %v147_v36, %v147_v36 }
  0x9b   :  { %v201_v39 = vmul.f32 %v185_v38, %v147_v36  ;;  %2982 = vtanh.f32 %v248_v37 }
  0x9d   :  { %v217_v40 = vmul.f32 0.044715, %v201_v39 }
  0x9e   :  { %v149_v41 = vpop.f32.mrf.mxu0 }
  0x9f   :  { %v233_v42 = vadd.f32 %v217_v40, %v147_v36  ;;  %v150_v43 = vadd.f32 %v3261_v28, %v149_v41 }
  0xa1   :  { %v249_v44 = vmul.f32 0.7978846, %v233_v42  ;;  %v186_v45 = vmul.f32 %v150_v43, %v150_v43  ;;  %v2983_v46 = vpop.eup %2982 }
  0xa2   :  { %v280_v49 = vadd.f32 1.0, %v2983_v46 }
  0xa3   :  { %2984 = vtanh.f32 %v249_v44  ;;  %v202_v47 = vmul.f32 %v186_v45, %v150_v43 }
  0xa4   :  { %v296_v56 = vmul.f32 0.5, %v280_v49 }
  0xa5   :  { %v218_v48 = vmul.f32 0.044715, %v202_v47 }
  0xa6   :  { %v151_v50 = vpop.f32.mrf.mxu0  ;;  %v312_v61 = vmul.f32 %v296_v56, %v145_v30 }
  0xa7   :  { %v234_v51 = vadd.f32 %v218_v48, %v150_v43  ;;  %v152_v52 = vadd.f32 %v3261_v28, %v151_v50 }
  0xa9   :  { %v2985_v53 = vpop.eup %2984  ;;  %v250_v54 = vmul.f32 0.7978846, %v234_v51  ;;  %v187_v55 = vmul.f32 %v152_v52, %v152_v52 }
  0xaa   :  { %v281_v57 = vadd.f32 1.0, %v2985_v53 }
  0xab   :  { %v203_v58 = vmul.f32 %v187_v55, %v152_v52  ;;  %2986 = vtanh.f32 %v250_v54 }
  0xac   :  { %v297_v59 = vmul.f32 0.5, %v281_v57  ;;  %2988 = vrcp.f32 %v3107_v63 }
  0xad   :  { %v219_v60 = vmul.f32 0.044715, %v203_v58 }
  0xae   :  { %v313_v62 = vmul.f32 %v297_v59, %v147_v36  ;;  %v154_v0 = vpop.f32.mrf.mxu0 }
  0xaf   :  { %v235_v1 = vadd.f32 %v219_v60, %v152_v52  ;;  %v3268_v2 = vadd.f32 %v3261_v28, %v154_v0 }
  0xb0   :  { %v328_v3 = vadd.f32 %v313_v62, %v312_v61 }
  0xb1   :  { %v251_v4 = vmul.f32 0.7978846, %v235_v1  ;;  %v188_v5 = vmul.f32 %v3268_v2, %v3268_v2  ;;  %v2987_v7 = vpop.eup %2986 }
  0xb2   :  { %v329_v6 = vrot.slane %v328_v3, 4  ;;  %v2989_v9 = vpop.eup %2988  ;;  %v282_v12 = vadd.f32 1.0, %v2987_v7 }
  0xb3   :  { %2990 = vtanh.f32 %v251_v4  ;;  %v204_v8 = vmul.f32 %v188_v5, %v3268_v2  ;;  %v385_v14 = vmul.f32 16.0, %v2989_v9  ;;  %vm389_vm1 = vweird.f32 %v2989_v9 }
  0xb4   :  { %v330_v11 = vadd.f32 %v329_v6, %v328_v3  ;;  %v298_v21 = vmul.f32 0.5, %v282_v12 }
  0xb5   :  { %v220_v10 = vmul.f32 0.044715, %v204_v8  ;;  %v386_v23 = vsub.f32 1.0, %v385_v14 }
  0xb6   :  { %v156_v13 = vpop.f32.mrf.mxu0  ;;  %v331_v20 = vrot.slane %v330_v11, 2  ;;  %v314_v29 = vmul.f32 %v298_v21, %v150_v43 }
  0xb7   :  { %v236_v15 = vadd.f32 %v220_v10, %v3268_v2  ;;  %v157_v16 = vadd.f32 %v3261_v28, %v156_v13  ;;  %v387_v32 = vmul.f32 %v2989_v9, %v386_v23 }
  0xb8   :  { %v332_v27 = vadd.f32 %v331_v20, %v330_v11 }
  0xb9   :  { %v2991_v17 = vpop.eup %2990  ;;  %v252_v18 = vmul.f32 0.7978846, %v236_v15  ;;  %v189_v19 = vmul.f32 %v157_v16, %v157_v16  ;;  %v388_v41 = vadd.f32 %v2989_v9, %v387_v32 }
  0xba   :  { %v283_v22 = vadd.f32 1.0, %v2991_v17  ;;  %v333_v38 = vrot.slane %v332_v27, 1 }
  0xbb   :  { %v205_v24 = vmul.f32 %v189_v19, %v157_v16  ;;  %2992 = vtanh.f32 %v252_v18  ;;  %v3276_v49 = vsel %vm389_vm1, %v2989_v9, %v388_v41 }
  0xbc   :  { %v299_v25 = vmul.f32 0.5, %v283_v22  ;;  %v334_v46 = vadd.f32 %v333_v38, %v332_v27 }
  0xbd   :  { %v221_v26 = vmul.f32 0.044715, %v205_v24 }
  0xbe   :  { %v315_v30 = vmul.f32 %v299_v25, %v152_v52  ;;  %v159_v31 = vpop.f32.mrf.mxu0  ;;  %v391_v56 = vmul.f32 %v3276_v49, %v334_v46  ;;  %v3319_v46 = vld [vmem:[%s4878_s9 + $0x70] sm:$0xff] }
  0xbf   :  { %v237_v33 = vadd.f32 %v221_v26, %v157_v16  ;;  %v160_v34 = vadd.f32 %v3261_v28, %v159_v31 }
  0xc0   :  { %v335_v35 = vadd.f32 %v315_v30, %v314_v29  ;;  %v399_v5 = vpack.c.bf16 %v391_v56, %v391_v56  ;;  %v3336_v56 = vld [vmem:[%s4878_s9 + $0x68] sm:$0xff] }
  0xc1   :  { %v253_v36 = vmul.f32 0.7978846, %v237_v33  ;;  %v190_v37 = vmul.f32 %v160_v34, %v160_v34  ;;  %v2993_v40 = vpop.eup %2992 }
  0xc2   :  { %v336_v39 = vrot.slane %v335_v35, 4  ;;  %v284_v47 = vadd.f32 1.0, %v2993_v40  ;;  %v435_v11 = vunpack.c.l.b16 %v399_v5 }
  0xc3   :  { %2994 = vtanh.f32 %v253_v36  ;;  %v206_v42 = vmul.f32 %v190_v37, %v160_v34  ;;  %v3297_v36 = vld [vmem:[%s4878_s9 + $0x38] sm:$0xff] }
  0xc4   :  { %v337_v44 = vadd.f32 %v336_v39, %v335_v35  ;;  %v300_v58 = vmul.f32 0.5, %v284_v47  ;;  %753 = vmatpush.bf16.msra.mxu2 %v3297_v36 }
  0xc5   :  { %v222_v45 = vmul.f32 0.044715, %v206_v42 }
  0xc6   :  { %v338_v43 = vrot.slane %v337_v44, 2  ;;  %v161_v48 = vpop.f32.mrf.mxu0  ;;  %v316_v1 = vmul.f32 %v300_v58, %v3268_v2 }
  0xc7   :  { %v238_v50 = vadd.f32 %v222_v45, %v160_v34  ;;  %v162_v51 = vadd.f32 %v3261_v28, %v161_v48  ;;  %v3314_v45 = vld [vmem:[%s4878_s9 + $0x30] sm:$0xff] }
  0xc8   :  { %v339_v52 = vadd.f32 %v338_v43, %v337_v44  ;;  %754 = vmatpush.bf16.msra.mxu2 %v3314_v45 }
  0xc9   :  { %v2995_v53 = vpop.eup %2994  ;;  %v254_v54 = vmul.f32 0.7978846, %v238_v50  ;;  %v191_v55 = vmul.f32 %v162_v51, %v162_v51 }
  0xca   :  { %v340_v57 = vrot.slane %v339_v52, 1  ;;  %v285_v59 = vadd.f32 1.0, %v2995_v53 }
  0xcb   :  { %v207_v60 = vmul.f32 %v191_v55, %v162_v51  ;;  %2996 = vtanh.f32 %v254_v54  ;;  %v3331_v55 = vld [vmem:[%s4878_s9 + $0x28] sm:$0xff] }
  0xcc   :  { %v341_v61 = vadd.f32 %v340_v57, %v339_v52  ;;  %v301_v62 = vmul.f32 0.5, %v285_v59  ;;  %755 = vmatpush.bf16.msra.mxu2 %v3331_v55 }
  0xcd   :  { %v223_v63 = vmul.f32 0.044715, %v207_v60 }
  0xce   :  { %v392_v0 = vmul.f32 %v3276_v49, %v341_v61  ;;  %v317_v3 = vmul.f32 %v301_v62, %v157_v16  ;;  %v164_v4 = vpop.f32.mrf.mxu0 }
  0xcf   :  { %v239_v6 = vadd.f32 %v223_v63, %v162_v51  ;;  %v3286_v29 = vadd.f32 %v3261_v28, %v164_v4 }
  0xd0   :  { %v342_v7 = vadd.f32 %v317_v3, %v316_v1  ;;  %v400_v8 = vpack.c.bf16 %v392_v0, %v392_v0  ;;  %v3347_v0 = vld [vmem:[%s4878_s9 + $0x20] sm:$0xff] }
  0xd1   :  { %v255_v9 = vmul.f32 0.7978846, %v239_v6  ;;  %v2997_v13 = vpop.eup %2996  ;;  %v192_v39 = vmul.f32 %v3286_v29, %v3286_v29  ;;  %v3352_v1 = vld [vmem:[%s4878_s9 + $0x60] sm:$0xff]  ;;  %756 = vmatpush.bf16.msra.mxu2 %v3347_v0 }
  0xd2   :  { %v343_v10 = vrot.slane %v342_v7, 4  ;;  %v436_v12 = vunpack.c.l.b16 %v400_v8  ;;  %v286_v18 = vadd.f32 1.0, %v2997_v13 }
  0xd3   :  { %2998 = vtanh.f32 %v255_v9  ;;  %v208_v48 = vmul.f32 %v192_v39, %v3286_v29 }
  0xd4   :  { %v344_v14 = vadd.f32 %v343_v10, %v342_v7  ;;  %v444_v15 = vsel %vm443_vm2, %v436_v12, %v435_v11  ;;  %v302_v21 = vmul.f32 0.5, %v286_v18  ;;  %v3366_v11 = vld [vmem:[%s4878_s9 + $0x18] sm:$0xff] }
  0xd5   :  { %v224_v59 = vmul.f32 0.044715, %v208_v48  ;;  %v3371_v12 = vld [vmem:[%s4878_s9 + $0x58] sm:$0xff]  ;;  %757 = vmatpush.bf16.msra.mxu2 %v3366_v11 }
  0xd6   :  { %v345_v17 = vrot.slane %v344_v14, 2  ;;  %v166_v19 = vpop.f32.mrf.mxu0  ;;  %v318_v26 = vmul.f32 %v302_v21, %v160_v34  ;;  %v3302_v34 = vld [vmem:[%s4878_s9 + $0x78] sm:$0xff] }
  0xd7   :  { %v3283_v25 = vadd.f32 %v3261_v28, %v166_v19  ;;  %766 = vmatpush.bf16.msra.mxu3 %v3302_v34  ;;  %v240_v4 = vadd.f32 %v224_v59, %v3286_v29 }
  0xd8   :  { %v346_v20 = vadd.f32 %v345_v17, %v344_v14 }
  0xd9   :  { %v2999_v2 = vpop.eup %2998  ;;  %v193_v35 = vmul.f32 %v3283_v25, %v3283_v25  ;;  %v256_v17 = vmul.f32 0.7978846, %v240_v4  ;;  %v4891_v4 = vmov 1.0|1.0  }
  0xda   :  { %v347_v16 = vrot.slane %v346_v20, 1  ;;  %v287_v22 = vadd.f32 1.0, %v2999_v2  ;;  %v3381_v2 = vld [vmem:[%s4878_s9 + $0x10] sm:$0xff] }
  0xdb   :  { %v209_v44 = vmul.f32 %v193_v35, %v3283_v25  ;;  %767 = vmatpush.bf16.msra.mxu3 %v3319_v46  ;;  %758 = vmatpush.bf16.msra.mxu2 %v3381_v2 }
  0xdc   :  { %v348_v23 = vadd.f32 %v347_v16, %v346_v20  ;;  %v303_v24 = vmul.f32 0.5, %v287_v22  ;;  %v3386_v16 = vld [vmem:[%s4878_s9 + $0x50] sm:$0xff] }
  0xdd   :  { %v225_v54 = vmul.f32 0.044715, %v209_v44  ;;  %v3420_v44 = vld [vmem:[%s4878_s9] sm:$0xff] }
  0xde   :  { %v319_v27 = vmul.f32 %v303_v24, %v162_v51  ;;  %v169_v30 = vpop.f32.mrf.mxu0  ;;  %v393_v31 = vmul.f32 %v3276_v49, %v348_v23  ;;  %v2894_v24 = vld [vmem:[%s4879_s3 + $0x38] sm:$0xff] }
  0xdf   :  { %v3290_v32 = vadd.f32 %v3261_v28, %v169_v30  ;;  %768 = vmatpush.bf16.msra.mxu3 %v3336_v56  ;;  %v241_v63 = vadd.f32 %v225_v54, %v3283_v25  ;;  %507 = vmatpush.bf16.msra.mxu1 %v2894_v24  ;;  %v3402_v30 = vld [vmem:[%s4878_s9 + $0x8] sm:$0xff] }
  0xe0   :  { %v349_v33 = vadd.f32 %v319_v27, %v318_v26  ;;  %v401_v37 = vpack.c.bf16 %v393_v31, %v393_v31  ;;  %v3407_v31 = vld [vmem:[%s4878_s9 + $0x48] sm:$0xff]  ;;  %759 = vmatpush.bf16.msra.mxu2 %v3402_v30 }
  0xe1   :  { %v194_v41 = vmul.f32 %v3290_v32, %v3290_v32  ;;  %v257_v10 = vmul.f32 0.7978846, %v241_v63 }
  0xe2   :  { %v350_v38 = vrot.slane %v349_v33, 4  ;;  %v437_v40 = vunpack.c.l.b16 %v401_v37 }
  0xe3   :  { %v210_v51 = vmul.f32 %v194_v41, %v3290_v32  ;;  %769 = vmatpush.bf16.msra.mxu3 %v3352_v1  ;;  %3000 = vtanh.f32 %v257_v10  ;;  %v646_v41 = vlaneseq }
  0xe4   :  { %v351_v42 = vadd.f32 %v350_v38, %v349_v33  ;;  %v446_v43 = vsel %vm445_vm3, %v437_v40, %v444_v15  ;;  %v2893_v38 = vld [vmem:[%s4879_s3 + $0x30] sm:$0xff]  ;;  %760 = vmatpush.bf16.msra.mxu2 %v3420_v44 }
  0xe5   :  { %v226_v60 = vmul.f32 0.044715, %v210_v51  ;;  %508 = vmatpush.bf16.msra.mxu1 %v2893_v38  ;;  %v3427_v51 = vand.u32 127, %v646_v41 }
  0xe6   :  { %v352_v47 = vrot.slane %v351_v42, 2  ;;  %v171_v50 = vpop.f32.mrf.mxu0 }
  0xe7   :  { %v3326_v52 = vadd.f32 %v3261_v28, %v171_v50  ;;  %v242_v7 = vadd.f32 %v226_v60, %v3290_v32  ;;  %770 = vmatpush.bf16.msra.mxu3 %v3371_v12  ;;  %vm649_vm5 = vcmp.eq.s32.totalorder %v3427_v51, 7 }
  0xe8   :  { %v353_v53 = vadd.f32 %v352_v47, %v351_v42  ;;  %vm2549_vm6 = vmpackc.low %vm649_vm5, %vm649_vm5 }
  0xe9   :  { %v195_v57 = vmul.f32 %v3326_v52, %v3326_v52  ;;  %v258_v19 = vmul.f32 0.7978846, %v242_v7  ;;  %v3001_v37 = vpop.eup %3000  ;;  %2550 = vmatmul.msk.bf16.vlgmr.msra.gmra.mxu2 %vm2549_vm6, %v4891_v4  ;;  %v2891_v7 = vld [vmem:[%s4879_s3 + $0x20] sm:$0xff] }
  0xea   :  { %v354_v58 = vrot.slane %v353_v53, 1  ;;  %v289_v48 = vadd.f32 1.0, %v3001_v37 }
  0xeb   :  { %v211_v61 = vmul.f32 %v195_v57, %v3326_v52  ;;  %771 = vmatpush.bf16.msra.mxu3 %v3386_v16  ;;  %v2892_v57 = vld [vmem:[%s4879_s3 + $0x28] sm:$0xff] }
  0xec   :  { %v355_v62 = vadd.f32 %v354_v58, %v353_v53  ;;  %509 = vmatpush.bf16.msra.mxu1 %v2892_v57 }
  0xed   :  { %v227_v3 = vmul.f32 0.044715, %v211_v61 }
  0xee   :  { %v174_v5 = vpop.f32.mrf.mxu0  ;;  %v394_v6 = vmul.f32 %v3276_v49, %v355_v62  ;;  %v305_v62 = vmul.f32 0.5, %v289_v48 }
  0xef   :  { %v243_v8 = vadd.f32 %v227_v3, %v3326_v52  ;;  %v3361_v9 = vadd.f32 %v3261_v28, %v174_v5  ;;  %772 = vmatpush.bf16.msra.mxu3 %v3407_v31  ;;  %v3109_v5 = vmov 0.0|0.0  }
  0xf0   :  { %v402_v13 = vpack.c.bf16 %v394_v6, %v394_v6  ;;  %510 = vmatpush.bf16.msra.mxu1 %v2891_v7 }
  0xf1   :  { %v259_v14 = vmul.f32 0.7978846, %v243_v8  ;;  %v196_v15 = vmul.f32 %v3361_v9, %v3361_v9 }
  0xf2   :  { %v438_v18 = vunpack.c.l.b16 %v402_v13 }
  0xf3   :  { %v212_v20 = vmul.f32 %v196_v15, %v3361_v9  ;;  %3002 = vtanh.f32 %v259_v14  ;;  %v2890_v15 = vld [vmem:[%s4879_s3 + $0x18] sm:$0xff] }
  0xf4   :  { %v3388_v21 = vsel %vm447_vm4, %v438_v18, %v446_v43  ;;  %3004 = vtanh.f32 %v256_v17  ;;  %v3425_v43 = vld [vmem:[%s4878_s9 + $0x40] sm:$0xff]  ;;  %v321_v17 = vmul.f32 %v305_v62, %v3283_v25  ;;  %511 = vmatpush.bf16.msra.mxu1 %v2890_v15  ;;  %v2669_v15 = vld [vmem:[%s4882_s5 + $0xa8] sm:$0xf] }
  0xf5   :  { %v228_v22 = vmul.f32 0.044715, %v212_v20  ;;  %3006 = vtanh.f32 %v258_v19  ;;  %773 = vmatpush.bf16.msra.mxu3 %v3425_v43 }
  0xf6   :  { %v176_v23 = vpop.f32.mrf.mxu0 }
  0xf7   :  { %v244_v26 = vadd.f32 %v228_v22, %v3361_v9  ;;  %v3397_v27 = vadd.f32 %v3261_v28, %v176_v23 }
  0xf8   :  { %774 = vmatmul.bf16.vlgmr.msra.gmra.mxu3 %v3109_v5 }
  0xf9   :  { %v260_v33 = vmul.f32 0.7978846, %v244_v26  ;;  %v197_v35 = vmul.f32 %v3397_v27, %v3397_v27  ;;  %v3003_v39 = vpop.eup %3002 }
  0xfa   :  { %v3005_v42 = vpop.eup %3004  ;;  %v291_v53 = vadd.f32 1.0, %v3003_v39 }
  0xfb   :  { %v213_v40 = vmul.f32 %v197_v35, %v3397_v27  ;;  %v3007_v47 = vpop.eup %3006  ;;  %3008 = vtanh.f32 %v260_v33  ;;  %v288_v58 = vadd.f32 1.0, %v3005_v42  ;;  %v2889_v35 = vld [vmem:[%s4879_s3 + $0x10] sm:$0xff] }
  0xfc   :  { %v290_v61 = vadd.f32 1.0, %v3007_v47  ;;  %v307_v6 = vmul.f32 0.5, %v291_v53  ;;  %512 = vmatpush.bf16.msra.mxu1 %v2889_v35 }
  0xfd   :  { %v229_v50 = vmul.f32 0.044715, %v213_v40  ;;  %v304_v10 = vmul.f32 0.5, %v288_v58  ;;  %v2887_v58 = vld [vmem:[%s4879_s3] sm:$0xff] }
  0xfe   :  { %v179_v54 = vpop.f32.mrf.mxu0  ;;  %v306_v14 = vmul.f32 0.5, %v290_v61  ;;  %v323_v19 = vmul.f32 %v307_v6, %v3326_v52 }
  0xff   :  { %v245_v59 = vadd.f32 %v229_v50, %v3397_v27  ;;  %v3436_v60 = vadd.f32 %v3261_v28, %v179_v54  ;;  %v320_v23 = vmul.f32 %v304_v10, %v3286_v29 }
 0x100   :  { %v322_v33 = vmul.f32 %v306_v14, %v3290_v32  ;;  %v2888_v32 = vld [vmem:[%s4879_s3 + $0x8] sm:$0xff]  ;;  %v3484_v14 = vld [vmem:[%s4881_s10 + $0x30] sm:$0xff] }
 0x101   :  { %v261_v63 = vmul.f32 0.7978846, %v245_v59  ;;  %v198_v3 = vmul.f32 %v3436_v60, %v3436_v60  ;;  %v3009_v8 = vpop.eup %3008  ;;  %v356_v37 = vadd.f32 %v321_v17, %v320_v23  ;;  %513 = vmatpush.bf16.msra.mxu1 %v2888_v32 }
 0x102   :  { %v292_v20 = vadd.f32 1.0, %v3009_v8  ;;  %v363_v39 = vadd.f32 %v323_v19, %v322_v33  ;;  %v3478_v8 = vld [vmem:[%s4881_s10 + $0x38] sm:$0xff] }
 0x103   :  { %3010 = vtanh.f32 %v261_v63  ;;  %v214_v13 = vmul.f32 %v198_v3, %v3436_v60  ;;  %v357_v42 = vrot.slane %v356_v37, 4  ;;  %v2671_v33 = vld [vmem:[%s4882_s5 + $0xb4] sm:$0xf0] }
 0x104   :  { %v308_v29 = vmul.f32 0.5, %v292_v20  ;;  %v364_v48 = vrot.slane %v363_v39, 4  ;;  %v2917_v20 = vld [vmem:[%s4882_s5 + $0xb0] sm:$0xf0] }
 0x105   :  { %v230_v18 = vmul.f32 0.044715, %v214_v13  ;;  %v358_v59 = vadd.f32 %v357_v42, %v356_v37  ;;  %514 = vmatpush.bf16.msra.mxu1 %v2887_v58  ;;  %v2657_v37 = vld [vmem:[%s4882_s5 + $0x90] sm:$0xf]  ;;  %v3545_v58 = vld [vmem:[%s4881_s10 + $0x20] sm:$0xff] }
 0x106   :  { %v181_v22 = vpop.f32.mrf.mxu0  ;;  %v324_v50 = vmul.f32 %v308_v29, %v3361_v9  ;;  %v365_v62 = vadd.f32 %v364_v48, %v363_v39  ;;  %v3512_v39 = vld [vmem:[%s4881_s10 + $0x28] sm:$0xff]  ;;  %v2645_v48 = vld [vmem:[%s4882_s5 + $0x78] sm:$0xf] }
 0x107   :  { %v246_v24 = vadd.f32 %v230_v18, %v3436_v60  ;;  %v3457_v26 = vadd.f32 %v3261_v28, %v181_v22  ;;  %v359_v6 = vrot.slane %v358_v59, 2  ;;  %v2916_v22 = vld [vmem:[%s4882_s5 + $0xac] sm:$0xf] }
 0x108   :  { %v366_v9 = vrot.slane %v365_v62, 2 }
 0x109   :  { %v3011_v25 = vpop.eup %3010  ;;  %v262_v38 = vmul.f32 0.7978846, %v246_v24  ;;  %v199_v52 = vmul.f32 %v3457_v26, %v3457_v26  ;;  %v360_v13 = vadd.f32 %v359_v6, %v358_v59  ;;  %828 = vmatpush.bf16.msrb.mxu1 %v3478_v8  ;;  %v3495_v24 = vor.u32 %v2917_v20, %v2669_v15 }
 0x10a   :  { %v293_v40 = vadd.f32 1.0, %v3011_v25  ;;  %v367_v19 = vadd.f32 %v366_v9, %v365_v62  ;;  %v3500_v25 = vor.u32 %v2916_v22, %v2671_v33  ;;  %v3559_v9 = vld [vmem:[%s4881_s10 + $0x18] sm:$0xff]  ;;  %v3576_v33 = vld [vmem:[%s4881_s10 + $0x8] sm:$0xff] }
 0x10b   :  { %v215_v41 = vmul.f32 %v199_v52, %v3457_v26  ;;  %3012 = vtanh.f32 %v262_v38  ;;  %v2914_v38 = vld [vmem:[%s4882_s5 + $0x98] sm:$0xf0]  ;;  %v361_v52 = vrot.slane %v360_v13, 1  ;;  %979 = vmatpush.bf16.msrb.mxu2 %v3495_v24  ;;  %1229 = vmatpush.bf16.msrb.mxu0 %v3495_v24 }
 0x10c   :  { %v309_v28 = vmul.f32 0.5, %v293_v40  ;;  %v3515_v29 = vor.u32 %v2914_v38, %v2657_v37  ;;  %v2913_v40 = vld [vmem:[%s4882_s5 + $0x94] sm:$0xf]  ;;  %v368_v42 = vrot.slane %v367_v19, 1  ;;  %992 = vmatpush.bf16.msrb.mxu3 %v3500_v25 }
 0x10d   :  { %v231_v47 = vmul.f32 0.044715, %v215_v41  ;;  %829 = vmatpush.bf16.msrb.mxu1 %v3484_v14  ;;  %v2659_v41 = vld [vmem:[%s4882_s5 + $0x9c] sm:$0xf0] }
 0x10e   :  { %v325_v53 = vmul.f32 %v309_v28, %v3397_v27  ;;  %v369_v62 = vadd.f32 %v368_v42, %v367_v19 }
 0x10f   :  { %v247_v54 = vadd.f32 %v231_v47, %v3457_v26  ;;  %v3526_v47 = vor.u32 %v2913_v40, %v2659_v41  ;;  %980 = vmatpush.bf16.msrb.mxu2 %v3515_v29  ;;  %1230 = vmatpush.bf16.msrb.mxu0 %v3515_v29  ;;  %v3584_v41 = vld [vmem:[%s4881_s10] sm:$0xff] }
 0x110   :  { %v370_v57 = vadd.f32 %v325_v53, %v324_v50  ;;  %v2911_v50 = vld [vmem:[%s4882_s5 + $0x80] sm:$0xf0] }
 0x111   :  { %v263_v61 = vmul.f32 0.7978846, %v247_v54  ;;  %v3013_v3 = vpop.eup %3012  ;;  %830 = vmatpush.bf16.msrb.mxu1 %v3512_v39  ;;  %v3548_v59 = vor.u32 %v2911_v50, %v2645_v48  ;;  %993 = vmatpush.bf16.msrb.mxu3 %v3526_v47 }
 0x112   :  { %v371_v63 = vrot.slane %v370_v57, 4  ;;  %v294_v7 = vadd.f32 1.0, %v3013_v3 }
 0x113   :  { %3014 = vtanh.f32 %v263_v61  ;;  %981 = vmatpush.bf16.msrb.mxu2 %v3548_v59  ;;  %1231 = vmatpush.bf16.msrb.mxu0 %v3548_v59 }
 0x114   :  { %v372_v5 = vadd.f32 %v371_v63, %v370_v57  ;;  %v310_v17 = vmul.f32 0.5, %v294_v7  ;;  %v362_v57 = vadd.f32 %v361_v52, %v360_v13 }
 0x115   :  { %831 = vmatpush.bf16.msrb.mxu1 %v3545_v58 }
 0x116   :  { %v373_v27 = vrot.slane %v372_v5, 2  ;;  %v326_v28 = vmul.f32 %v310_v17, %v3436_v60  ;;  %v2910_v60 = vld [vmem:[%s4882_s5 + $0x7c] sm:$0xf]  ;;  %v395_v6 = vmul.f32 %v3276_v49, %v362_v57  ;;  %v3570_v17 = vld [vmem:[%s4881_s10 + $0x10] sm:$0xff]  ;;  %v2653_v57 = vld [vmem:[%s4882_s5 + $0x80] sm:$0xf] }
 0x118   :  { %v374_v23 = vadd.f32 %v373_v27, %v372_v5  ;;  %v396_v27 = vmul.f32 %v3276_v49, %v369_v62  ;;  %v403_v15 = vpack.c.bf16 %v395_v6, %v395_v6  ;;  %v2907_v6 = vld [vmem:[%s4882_s5 + $0x64] sm:$0xf] }
 0x119   :  { %v3015_v10 = vpop.eup %3014  ;;  %832 = vmatpush.bf16.msrb.mxu1 %v3559_v9 }
 0x11a   :  { %v295_v18 = vadd.f32 1.0, %v3015_v10  ;;  %v375_v53 = vrot.slane %v374_v23, 1  ;;  %v404_v19 = vpack.c.bf16 %v396_v27, %v396_v27  ;;  %v2635_v27 = vld [vmem:[%s4882_s5 + $0x6c] sm:$0xf0] }
 0x11c   :  { %v311_v35 = vmul.f32 0.5, %v295_v18  ;;  %v376_v3 = vadd.f32 %v375_v53, %v374_v23  ;;  %v439_v23 = vunpack.c.l.b16 %v403_v15  ;;  %v440_v37 = vunpack.c.l.b16 %v404_v19  ;;  %v2621_v19 = vld [vmem:[%s4882_s5 + $0x48] sm:$0xf] }
 0x11d   :  { %833 = vmatpush.bf16.msrb.mxu1 %v3570_v17  ;;  %v3634_v15 = vor.u32 %v2907_v6, %v2635_v27  ;;  %v2605_v6 = vld [vmem:[%s4882_s5 + $0x20] sm:$0xf]  ;;  %v2900_v27 = vld [vmem:[%s4882_s5 + $0x28] sm:$0xf0] }
 0x11e   :  { %v327_v32 = vmul.f32 %v311_v35, %v3457_v26  ;;  %v2647_v26 = vld [vmem:[%s4882_s5 + $0x84] sm:$0xf0]  ;;  %v397_v10 = vmul.f32 %v3276_v49, %v376_v3  ;;  %v450_v40 = vsel %vm449_vm7, %v439_v23, %v3388_v21  ;;  %v2633_v3 = vld [vmem:[%s4882_s5 + $0x60] sm:$0xf] }
 0x11f   :  { %v3551_v63 = vor.u32 %v2910_v60, %v2647_v26  ;;  %v452_v42 = vsel %vm451_vm8, %v440_v37, %v450_v40  ;;  %v2665_v60 = vld [vmem:[%s4882_s5 + $0x98] sm:$0xf]  ;;  %v2915_v26 = vld [vmem:[%s4882_s5 + $0xa0] sm:$0xf0]  ;;  %4977 = vst [vmem:[#allocation2_spill] sm:$0xff] %v3634_v15  ;;  %vm1043_vm8 = vcmp.eq.s32.totalorder %v3427_v51, 0 }
 0x120   :  { %v377_v54 = vadd.f32 %v327_v32, %v326_v28  ;;  %v405_v20 = vpack.c.bf16 %v397_v10, %v397_v10  ;;  %v2918_v28 = vld [vmem:[%s4882_s5 + $0xb8] sm:$0xf0]  ;;  %v2641_v10 = vld [vmem:[%s4882_s5 + $0x68] sm:$0xf]  ;;  %v2629_v37 = vld [vmem:[%s4882_s5 + $0x50] sm:$0xf] }
 0x121   :  { %994 = vmatpush.bf16.msrb.mxu3 %v3551_v63  ;;  %834 = vmatpush.bf16.msrb.mxu1 %v3576_v33 }
 0x122   :  { %v378_v61 = vrot.slane %v377_v54, 4  ;;  %v441_v38 = vunpack.c.l.b16 %v405_v20  ;;  %v2905_v20 = vld [vmem:[%s4882_s5 + $0x50] sm:$0xf0] }
 0x123   :  { %v3648_v23 = vor.u32 %v2905_v20, %v2621_v19  ;;  %v3720_v19 = vor.u32 %v2900_v27, %v2605_v6  ;;  %v2979_v6 = vld [vmem:[%s4880_s4] ss:$0 sm:$0xff] }
 0x124   :  { %v379_v5 = vadd.f32 %v378_v61, %v377_v54  ;;  %v454_v48 = vsel %vm453_vm9, %v441_v38, %v452_v42  ;;  %v3602_v54 = vor.u32 %v2915_v26, %v2665_v60  ;;  %v2912_v61 = vld [vmem:[%s4882_s5 + $0x88] sm:$0xf0]  ;;  %v2906_v38 = vld [vmem:[%s4882_s5 + $0x58] sm:$0xf0]  ;;  %v2611_v42 = vld [vmem:[%s4882_s5 + $0x3c] sm:$0xf0] }
 0x125   :  { %835 = vmatpush.bf16.msrb.mxu1 %v3584_v41  ;;  %v3611_v62 = vor.u32 %v2912_v61, %v2653_v57  ;;  %4979 = vst [vmem:[#allocation4_spill] sm:$0xff] %v3648_v23  ;;  %995 = vmatpush.bf16.msrb.mxu3 %v3634_v15  ;;  %v3664_v40 = vor.u32 %v2906_v38, %v2629_v37  ;;  %v2597_v57 = vld [vmem:[%s4882_s5 + $0x18] sm:$0xf]  ;;  %v2899_v61 = vld [vmem:[%s4882_s5 + $0x20] sm:$0xf0]  ;;  %vm1293_vm9 = vcmp.eq.s32.totalorder %v3427_v51, 1 }
 0x126   :  { %v380_v7 = vrot.slane %v379_v5, 2  ;;  %4987 = vst [vmem:[#allocation12_spill] sm:$0xff] %v3720_v19 }
 0x127   :  { %4981 = vst [vmem:[#allocation6_spill] sm:$0xff] %v3664_v40 }
 0x128   :  { %v381_v13 = vadd.f32 %v380_v7, %v379_v5  ;;  %v2908_v5 = vld [vmem:[%s4882_s5 + $0x68] sm:$0xf0] }
 0x129   :  { %v3623_v7 = vor.u32 %v2908_v5, %v2633_v3  ;;  %v2898_v3 = vld [vmem:[%s4882_s5 + $0x1c] sm:$0xf]  ;;  %v2599_v5 = vld [vmem:[%s4882_s5 + $0x24] sm:$0xf0] }
 0x12a   :  { %v382_v18 = vrot.slane %v381_v13, 1 }
 0x12b   :  { %982 = vmatpush.bf16.msrb.mxu2 %v3623_v7  ;;  %1232 = vmatpush.bf16.msrb.mxu0 %v3623_v7 }
 0x12c   :  { %v383_v22 = vadd.f32 %v382_v18, %v381_v13  ;;  %v2909_v13 = vld [vmem:[%s4882_s5 + $0x70] sm:$0xf0] }
 0x12d   :  { %v3636_v18 = vor.u32 %v2909_v13, %v2641_v10  ;;  %v3713_v10 = vor.u32 %v2899_v61, %v2597_v57  ;;  %v3718_v13 = vor.u32 %v2898_v3, %v2599_v5  ;;  %v2593_v57 = vld [vmem:[%s4882_s5 + $0x8] sm:$0xf]  ;;  %v2897_v61 = vld [vmem:[%s4882_s5 + $0x10] sm:$0xf0] }
 0x12e   :  { %v398_v35 = vmul.f32 %v3276_v49, %v383_v22  ;;  %v2677_v49 = vld [vmem:[%s4882_s5 + $0xb0] sm:$0xf]  ;;  %v2904_v22 = vld [vmem:[%s4882_s5 + $0x4c] sm:$0xf]  ;;  %v3748_v5 = vor.u32 %v2897_v61, %v2593_v57 }
 0x12f   :  { %v3592_v50 = vor.u32 %v2918_v28, %v2677_v49  ;;  %4978 = vst [vmem:[#allocation3_spill] sm:$0xff] %v3636_v18  ;;  %v2609_v49 = vld [vmem:[%s4882_s5 + $0x30] sm:$0xf]  ;;  %v2902_v28 = vld [vmem:[%s4882_s5 + $0x38] sm:$0xf0]  ;;  %983 = vmatpush.bf16.msrb.mxu2 %v3648_v23  ;;  %1233 = vmatpush.bf16.msrb.mxu0 %v3648_v23 }
 0x130   :  { %v406_v52 = vpack.c.bf16 %v398_v35, %v398_v35  ;;  %v2623_v35 = vld [vmem:[%s4882_s5 + $0x54] sm:$0xf0]  ;;  %4985 = vst [vmem:[#allocation10_spill] sm:$0xff] %v3713_v10 }
 0x131   :  { %4986 = vst [vmem:[#allocation11_spill] sm:$0xff] %v3718_v13 }
 0x132   :  { %v442_v32 = vunpack.c.l.b16 %v406_v52  ;;  %v3662_v52 = vor.u32 %v2904_v22, %v2623_v35  ;;  %4990 = vst [vmem:[#allocation15_spill] sm:$0xff] %v3748_v5 }
 0x134   :  { %v456_v21 = vsel %vm455_vm10, %v442_v32, %v454_v48  ;;  %4980 = vst [vmem:[#allocation5_spill] sm:$0xff] %v3662_v52  ;;  %v2901_v32 = vld [vmem:[%s4882_s5 + $0x34] sm:$0xf]  ;;  %v2617_v48 = vld [vmem:[%s4882_s5 + $0x38] sm:$0xf]  ;;  %996 = vmatpush.bf16.msrb.mxu3 %v3662_v52 }
 0x135   :  { %v457_v53 = vpack.c.b16 %v456_v21, %v456_v21  ;;  %v2903_v21 = vld [vmem:[%s4882_s5 + $0x40] sm:$0xf0]  ;;  %v3690_v60 = vor.u32 %v2901_v32, %v2611_v42  ;;  %v2896_v32 = vld [vmem:[%s4882_s5 + $0x8] sm:$0xf0] }
 0x136   :  { %v3692_v26 = vor.u32 %v2903_v21, %v2617_v48  ;;  %v2895_v42 = vld [vmem:[%s4882_s5 + $0x4] sm:$0xf]  ;;  %v2587_v21 = vld [vmem:[%s4882_s5 + $0xc] sm:$0xf0] }
 0x137   :  { %515 = vmatmul.bf16.vlgmr.msra.gmra.mxu1 %v457_v53  ;;  %v3685_v53 = vor.u32 %v2902_v28, %v2609_v49  ;;  %4983 = vst [vmem:[#allocation8_spill] sm:$0xff] %v3690_v60  ;;  %v2585_v28 = vld [vmem:[%s4882_s5] sm:$0xf]  ;;  %v3746_v3 = vor.u32 %v2895_v42, %v2587_v21 }
 0x138   :  { %1005 = vmatpush.bf16.msra.mxu1 %v3592_v50  ;;  %4984 = vst [vmem:[#allocation9_spill] sm:$0xff] %v3692_v26  ;;  %997 = vmatpush.bf16.msrb.mxu3 %v3690_v60  ;;  %v3735_v48 = vor.u32 %v2896_v32, %v2585_v28 }
 0x139   :  { %4982 = vst [vmem:[#allocation7_spill] sm:$0xff] %v3685_v53  ;;  %984 = vmatpush.bf16.msrb.mxu2 %v3685_v53  ;;  %1234 = vmatpush.bf16.msrb.mxu0 %v3685_v53 }
 0x13a   :  { %4988 = vst [vmem:[#allocation13_spill] sm:$0xff] %v3735_v48 }
 0x13b   :  { %4989 = vst [vmem:[#allocation14_spill] sm:$0xff] %v3746_v3 }
 0x13c   :  { %1006 = vmatpush.bf16.msra.mxu1 %v3602_v54  ;;  %998 = vmatpush.bf16.msrb.mxu3 %v3718_v13 }
 0x13d   :  { %985 = vmatpush.bf16.msrb.mxu2 %v3713_v10  ;;  %1235 = vmatpush.bf16.msrb.mxu0 %v3713_v10 }
 0x140   :  { %1007 = vmatpush.bf16.msra.mxu1 %v3611_v62  ;;  %999 = vmatpush.bf16.msrb.mxu3 %v3746_v3 }
 0x141   :  { %986 = vmatpush.bf16.msrb.mxu2 %v3735_v48  ;;  %1236 = vmatpush.bf16.msrb.mxu0 %v3735_v48 }
 0x144   :  { %1008 = vmatpush.bf16.msra.mxu1 %v3636_v18 }
 0x148   :  { %1009 = vmatpush.bf16.msra.mxu1 %v3664_v40 }
 0x14c   :  { %1010 = vmatpush.bf16.msra.mxu1 %v3692_v26 }
 0x150   :  { %1011 = vmatpush.bf16.msra.mxu1 %v3720_v19 }
 0x154   :  { %1012 = vmatpush.bf16.msra.mxu1 %v3748_v5 }
 0x16c   :  { %v762_v20 = vpop.f32.mrf.mxu2 }
 0x174   :  { %v764_v38 = vpop.f32.mrf.mxu2 }
 0x17b   :  { %v775_v22 = vpop.f32.mrf.mxu3 }
 0x17c   :  { %v776_v35 = vadd.f32 %v775_v22, %v762_v20 }
 0x17e   :  { %v779_v37 = vpack.c.bf16 %v776_v35, %v776_v35 }
 0x180   :  { %836 = vmatmul.bf16.vlgmr.msrb.gmra.mxu1 %v779_v37 }
 0x181   :  { %1178 = vmatpush.bf16.msrb.mxu1 %v3297_v36 }
 0x183   :  { %v777_v49 = vpop.f32.mrf.mxu3 }
 0x184   :  { %v632_v49 = vld [vmem:[%s4884_s6] sm:$0x3] }
 0x185   :  { %1179 = vmatpush.bf16.msrb.mxu1 %v3314_v45  ;;  %v3780_v32 = vperm.slane %v632_v49, 0  ;;  %v3782_v42 = vperm.slane %v632_v49, 1 }
 0x187   :  { %4992 = vst [vmem:[#allocation17_spill] sm:$0xff] %v3780_v32 }
 0x188   :  { %4993 = vst [vmem:[#allocation18_spill] sm:$0xff] %v3782_v42 }
 0x189   :  { %1180 = vmatpush.bf16.msrb.mxu1 %v3331_v55 }
 0x18d   :  { %1181 = vmatpush.bf16.msrb.mxu1 %v3347_v0 }
 0x191   :  { %1182 = vmatpush.bf16.msrb.mxu1 %v3366_v11 }
 0x195   :  { %1183 = vmatpush.bf16.msrb.mxu1 %v3381_v2 }
 0x199   :  { %1184 = vmatpush.bf16.msrb.mxu1 %v3402_v30 }
 0x19d   :  { %1185 = vmatpush.bf16.msrb.mxu1 %v3420_v44 }
 0x1b4   :  { %v516_v27 = vpop.f32.mrf.mxu1 }
 0x1b5   :  { %v517_v20 = vadd.f32 %v2979_v6, %v516_v27 }
 0x1b7   :  { %v850_v22 = vpack.c.bf16 %v517_v20, %v517_v20 }
 0x1b9   :  { %987 = vmatmul.bf16.vlgmr.msrb.gmra.mxu2 %v850_v22  ;;  %1000 = vmatmul.bf16.vlgmr.msrb.gmra.mxu3 %v850_v22 }
 0x1ba   :  { %1013 = vmatmul.bf16.vlgmr.msra.gmra.mxu1 %v850_v22 }
 0x1bb   :  { %1242 = vmatpush.bf16.msra.mxu1 %v3500_v25 }
 0x1bc   :  { %v518_v35 = vpop.f32.mrf.mxu1 }
 0x1bf   :  { %1243 = vmatpush.bf16.msra.mxu1 %v3526_v47 }
 0x1c3   :  { %1244 = vmatpush.bf16.msra.mxu1 %v3551_v63 }
 0x1c7   :  { %1245 = vmatpush.bf16.msra.mxu1 %v3634_v15 }
 0x1cb   :  { %1246 = vmatpush.bf16.msra.mxu1 %v3662_v52 }
 0x1cf   :  { %1247 = vmatpush.bf16.msra.mxu1 %v3690_v60 }
 0x1d3   :  { %1248 = vmatpush.bf16.msra.mxu1 %v3718_v13 }
 0x1d7   :  { %1249 = vmatpush.bf16.msra.mxu1 %v3746_v3 }
 0x1fd   :  { %v3773_v37 = vpop.f32.mrf.mxu1 }
 0x1fe   :  { %4991 = vst [vmem:[#allocation16_spill] sm:$0xff] %v3773_v37 }
 0x205   :  { %v839_v38 = vpop.f32.mrf.mxu1 }
 0x206   :  { %v3787_v38 = vadd.s32 128, %v3427_v51 }
 0x237   :  { %v3778_v28 = vpop.f32.mrf.mxu1 }
 0x23c   :  { %v988_v21 = vpop.f32.mrf.mxu2  ;;  %v1001_v57 = vpop.f32.mrf.mxu3 }
 0x23d   :  { %v1018_v61 = vadd.f32 %v988_v21, %v3780_v32  ;;  %v1019_v6 = vadd.f32 %v1001_v57, %v3782_v42  ;;  %v3794_v57 = vld [vmem:[%s4885_s8 + $0x38] sm:$0xff] }
 0x23e   :  { %1149 = vmatpush.bf16.msra.mxu2 %v3794_v57 }
 0x23f   :  { %v1016_v27 = vpop.f32.mrf.mxu1  ;;  %v1020_v20 = vmax.f32 %v1018_v61, %v1019_v6 }
 0x240   :  { %v3799_v27 = vld [vmem:[%s4885_s8 + $0x78] sm:$0xff] }
 0x241   :  { %1021 = vmax.xlane.f32.xlu0 %v1020_v20  ;;  %4994 = vst [vmem:[#allocation19_spill] sm:$0xff] %v3799_v27  ;;  %1162 = vmatpush.bf16.msra.mxu3 %v3799_v27  ;;  %v3831_v20 = vld [vmem:[%s4885_s8 + $0x20] sm:$0xff] }
 0x242   :  { %1316 = vmatpush.bf16.msra.mxu0 %v3799_v27 }
 0x244   :  { %v990_v22 = vpop.f32.mrf.mxu2  ;;  %v1003_v35 = vpop.f32.mrf.mxu3 }
 0x245   :  { %v3837_v22 = vld [vmem:[%s4885_s8 + $0x60] sm:$0xff]  ;;  %v3844_v35 = vld [vmem:[%s4885_s8 + $0x18] sm:$0xff] }
 0x246   :  { %4997 = vst [vmem:[#allocation22_spill] sm:$0xff] %v3837_v22 }
 0x247   :  { %4998 = vst [vmem:[#allocation23_spill] sm:$0xff] %v3844_v35 }
 0x2b4   :  { %v1022_v4 = vpop.xlane.xlu0 %1021 }
 0x2b5   :  { %vm1023_vm11 = vcmp.eq.f32.partialorder %v1018_v61, %v1022_v4  ;;  %vm1024_vm12 = vcmp.eq.f32.partialorder %v1019_v6, %v1022_v4  ;;  %v3805_v4 = vld [vmem:[%s4885_s8 + $0x30] sm:$0xff]  ;;  %v3818_v61 = vld [vmem:[%s4885_s8 + $0x28] sm:$0xff] }
 0x2b6   :  { %v1025_v49 = vsel %vm1023_vm11, %v3427_v51, 256  ;;  %v1026_v37 = vsel %vm1024_vm12, %v3787_v38, 256  ;;  %1150 = vmatpush.bf16.msra.mxu2 %v3805_v4  ;;  %v3824_v6 = vld [vmem:[%s4885_s8 + $0x68] sm:$0xff] }
 0x2b7   :  { %vm1027_vm13 = vcmp.lt.s32.totalorder %v1025_v49, %v1026_v37  ;;  %4996 = vst [vmem:[#allocation21_spill] sm:$0xff] %v3824_v6 }
 0x2b8   :  { %v1028_v3 = vsel %vm1027_vm13, %v1025_v49, %v1026_v37  ;;  %v3811_v37 = vld [vmem:[%s4885_s8 + $0x70] sm:$0xff]  ;;  %v3850_v49 = vld [vmem:[%s4885_s8 + $0x58] sm:$0xff] }
 0x2b9   :  { %v1030_v21 = vshra.s32 %v1028_v3, 16  ;;  %4995 = vst [vmem:[#allocation20_spill] sm:$0xff] %v3811_v37  ;;  %1163 = vmatpush.bf16.msra.mxu3 %v3811_v37  ;;  %1317 = vmatpush.bf16.msra.mxu0 %v3811_v37  ;;  %v3876_v37 = vld [vmem:[%s4885_s8 + $0x48] sm:$0xff]  ;;  %v1029_v27 = vand.u32 65535, %v1028_v3 }
 0x2ba   :  { %1151 = vmatpush.bf16.msra.mxu2 %v3818_v61  ;;  %4999 = vst [vmem:[#allocation24_spill] sm:$0xff] %v3850_v49 }
 0x2bb   :  { %v1032_v32 = vcvt.s32.f32 %v1030_v21  ;;  %v3857_v21 = vld [vmem:[%s4885_s8 + $0x10] sm:$0xff]  ;;  %5003 = vst [vmem:[#allocation28_spill] sm:$0xff] %v3876_v37  ;;  %v1031_v48 = vcvt.s32.f32 %v1029_v27 }
 0x2bc   :  { %5000 = vst [vmem:[#allocation25_spill] sm:$0xff] %v3857_v21 }
 0x2bd   :  { %1033 = vmin.xlane.f32.xlu0 %v1032_v32  ;;  %1164 = vmatpush.bf16.msra.mxu3 %v3824_v6 }
 0x2be   :  { %1318 = vmatpush.bf16.msra.mxu0 %v3824_v6  ;;  %1152 = vmatpush.bf16.msra.mxu2 %v3831_v20  ;;  %v3863_v6 = vld [vmem:[%s4885_s8 + $0x50] sm:$0xff] }
 0x2bf   :  { %5001 = vst [vmem:[#allocation26_spill] sm:$0xff] %v3863_v6 }
 0x2c1   :  { %1165 = vmatpush.bf16.msra.mxu3 %v3837_v22 }
 0x2c2   :  { %1319 = vmatpush.bf16.msra.mxu0 %v3837_v22  ;;  %1153 = vmatpush.bf16.msra.mxu2 %v3844_v35  ;;  %v3870_v22 = vld [vmem:[%s4885_s8 + $0x8] sm:$0xff] }
 0x2c3   :  { %5002 = vst [vmem:[#allocation27_spill] sm:$0xff] %v3870_v22 }
 0x2c5   :  { %1166 = vmatpush.bf16.msra.mxu3 %v3850_v49 }
 0x2c6   :  { %1320 = vmatpush.bf16.msra.mxu0 %v3850_v49  ;;  %1154 = vmatpush.bf16.msra.mxu2 %v3857_v21  ;;  %v3883_v49 = vld [vmem:[%s4885_s8] sm:$0xff] }
 0x2c7   :  { %5004 = vst [vmem:[#allocation29_spill] sm:$0xff] %v3883_v49 }
 0x2c9   :  { %1167 = vmatpush.bf16.msra.mxu3 %v3863_v6 }
 0x2ca   :  { %1321 = vmatpush.bf16.msra.mxu0 %v3863_v6  ;;  %1155 = vmatpush.bf16.msra.mxu2 %v3870_v22 }
 0x2cd   :  { %1168 = vmatpush.bf16.msra.mxu3 %v3876_v37 }
 0x2ce   :  { %1322 = vmatpush.bf16.msra.mxu0 %v3876_v37  ;;  %1156 = vmatpush.bf16.msra.mxu2 %v3883_v49  ;;  %v5006_v37 = vmov 1.0|1.0  }
 0x2d2   :  { %1191 = vmatpush.bf16.msrb.mxu2 %v3302_v34 }
 0x2d6   :  { %1192 = vmatpush.bf16.msrb.mxu2 %v3319_v46 }
 0x2da   :  { %1193 = vmatpush.bf16.msrb.mxu2 %v3336_v56 }
 0x2de   :  { %1194 = vmatpush.bf16.msrb.mxu2 %v3352_v1 }
 0x2e2   :  { %1195 = vmatpush.bf16.msrb.mxu2 %v3371_v12 }
 0x2e6   :  { %1196 = vmatpush.bf16.msrb.mxu2 %v3386_v16 }
 0x2ea   :  { %1197 = vmatpush.bf16.msrb.mxu2 %v3407_v31 }
 0x2ee   :  { %1198 = vmatpush.bf16.msrb.mxu2 %v3425_v43 }
 0x330   :  { %v1034_v42 = vpop.xlane.xlu0 %1033 }
 0x331   :  { %vm1035_vm14 = vcmp.eq.f32.partialorder %v1032_v32, %v1034_v42 }
 0x332   :  { %v1036_v13 = vsel %vm1035_vm14, %v1031_v48, inf  ;;  %v3899_v48 = vld [vmem:[%s4885_s8 + $0x40] sm:$0xff] }
 0x333   :  { %1037 = vmin.xlane.f32.xlu1 %v1036_v13  ;;  %5005 = vst [vmem:[#allocation30_spill] sm:$0xff] %v3899_v48  ;;  %1169 = vmatpush.bf16.msra.mxu3 %v3899_v48  ;;  %v1040_v13 = vcvt.f32.s32 %v1034_v42 }
 0x334   :  { %1323 = vmatpush.bf16.msra.mxu0 %v3899_v48 }
 0x335   :  { %v1041_v32 = vshll.u32 %v1040_v13, 16  ;;  %v5010_v13 = vld [vmem:[#allocation13_spill] sm:$0xff] }
 0x337   :  { %1205 = vmatpush.bf16.msrb.mxu3 %v3478_v8 }
 0x33b   :  { %1206 = vmatpush.bf16.msrb.mxu3 %v3484_v14 }
 0x33f   :  { %1207 = vmatpush.bf16.msrb.mxu3 %v3512_v39 }
 0x343   :  { %1208 = vmatpush.bf16.msrb.mxu3 %v3545_v58 }
 0x347   :  { %1209 = vmatpush.bf16.msrb.mxu3 %v3559_v9 }
 0x34b   :  { %1210 = vmatpush.bf16.msrb.mxu3 %v3570_v17 }
 0x34f   :  { %1211 = vmatpush.bf16.msrb.mxu3 %v3576_v33 }
 0x353   :  { %1212 = vmatpush.bf16.msrb.mxu3 %v3584_v41 }
 0x3a6   :  { %v1038_v3 = vpop.xlane.xlu1 %1037 }
 0x3a7   :  { %v1039_v27 = vcvt.f32.s32 %v1038_v3  ;;  %v5011_v3 = vld [vmem:[#allocation14_spill] sm:$0xff] }
 0x3a9   :  { %v3911_v48 = vadd.s32 %v1041_v32, %v1039_v27  ;;  %v4003_v32 = vld [vmem:[%s4883_s11] ss:$0 sm:$0xff]  ;;  %v5013_v27 = vld [vmem:[#allocation16_spill] sm:$0xff] }
 0x3aa   :  { %5012 = vst [vmem:[#allocation31_spill] sm:$0xff] %v4003_v32  ;;  %v838_v42 = vadd.f32 %v4003_v32, %v5013_v27 }
 0x3ab   :  { %vm1045_vm15 = vcmp.eq.s32.totalorder %v3427_v51, %v3911_v48  ;;  %vm1046_vm0 = vcmp.eq.s32.totalorder %v3787_v38, %v3911_v48 }
 0x3ac   :  { %vm2745_vm1 = vmpackc.low %vm1045_vm15, %vm1045_vm15 }
 0x3ad   :  { %2746 = vmatmul.msk.bf16.vlgmr.msra.gmra.mxu2 %vm2745_vm1, %v5006_v37  ;;  %vm3918_vm2 = vmpackc.low %vm1046_vm0, %vm1046_vm0  ;;  %2750 = vmatmul.msk.bf16.vlgmr.msrb.gmra.mxu1 %vm2745_vm1, %v5006_v37 }
 0x3ae   :  { %2748 = vmatmul.msk.bf16.vlgmr.msra.gmra.mxu3 %vm3918_vm2, %v5006_v37  ;;  %1255 = vmatpush.bf16.msra.mxu2 %v3592_v50 }
 0x3af   :  { %1303 = vmatpush.bf16.msra.mxu3 %v3794_v57  ;;  %1332 = vmatpush.bf16.msrb.mxu1 %v3297_v36 }
 0x3b2   :  { %1256 = vmatpush.bf16.msra.mxu2 %v3602_v54 }
 0x3b3   :  { %1304 = vmatpush.bf16.msra.mxu3 %v3805_v4  ;;  %1333 = vmatpush.bf16.msrb.mxu1 %v3314_v45 }
 0x3b6   :  { %1257 = vmatpush.bf16.msra.mxu2 %v3611_v62 }
 0x3b7   :  { %1305 = vmatpush.bf16.msra.mxu3 %v3818_v61  ;;  %1334 = vmatpush.bf16.msrb.mxu1 %v3331_v55  ;;  %v3964_v55 = vld [vmem:[%s4886_s7] ss:$0 sm:$0xff] }
 0x3ba   :  { %1258 = vmatpush.bf16.msra.mxu2 %v3636_v18 }
 0x3bb   :  { %1306 = vmatpush.bf16.msra.mxu3 %v3831_v20  ;;  %1335 = vmatpush.bf16.msrb.mxu1 %v3347_v0 }
 0x3bd   :  { %2752 = vmatmul.msk.bf16.vlgmr.msrb.gmra.mxu2 %vm3918_vm2, %v5006_v37  ;;  %vm1447_vm2 = vcmp.eq.s32.totalorder %v3427_v51, 2 }
 0x3be   :  { %1259 = vmatpush.bf16.msra.mxu2 %v3664_v40 }
 0x3bf   :  { %1307 = vmatpush.bf16.msra.mxu3 %v3844_v35  ;;  %1336 = vmatpush.bf16.msrb.mxu1 %v3366_v11 }
 0x3c2   :  { %1260 = vmatpush.bf16.msra.mxu2 %v3692_v26 }
 0x3c3   :  { %1308 = vmatpush.bf16.msra.mxu3 %v3857_v21  ;;  %1337 = vmatpush.bf16.msrb.mxu1 %v3381_v2 }
 0x3c6   :  { %1261 = vmatpush.bf16.msra.mxu2 %v3720_v19 }
 0x3c7   :  { %1309 = vmatpush.bf16.msra.mxu3 %v3870_v22  ;;  %1338 = vmatpush.bf16.msrb.mxu1 %v3402_v30 }
 0x3ca   :  { %1262 = vmatpush.bf16.msra.mxu2 %v3748_v5 }
 0x3cb   :  { %1310 = vmatpush.bf16.msra.mxu3 %v3883_v49  ;;  %1339 = vmatpush.bf16.msrb.mxu1 %v3420_v44 }
 0x3ce   :  { %1345 = vmatpush.bf16.msrb.mxu2 %v3302_v34 }
 0x3d2   :  { %1346 = vmatpush.bf16.msrb.mxu2 %v3319_v46 }
 0x3d6   :  { %1347 = vmatpush.bf16.msrb.mxu2 %v3336_v56 }
 0x3da   :  { %1348 = vmatpush.bf16.msrb.mxu2 %v3352_v1 }
 0x3de   :  { %1349 = vmatpush.bf16.msrb.mxu2 %v3371_v12 }
 0x3e2   :  { %1350 = vmatpush.bf16.msrb.mxu2 %v3386_v16 }
 0x3e6   :  { %1351 = vmatpush.bf16.msrb.mxu2 %v3407_v31 }
 0x3ea   :  { %1352 = vmatpush.bf16.msrb.mxu2 %v3425_v43 }
 0x42a   :  { %v1187_v36 = vpop.f32.mrf.mxu1 }
 0x430   :  { %v1158_v34 = vpop.f32.mrf.mxu2 }
 0x431   :  { %v1171_v45 = vpop.f32.mrf.mxu3 }
 0x432   :  { %v1172_v46 = vadd.f32 %v1171_v45, %v1158_v34  ;;  %v1189_v56 = vpop.f32.mrf.mxu1 }
 0x433   :  { %v5014_v56 = vld [vmem:[#allocation17_spill] sm:$0xff] }
 0x434   :  { %v1175_v0 = vadd.f32 %v1172_v46, %v3778_v28  ;;  %v5009_v28 = vld [vmem:[#allocation11_spill] sm:$0xff] }
 0x436   :  { %v1176_v1 = vadd.f32 %v3964_v55, %v1175_v0 }
 0x438   :  { %3016 = vtanh.f32 %v1176_v1  ;;  %v1160_v11 = vpop.f32.mrf.mxu2  ;;  %v5015_v1 = vld [vmem:[#allocation18_spill] sm:$0xff] }
 0x439   :  { %v1173_v12 = vpop.f32.mrf.mxu3 }
 0x43e   :  { %v3017_v2 = vpop.eup %3016 }
 0x43f   :  { %v1228_v16 = vpack.c.bf16 %v3017_v2, %v3017_v2 }
 0x440   :  { %v1200_v30 = vpop.f32.mrf.mxu2 }
 0x441   :  { %v1201_v31 = vadd.f32 %v1200_v30, %v1187_v36  ;;  %1237 = vmatmul.bf16.vlgmr.msrb.gmra.mxu0 %v1228_v16  ;;  %1250 = vmatmul.bf16.vlgmr.msra.gmra.mxu1 %v1228_v16  ;;  %v841_v36 = vmul.f32 %v838_v42, %v838_v42 }
 0x442   :  { %1263 = vmatmul.bf16.vlgmr.msra.gmra.mxu2 %v1228_v16  ;;  %1383 = vmatpush.bf16.msrb.mxu0 %v3495_v24 }
 0x443   :  { %v1204_v44 = vpack.c.bf16 %v1201_v31, %v1201_v31  ;;  %1396 = vmatpush.bf16.msra.mxu1 %v3500_v25  ;;  %1409 = vmatpush.bf16.msra.mxu2 %v3592_v50  ;;  %v842_v46 = vmul.f32 %v841_v36, %v838_v42 }
 0x445   :  { %1213 = vmatmul.bf16.vlgmr.msrb.gmra.mxu3 %v1204_v44  ;;  %v843_v2 = vmul.f32 0.044715, %v842_v46 }
 0x446   :  { %1359 = vmatpush.bf16.msrb.mxu3 %v3478_v8  ;;  %1384 = vmatpush.bf16.msrb.mxu0 %v3515_v29 }
 0x447   :  { %1397 = vmatpush.bf16.msra.mxu1 %v3526_v47  ;;  %1410 = vmatpush.bf16.msra.mxu2 %v3602_v54  ;;  %v844_v44 = vadd.f32 %v843_v2, %v838_v42 }
 0x448   :  { %v1202_v43 = vpop.f32.mrf.mxu2 }
 0x449   :  { %v845_v27 = vmul.f32 0.7978846, %v844_v44 }
 0x44a   :  { %1360 = vmatpush.bf16.msrb.mxu3 %v3484_v14  ;;  %1385 = vmatpush.bf16.msrb.mxu0 %v3548_v59 }
 0x44b   :  { %1398 = vmatpush.bf16.msra.mxu1 %v3551_v63  ;;  %1411 = vmatpush.bf16.msra.mxu2 %v3611_v62  ;;  %3018 = vtanh.f32 %v845_v27 }
 0x44e   :  { %1361 = vmatpush.bf16.msrb.mxu3 %v3512_v39  ;;  %1386 = vmatpush.bf16.msrb.mxu0 %v3623_v7 }
 0x44f   :  { %1399 = vmatpush.bf16.msra.mxu1 %v3634_v15  ;;  %1412 = vmatpush.bf16.msra.mxu2 %v3636_v18 }
 0x452   :  { %1362 = vmatpush.bf16.msrb.mxu3 %v3545_v58  ;;  %1387 = vmatpush.bf16.msrb.mxu0 %v3648_v23 }
 0x453   :  { %1400 = vmatpush.bf16.msra.mxu1 %v3662_v52  ;;  %1413 = vmatpush.bf16.msra.mxu2 %v3664_v40 }
 0x456   :  { %1363 = vmatpush.bf16.msrb.mxu3 %v3559_v9  ;;  %1388 = vmatpush.bf16.msrb.mxu0 %v3685_v53 }
 0x457   :  { %1401 = vmatpush.bf16.msra.mxu1 %v3690_v60  ;;  %1414 = vmatpush.bf16.msra.mxu2 %v3692_v26 }
 0x45a   :  { %1364 = vmatpush.bf16.msrb.mxu3 %v3570_v17  ;;  %1389 = vmatpush.bf16.msrb.mxu0 %v3713_v10 }
 0x45b   :  { %1402 = vmatpush.bf16.msra.mxu1 %v5009_v28  ;;  %1415 = vmatpush.bf16.msra.mxu2 %v3720_v19 }
 0x45e   :  { %1365 = vmatpush.bf16.msrb.mxu3 %v3576_v33  ;;  %1390 = vmatpush.bf16.msrb.mxu0 %v5010_v13 }
 0x45f   :  { %1403 = vmatpush.bf16.msra.mxu1 %v5011_v3  ;;  %1416 = vmatpush.bf16.msra.mxu2 %v3748_v5 }
 0x462   :  { %1366 = vmatpush.bf16.msrb.mxu3 %v3584_v41 }
 0x4be   :  { %v1238_v34 = vpop.f32.mrf.mxu0  ;;  %v1251_v45 = vpop.f32.mrf.mxu1 }
 0x4bf   :  { %v1268_v0 = vadd.f32 %v1238_v34, %v5014_v56  ;;  %v1269_v11 = vadd.f32 %v1251_v45, %v5015_v1  ;;  %v3019_v1 = vpop.eup %3018 }
 0x4c0   :  { %v847_v46 = vadd.f32 1.0, %v3019_v1 }
 0x4c1   :  { %v1270_v12 = vmax.f32 %v1268_v0, %v1269_v11 }
 0x4c2   :  { %v848_v28 = vmul.f32 0.5, %v847_v46  ;;  %v5016_v46 = vld [vmem:[#allocation19_spill] sm:$0xff] }
 0x4c3   :  { %1271 = vmax.xlane.f32.xlu1 %v1270_v12 }
 0x4c4   :  { %v849_v2 = vmul.f32 %v848_v28, %v838_v42 }
 0x4c5   :  { %v4009_v16 = vpop.f32.mrf.mxu2 }
 0x4c6   :  { %v1240_v30 = vpop.f32.mrf.mxu0  ;;  %v1253_v31 = vpop.f32.mrf.mxu1 }
 0x4c8   :  { %v1214_v43 = vpop.f32.mrf.mxu3 }
 0x4c9   :  { %v1215_v5 = vadd.f32 %v4003_v32, %v1214_v43 }
 0x4cb   :  { %v1218_v3 = vmul.f32 %v1215_v5, %v1215_v5 }
 0x4cd   :  { %v1219_v13 = vmul.f32 %v1218_v3, %v1215_v5  ;;  %v1266_v19 = vpop.f32.mrf.mxu2 }
 0x4cf   :  { %v1220_v36 = vmul.f32 0.044715, %v1219_v13 }
 0x4d0   :  { %v1216_v34 = vpop.f32.mrf.mxu3 }
 0x4d1   :  { %v1221_v56 = vadd.f32 %v1220_v36, %v1215_v5  ;;  %v1044_v34 = vsel %vm1043_vm8, %v3911_v48, 0  ;;  %v4032_v48 = vld [vmem:[%s4878_s9 + $0x38] sm:$0xff] }
 0x4d3   :  { %v1222_v45 = vmul.f32 0.7978846, %v1221_v56 }
 0x4d5   :  { %3020 = vtanh.f32 %v1222_v45 }
 0x4db   :  { %v3021_v12 = vpop.eup %3020 }
 0x4dc   :  { %v1224_v30 = vadd.f32 1.0, %v3021_v12  ;;  %v4038_v12 = vld [vmem:[%s4878_s9 + $0x78] sm:$0xff] }
 0x4de   :  { %v1225_v31 = vmul.f32 0.5, %v1224_v30  ;;  %v5017_v30 = vld [vmem:[#allocation20_spill] sm:$0xff] }
 0x4e0   :  { %v1226_v10 = vmul.f32 %v1225_v31, %v1215_v5  ;;  %v4046_v31 = vld [vmem:[%s4878_s9 + $0x30] sm:$0xff] }
 0x4e2   :  { %v4012_v26 = vadd.f32 %v1226_v10, %v849_v2  ;;  %v4052_v2 = vld [vmem:[%s4878_s9 + $0x70] sm:$0xff] }
 0x536   :  { %v1272_v44 = vpop.xlane.xlu1 %1271 }
 0x537   :  { %vm1273_vm3 = vcmp.eq.f32.partialorder %v1268_v0, %v1272_v44  ;;  %vm1274_vm4 = vcmp.eq.f32.partialorder %v1269_v11, %v1272_v44  ;;  %v5018_v44 = vld [vmem:[#allocation21_spill] sm:$0xff] }
 0x538   :  { %v1275_v19 = vsel %vm1273_vm3, %v3427_v51, 256  ;;  %v1276_v13 = vsel %vm1274_vm4, %v3787_v38, 256 }
 0x539   :  { %vm1277_vm6 = vcmp.lt.s32.totalorder %v1275_v19, %v1276_v13 }
 0x53a   :  { %v1278_v3 = vsel %vm1277_vm6, %v1275_v19, %v1276_v13  ;;  %v4060_v19 = vld [vmem:[%s4878_s9 + $0x28] sm:$0xff] }
 0x53b   :  { %v1280_v56 = vshra.s32 %v1278_v3, 16  ;;  %v1279_v1 = vand.u32 65535, %v1278_v3  ;;  %v4066_v13 = vld [vmem:[%s4878_s9 + $0x68] sm:$0xff]  ;;  %v5019_v3 = vld [vmem:[#allocation22_spill] sm:$0xff] }
 0x53d   :  { %v1282_v43 = vcvt.s32.f32 %v1280_v56  ;;  %v1281_v36 = vcvt.s32.f32 %v1279_v1  ;;  %v4074_v56 = vld [vmem:[%s4878_s9 + $0x20] sm:$0xff]  ;;  %v5020_v1 = vld [vmem:[#allocation24_spill] sm:$0xff] }
 0x53f   :  { %1283 = vmin.xlane.f32.xlu2 %v1282_v43 }
 0x5b2   :  { %v1284_v27 = vpop.xlane.xlu2 %1283 }
 0x5b3   :  { %vm1285_vm7 = vcmp.eq.f32.partialorder %v1282_v43, %v1284_v27  ;;  %v1290_v10 = vcvt.f32.s32 %v1284_v27  ;;  %v4080_v43 = vld [vmem:[%s4878_s9 + $0x60] sm:$0xff]  ;;  %v4088_v27 = vld [vmem:[%s4878_s9 + $0x18] sm:$0xff] }
 0x5b4   :  { %v1286_v28 = vsel %vm1285_vm7, %v1281_v36, inf  ;;  %5021 = vst [vmem:[#allocation16_spill] sm:$0xff] %v4088_v27  ;;  %v4094_v36 = vld [vmem:[%s4878_s9 + $0x58] sm:$0xff] }
 0x5b5   :  { %1287 = vmin.xlane.f32.xlu2 %v1286_v28  ;;  %v1291_v42 = vshll.u32 %v1290_v10, 16  ;;  %5022 = vst [vmem:[#allocation19_spill] sm:$0xff] %v4094_v36  ;;  %v4102_v28 = vld [vmem:[%s4878_s9 + $0x10] sm:$0xff] }
 0x5b6   :  { %5023 = vst [vmem:[#allocation20_spill] sm:$0xff] %v4102_v28  ;;  %v4108_v10 = vld [vmem:[%s4878_s9 + $0x50] sm:$0xff] }
 0x5b7   :  { %5024 = vst [vmem:[#allocation21_spill] sm:$0xff] %v4108_v10 }
 0x628   :  { %v1288_v5 = vpop.xlane.xlu2 %1287 }
 0x629   :  { %v1289_v0 = vcvt.f32.s32 %v1288_v5  ;;  %v5025_v5 = vld [vmem:[#allocation28_spill] sm:$0xff] }
 0x62b   :  { %v1292_v11 = vadd.s32 %v1291_v42, %v1289_v0  ;;  %v4116_v42 = vld [vmem:[%s4878_s9 + $0x8] sm:$0xff] }
 0x62c   :  { %5026 = vst [vmem:[#allocation22_spill] sm:$0xff] %v4116_v42  ;;  %v4122_v0 = vld [vmem:[%s4878_s9 + $0x48] sm:$0xff] }
 0x62d   :  { %v4019_v45 = vsel %vm1293_vm9, %v1292_v11, %v1044_v34  ;;  %vm1295_vm10 = vcmp.eq.s32.totalorder %v3427_v51, %v1292_v11  ;;  %vm1296_vm11 = vcmp.eq.s32.totalorder %v3787_v38, %v1292_v11  ;;  %5027 = vst [vmem:[#allocation32_spill] sm:$0xff] %v4122_v0  ;;  %v5028_v11 = vld [vmem:[#allocation30_spill] sm:$0xff] }
 0x62e   :  { %vm2755_vm12 = vmpackc.low %vm1295_vm10, %vm1295_vm10  ;;  %v4130_v34 = vld [vmem:[%s4878_s9] sm:$0xff] }
 0x62f   :  { %2756 = vmatmul.msk.bf16.vlgmr.msra.gmra.mxu3 %vm2755_vm12, %v5006_v37  ;;  %vm2757_vm13 = vmpackc.low %vm1296_vm11, %vm1296_vm11  ;;  %2760 = vmatmul.msk.bf16.vlgmr.msrb.gmra.mxu1 %vm2755_vm12, %v5006_v37  ;;  %5029 = vst [vmem:[#allocation33_spill] sm:$0xff] %v4130_v34  ;;  %vm1601_vm12 = vcmp.eq.s32.totalorder %v3427_v51, 3 }
 0x630   :  { %2758 = vmatmul.msk.bf16.vlgmr.msra.gmra.mxu0 %vm2757_vm13, %v5006_v37  ;;  %2762 = vmatmul.msk.bf16.vlgmr.msrb.gmra.mxu2 %vm2757_vm13, %v5006_v37 }
 0x631   :  { %1457 = vmatpush.bf16.msra.mxu3 %v3794_v57  ;;  %1470 = vmatpush.bf16.msra.mxu0 %v5016_v46 }
 0x632   :  { %1486 = vmatpush.bf16.msrb.mxu1 %v4032_v48  ;;  %1499 = vmatpush.bf16.msrb.mxu2 %v4038_v12 }
 0x635   :  { %1458 = vmatpush.bf16.msra.mxu3 %v3805_v4  ;;  %1471 = vmatpush.bf16.msra.mxu0 %v5017_v30 }
 0x636   :  { %1487 = vmatpush.bf16.msrb.mxu1 %v4046_v31  ;;  %1500 = vmatpush.bf16.msrb.mxu2 %v4052_v2 }
 0x639   :  { %1459 = vmatpush.bf16.msra.mxu3 %v3818_v61  ;;  %1472 = vmatpush.bf16.msra.mxu0 %v5018_v44 }
 0x63a   :  { %1488 = vmatpush.bf16.msrb.mxu1 %v4060_v19  ;;  %1501 = vmatpush.bf16.msrb.mxu2 %v4066_v13 }
 0x63d   :  { %1460 = vmatpush.bf16.msra.mxu3 %v3831_v20  ;;  %1473 = vmatpush.bf16.msra.mxu0 %v5019_v3 }
 0x63e   :  { %1489 = vmatpush.bf16.msrb.mxu1 %v4074_v56  ;;  %1502 = vmatpush.bf16.msrb.mxu2 %v4080_v43 }
 0x641   :  { %1461 = vmatpush.bf16.msra.mxu3 %v3844_v35  ;;  %1474 = vmatpush.bf16.msra.mxu0 %v5020_v1 }
 0x642   :  { %1490 = vmatpush.bf16.msrb.mxu1 %v4088_v27  ;;  %1503 = vmatpush.bf16.msrb.mxu2 %v4094_v36 }
 0x645   :  { %1462 = vmatpush.bf16.msra.mxu3 %v3857_v21  ;;  %1475 = vmatpush.bf16.msra.mxu0 %v3863_v6 }
 0x646   :  { %1491 = vmatpush.bf16.msrb.mxu1 %v4102_v28  ;;  %1504 = vmatpush.bf16.msrb.mxu2 %v4108_v10 }
 0x649   :  { %1463 = vmatpush.bf16.msra.mxu3 %v3870_v22  ;;  %1476 = vmatpush.bf16.msra.mxu0 %v5025_v5 }
 0x64a   :  { %1492 = vmatpush.bf16.msrb.mxu1 %v4116_v42  ;;  %1505 = vmatpush.bf16.msrb.mxu2 %v4122_v0  ;;  %v4136_v42 = vld [vmem:[%s4878_s9 + $0x40] sm:$0xff] }
 0x64b   :  { %5030 = vst [vmem:[#allocation34_spill] sm:$0xff] %v4136_v42 }
 0x64d   :  { %1464 = vmatpush.bf16.msra.mxu3 %v3883_v49  ;;  %1477 = vmatpush.bf16.msra.mxu0 %v5028_v11 }
 0x64e   :  { %1493 = vmatpush.bf16.msrb.mxu1 %v4130_v34  ;;  %1506 = vmatpush.bf16.msrb.mxu2 %v4136_v42 }
 0x6ac   :  { %v1341_v5 = vpop.f32.mrf.mxu1 }
 0x6ad   :  { %v1325_v0 = vpop.f32.mrf.mxu0 }
 0x6b2   :  { %v1312_v22 = vpop.f32.mrf.mxu3 }
 0x6b3   :  { %v1326_v49 = vadd.f32 %v1325_v0, %v1312_v22  ;;  %v1354_v10 = vpop.f32.mrf.mxu2 }
 0x6b4   :  { %v1355_v11 = vadd.f32 %v1354_v10, %v1341_v5  ;;  %v1343_v28 = vpop.f32.mrf.mxu1 }
 0x6b5   :  { %v1329_v6 = vadd.f32 %v1326_v49, %v4009_v16  ;;  %v1327_v21 = vpop.f32.mrf.mxu0  ;;  %v5038_v16 = vld [vmem:[#allocation17_spill] sm:$0xff] }
 0x6b6   :  { %v1358_v36 = vpack.c.bf16 %v1355_v11, %v1355_v11 }
 0x6b7   :  { %v1330_v34 = vadd.f32 %v3964_v55, %v1329_v6 }
 0x6b8   :  { %1367 = vmatmul.bf16.vlgmr.msrb.gmra.mxu3 %v1358_v36 }
 0x6b9   :  { %3022 = vtanh.f32 %v1330_v34  ;;  %1513 = vmatpush.bf16.msrb.mxu3 %v3478_v8  ;;  %v5031_v8 = vld [vmem:[#allocation9_spill] sm:$0xff] }
 0x6ba   :  { %v1314_v27 = vpop.f32.mrf.mxu3 }
 0x6bb   :  { %v1356_v1 = vpop.f32.mrf.mxu2  ;;  %v5039_v27 = vld [vmem:[#allocation18_spill] sm:$0xff] }
 0x6bd   :  { %1514 = vmatpush.bf16.msrb.mxu3 %v3484_v14  ;;  %v5032_v14 = vld [vmem:[#allocation10_spill] sm:$0xff] }
 0x6bf   :  { %v3023_v42 = vpop.eup %3022 }
 0x6c0   :  { %v1382_v35 = vpack.c.bf16 %v3023_v42, %v3023_v42 }
 0x6c1   :  { %1515 = vmatpush.bf16.msrb.mxu3 %v3512_v39  ;;  %v5033_v39 = vld [vmem:[#allocation11_spill] sm:$0xff] }
 0x6c2   :  { %1391 = vmatmul.bf16.vlgmr.msrb.gmra.mxu0 %v1382_v35  ;;  %1404 = vmatmul.bf16.vlgmr.msra.gmra.mxu1 %v1382_v35 }
 0x6c3   :  { %1417 = vmatmul.bf16.vlgmr.msra.gmra.mxu2 %v1382_v35  ;;  %1537 = vmatpush.bf16.msrb.mxu0 %v3495_v24 }
 0x6c4   :  { %1550 = vmatpush.bf16.msra.mxu1 %v3500_v25  ;;  %1563 = vmatpush.bf16.msra.mxu2 %v3592_v50 }
 0x6c5   :  { %1516 = vmatpush.bf16.msrb.mxu3 %v3545_v58  ;;  %v5034_v58 = vld [vmem:[#allocation12_spill] sm:$0xff] }
 0x6c7   :  { %1538 = vmatpush.bf16.msrb.mxu0 %v3515_v29 }
 0x6c8   :  { %1551 = vmatpush.bf16.msra.mxu1 %v3526_v47  ;;  %1564 = vmatpush.bf16.msra.mxu2 %v3602_v54 }
 0x6c9   :  { %1517 = vmatpush.bf16.msrb.mxu3 %v3559_v9  ;;  %v5035_v9 = vld [vmem:[#allocation13_spill] sm:$0xff] }
 0x6cb   :  { %1539 = vmatpush.bf16.msrb.mxu0 %v3548_v59 }
 0x6cc   :  { %1552 = vmatpush.bf16.msra.mxu1 %v3551_v63  ;;  %1565 = vmatpush.bf16.msra.mxu2 %v3611_v62 }
 0x6cd   :  { %1518 = vmatpush.bf16.msrb.mxu3 %v3570_v17  ;;  %v5036_v17 = vld [vmem:[#allocation14_spill] sm:$0xff] }
 0x6cf   :  { %1540 = vmatpush.bf16.msrb.mxu0 %v3623_v7 }
 0x6d0   :  { %1553 = vmatpush.bf16.msra.mxu1 %v3634_v15  ;;  %1566 = vmatpush.bf16.msra.mxu2 %v3636_v18 }
 0x6d1   :  { %1519 = vmatpush.bf16.msrb.mxu3 %v3576_v33  ;;  %v5037_v33 = vld [vmem:[#allocation15_spill] sm:$0xff] }
 0x6d3   :  { %1541 = vmatpush.bf16.msrb.mxu0 %v3648_v23 }
 0x6d4   :  { %1554 = vmatpush.bf16.msra.mxu1 %v3662_v52  ;;  %1567 = vmatpush.bf16.msra.mxu2 %v3664_v40 }
 0x6d5   :  { %1520 = vmatpush.bf16.msrb.mxu3 %v3584_v41 }
 0x6d7   :  { %1542 = vmatpush.bf16.msrb.mxu0 %v3685_v53 }
 0x6d8   :  { %1555 = vmatpush.bf16.msra.mxu1 %v3690_v60  ;;  %1568 = vmatpush.bf16.msra.mxu2 %v5031_v8 }
 0x6db   :  { %1543 = vmatpush.bf16.msrb.mxu0 %v5032_v14 }
 0x6dc   :  { %1556 = vmatpush.bf16.msra.mxu1 %v5033_v39  ;;  %1569 = vmatpush.bf16.msra.mxu2 %v5034_v58 }
 0x6df   :  { %1544 = vmatpush.bf16.msrb.mxu0 %v5035_v9 }
 0x6e0   :  { %1557 = vmatpush.bf16.msra.mxu1 %v5036_v17  ;;  %1570 = vmatpush.bf16.msra.mxu2 %v5037_v33 }
 0x73b   :  { %v1368_v6 = vpop.f32.mrf.mxu3 }
 0x73c   :  { %v1369_v41 = vadd.f32 %v4003_v32, %v1368_v6 }
 0x73e   :  { %v1372_v22 = vmul.f32 %v1369_v41, %v1369_v41 }
 0x73f   :  { %v1392_v35 = vpop.f32.mrf.mxu0  ;;  %v1405_v49 = vpop.f32.mrf.mxu1 }
 0x740   :  { %v1373_v21 = vmul.f32 %v1372_v22, %v1369_v41  ;;  %v1422_v1 = vadd.f32 %v1392_v35, %v5038_v16  ;;  %v1423_v36 = vadd.f32 %v1405_v49, %v5039_v27 }
 0x742   :  { %v1374_v28 = vmul.f32 0.044715, %v1373_v21  ;;  %v1424_v10 = vmax.f32 %v1422_v1, %v1423_v36 }
 0x743   :  { %v1370_v5 = vpop.f32.mrf.mxu3 }
 0x744   :  { %v1375_v42 = vadd.f32 %v1374_v28, %v1369_v41  ;;  %1425 = vmax.xlane.f32.xlu0 %v1424_v10 }
 0x746   :  { %v1376_v0 = vmul.f32 0.7978846, %v1375_v42  ;;  %v4176_v11 = vpop.f32.mrf.mxu2 }
 0x747   :  { %v1394_v34 = vpop.f32.mrf.mxu0  ;;  %v1407_v33 = vpop.f32.mrf.mxu1 }
 0x748   :  { %3024 = vtanh.f32 %v1376_v0 }
 0x74e   :  { %v3025_v6 = vpop.eup %3024  ;;  %v1420_v32 = vpop.f32.mrf.mxu2 }
 0x74f   :  { %v1378_v17 = vadd.f32 1.0, %v3025_v6  ;;  %v5041_v6 = vld [vmem:[#allocation24_spill] sm:$0xff] }
 0x751   :  { %v1379_v9 = vmul.f32 0.5, %v1378_v17 }
 0x753   :  { %v1380_v22 = vmul.f32 %v1379_v9, %v1369_v41 }
 0x755   :  { %v4179_v35 = vadd.f32 %v1380_v22, %v4012_v26  ;;  %v5042_v22 = vld [vmem:[#allocation16_spill] sm:$0xff] }
 0x7b7   :  { %v1426_v49 = vpop.xlane.xlu0 %1425 }
 0x7b8   :  { %vm1427_vm14 = vcmp.eq.f32.partialorder %v1422_v1, %v1426_v49  ;;  %vm1428_vm15 = vcmp.eq.f32.partialorder %v1423_v36, %v1426_v49  ;;  %v5043_v49 = vld [vmem:[#allocation19_spill] sm:$0xff] }
 0x7b9   :  { %v1429_v21 = vsel %vm1427_vm14, %v3427_v51, 256  ;;  %v1430_v28 = vsel %vm1428_vm15, %v3787_v38, 256 }
 0x7ba   :  { %vm1431_vm0 = vcmp.lt.s32.totalorder %v1429_v21, %v1430_v28 }
 0x7bb   :  { %v1432_v10 = vsel %vm1431_vm0, %v1429_v21, %v1430_v28  ;;  %v5044_v21 = vld [vmem:[#allocation25_spill] sm:$0xff]  ;;  %v5045_v28 = vld [vmem:[#allocation26_spill] sm:$0xff] }
 0x7bc   :  { %v1434_v5 = vshra.s32 %v1432_v10, 16  ;;  %v1433_v42 = vand.u32 65535, %v1432_v10  ;;  %v5046_v10 = vld [vmem:[#allocation20_spill] sm:$0xff] }
 0x7be   :  { %v1436_v33 = vcvt.s32.f32 %v1434_v5  ;;  %v1435_v0 = vcvt.s32.f32 %v1433_v42  ;;  %v5047_v5 = vld [vmem:[#allocation21_spill] sm:$0xff]  ;;  %v5049_v42 = vld [vmem:[#allocation28_spill] sm:$0xff] }
 0x7c0   :  { %1437 = vmin.xlane.f32.xlu1 %v1436_v33 }
 0x833   :  { %v1438_v32 = vpop.xlane.xlu1 %1437 }
 0x834   :  { %vm1439_vm1 = vcmp.eq.f32.partialorder %v1436_v33, %v1438_v32  ;;  %v1444_v26 = vcvt.f32.s32 %v1438_v32  ;;  %v5048_v33 = vld [vmem:[#allocation27_spill] sm:$0xff]  ;;  %v5050_v32 = vld [vmem:[#allocation22_spill] sm:$0xff] }
 0x835   :  { %v1440_v9 = vsel %vm1439_vm1, %v1435_v0, inf  ;;  %v5051_v0 = vld [vmem:[#allocation32_spill] sm:$0xff] }
 0x836   :  { %1441 = vmin.xlane.f32.xlu2 %v1440_v9  ;;  %v1445_v41 = vshll.u32 %v1444_v26, 16  ;;  %v5052_v9 = vld [vmem:[#allocation29_spill] sm:$0xff]  ;;  %v5053_v26 = vld [vmem:[#allocation30_spill] sm:$0xff] }
 0x8a9   :  { %v1442_v17 = vpop.xlane.xlu2 %1441 }
 0x8aa   :  { %v1443_v1 = vcvt.f32.s32 %v1442_v17  ;;  %v5054_v17 = vld [vmem:[#allocation33_spill] sm:$0xff] }
 0x8ac   :  { %v1446_v36 = vadd.s32 %v1445_v41, %v1443_v1  ;;  %v5055_v41 = vld [vmem:[#allocation34_spill] sm:$0xff] }
 0x8ae   :  { %v4185_v34 = vsel %vm1447_vm2, %v1446_v36, %v4019_v45  ;;  %vm1449_vm3 = vcmp.eq.s32.totalorder %v3427_v51, %v1446_v36  ;;  %vm1450_vm4 = vcmp.eq.s32.totalorder %v3787_v38, %v1446_v36  ;;  %v5040_v45 = vld [vmem:[#allocation23_spill] sm:$0xff] }
 0x8af   :  { %vm2765_vm6 = vmpackc.low %vm1449_vm3, %vm1449_vm3 }
 0x8b0   :  { %2766 = vmatmul.msk.bf16.vlgmr.msra.gmra.mxu3 %vm2765_vm6, %v5006_v37  ;;  %vm2767_vm7 = vmpackc.low %vm1450_vm4, %vm1450_vm4  ;;  %2770 = vmatmul.msk.bf16.vlgmr.msrb.gmra.mxu1 %vm2765_vm6, %v5006_v37  ;;  %vm1755_vm6 = vcmp.eq.s32.totalorder %v3427_v51, 4 }
 0x8b1   :  { %2768 = vmatmul.msk.bf16.vlgmr.msra.gmra.mxu0 %vm2767_vm7, %v5006_v37  ;;  %2772 = vmatmul.msk.bf16.vlgmr.msrb.gmra.mxu2 %vm2767_vm7, %v5006_v37 }
 0x8b2   :  { %1611 = vmatpush.bf16.msra.mxu3 %v3794_v57  ;;  %1624 = vmatpush.bf16.msra.mxu0 %v5016_v46 }
 0x8b3   :  { %1640 = vmatpush.bf16.msrb.mxu1 %v4032_v48  ;;  %1653 = vmatpush.bf16.msrb.mxu2 %v4038_v12 }
 0x8b6   :  { %1612 = vmatpush.bf16.msra.mxu3 %v3805_v4  ;;  %1625 = vmatpush.bf16.msra.mxu0 %v5017_v30 }
 0x8b7   :  { %1641 = vmatpush.bf16.msrb.mxu1 %v4046_v31  ;;  %1654 = vmatpush.bf16.msrb.mxu2 %v4052_v2 }
 0x8ba   :  { %1613 = vmatpush.bf16.msra.mxu3 %v3818_v61  ;;  %1626 = vmatpush.bf16.msra.mxu0 %v5018_v44 }
 0x8bb   :  { %1642 = vmatpush.bf16.msrb.mxu1 %v4060_v19  ;;  %1655 = vmatpush.bf16.msrb.mxu2 %v4066_v13 }
 0x8be   :  { %1614 = vmatpush.bf16.msra.mxu3 %v3831_v20  ;;  %1627 = vmatpush.bf16.msra.mxu0 %v5019_v3 }
 0x8bf   :  { %1643 = vmatpush.bf16.msrb.mxu1 %v4074_v56  ;;  %1656 = vmatpush.bf16.msrb.mxu2 %v4080_v43 }
 0x8c2   :  { %1615 = vmatpush.bf16.msra.mxu3 %v5040_v45  ;;  %1628 = vmatpush.bf16.msra.mxu0 %v5041_v6 }
 0x8c3   :  { %1644 = vmatpush.bf16.msrb.mxu1 %v5042_v22  ;;  %1657 = vmatpush.bf16.msrb.mxu2 %v5043_v49 }
 0x8c6   :  { %1616 = vmatpush.bf16.msra.mxu3 %v5044_v21  ;;  %1629 = vmatpush.bf16.msra.mxu0 %v5045_v28 }
 0x8c7   :  { %1645 = vmatpush.bf16.msrb.mxu1 %v5046_v10  ;;  %1658 = vmatpush.bf16.msrb.mxu2 %v5047_v5 }
 0x8ca   :  { %1617 = vmatpush.bf16.msra.mxu3 %v5048_v33  ;;  %1630 = vmatpush.bf16.msra.mxu0 %v5049_v42 }
 0x8cb   :  { %1646 = vmatpush.bf16.msrb.mxu1 %v5050_v32  ;;  %1659 = vmatpush.bf16.msrb.mxu2 %v5051_v0 }
 0x8ce   :  { %1618 = vmatpush.bf16.msra.mxu3 %v5052_v9  ;;  %1631 = vmatpush.bf16.msra.mxu0 %v5053_v26 }
 0x8cf   :  { %1647 = vmatpush.bf16.msrb.mxu1 %v5054_v17  ;;  %1660 = vmatpush.bf16.msrb.mxu2 %v5055_v41  ;;  %v4230_v17 = vld [vmem:[%s4881_s10 + $0x38] sm:$0xff] }
 0x92d   :  { %v1495_v1 = vpop.f32.mrf.mxu1 }
 0x92e   :  { %v1479_v36 = vpop.f32.mrf.mxu0 }
 0x933   :  { %v1466_v10 = vpop.f32.mrf.mxu3 }
 0x934   :  { %v1480_v5 = vadd.f32 %v1479_v36, %v1466_v10  ;;  %v1508_v28 = vpop.f32.mrf.mxu2  ;;  %v5060_v36 = vld [vmem:[#allocation15_spill] sm:$0xff] }
 0x935   :  { %v1509_v33 = vadd.f32 %v1508_v28, %v1495_v1  ;;  %v1497_v21 = vpop.f32.mrf.mxu1  ;;  %v5059_v1 = vld [vmem:[#allocation14_spill] sm:$0xff] }
 0x936   :  { %v1483_v42 = vadd.f32 %v1480_v5, %v4176_v11  ;;  %v1481_v32 = vpop.f32.mrf.mxu0  ;;  %v4236_v21 = vld [vmem:[%s4881_s10 + $0x30] sm:$0xff]  ;;  %v4251_v5 = vld [vmem:[%s4881_s10 + $0x20] sm:$0xff] }
 0x937   :  { %v1512_v49 = vpack.c.bf16 %v1509_v33, %v1509_v33  ;;  %v4260_v33 = vld [vmem:[%s4881_s10 + $0x18] sm:$0xff]  ;;  %v4278_v32 = vld [vmem:[%s4881_s10 + $0x8] sm:$0xff] }
 0x938   :  { %v1484_v0 = vadd.f32 %v3964_v55, %v1483_v42  ;;  %v4269_v42 = vld [vmem:[%s4881_s10 + $0x10] sm:$0xff]  ;;  %5056 = vst [vmem:[#allocation17_spill] sm:$0xff] %v4278_v32 }
 0x939   :  { %1521 = vmatmul.bf16.vlgmr.msrb.gmra.mxu3 %v1512_v49  ;;  %v4242_v49 = vld [vmem:[%s4881_s10 + $0x28] sm:$0xff] }
 0x93a   :  { %3026 = vtanh.f32 %v1484_v0  ;;  %1667 = vmatpush.bf16.msrb.mxu3 %v4230_v17  ;;  %v4287_v0 = vld [vmem:[%s4881_s10] sm:$0xff] }
 0x93b   :  { %v1468_v41 = vpop.f32.mrf.mxu3  ;;  %5057 = vst [vmem:[#allocation18_spill] sm:$0xff] %v4287_v0 }
 0x93c   :  { %v1510_v10 = vpop.f32.mrf.mxu2  ;;  %v5058_v41 = vld [vmem:[#allocation13_spill] sm:$0xff] }
 0x93e   :  { %1668 = vmatpush.bf16.msrb.mxu3 %v4236_v21 }
 0x940   :  { %v3027_v11 = vpop.eup %3026 }
 0x941   :  { %v1536_v28 = vpack.c.bf16 %v3027_v11, %v3027_v11  ;;  %v5061_v11 = vld [vmem:[#allocation31_spill] sm:$0xff] }
 0x942   :  { %1669 = vmatpush.bf16.msrb.mxu3 %v4242_v49 }
 0x943   :  { %1545 = vmatmul.bf16.vlgmr.msrb.gmra.mxu0 %v1536_v28  ;;  %1558 = vmatmul.bf16.vlgmr.msra.gmra.mxu1 %v1536_v28 }
 0x944   :  { %1571 = vmatmul.bf16.vlgmr.msra.gmra.mxu2 %v1536_v28  ;;  %1691 = vmatpush.bf16.msrb.mxu0 %v3495_v24 }
 0x945   :  { %1704 = vmatpush.bf16.msra.mxu1 %v3500_v25  ;;  %1717 = vmatpush.bf16.msra.mxu2 %v3592_v50 }
 0x946   :  { %1670 = vmatpush.bf16.msrb.mxu3 %v4251_v5 }
 0x948   :  { %1692 = vmatpush.bf16.msrb.mxu0 %v3515_v29 }
 0x949   :  { %1705 = vmatpush.bf16.msra.mxu1 %v3526_v47  ;;  %1718 = vmatpush.bf16.msra.mxu2 %v3602_v54 }
 0x94a   :  { %1671 = vmatpush.bf16.msrb.mxu3 %v4260_v33 }
 0x94c   :  { %1693 = vmatpush.bf16.msrb.mxu0 %v3548_v59 }
 0x94d   :  { %1706 = vmatpush.bf16.msra.mxu1 %v3551_v63  ;;  %1719 = vmatpush.bf16.msra.mxu2 %v3611_v62 }
 0x94e   :  { %1672 = vmatpush.bf16.msrb.mxu3 %v4269_v42 }
 0x950   :  { %1694 = vmatpush.bf16.msrb.mxu0 %v3623_v7 }
 0x951   :  { %1707 = vmatpush.bf16.msra.mxu1 %v3634_v15  ;;  %1720 = vmatpush.bf16.msra.mxu2 %v3636_v18 }
 0x952   :  { %1673 = vmatpush.bf16.msrb.mxu3 %v4278_v32 }
 0x954   :  { %1695 = vmatpush.bf16.msrb.mxu0 %v3648_v23 }
 0x955   :  { %1708 = vmatpush.bf16.msra.mxu1 %v3662_v52  ;;  %1721 = vmatpush.bf16.msra.mxu2 %v3664_v40 }
 0x956   :  { %1674 = vmatpush.bf16.msrb.mxu3 %v4287_v0 }
 0x958   :  { %1696 = vmatpush.bf16.msrb.mxu0 %v3685_v53 }
 0x959   :  { %1709 = vmatpush.bf16.msra.mxu1 %v3690_v60  ;;  %1722 = vmatpush.bf16.msra.mxu2 %v5031_v8 }
 0x95c   :  { %1697 = vmatpush.bf16.msrb.mxu0 %v5032_v14 }
 0x95d   :  { %1710 = vmatpush.bf16.msra.mxu1 %v5033_v39  ;;  %1723 = vmatpush.bf16.msra.mxu2 %v5034_v58 }
 0x960   :  { %1698 = vmatpush.bf16.msrb.mxu0 %v5058_v41 }
 0x961   :  { %1711 = vmatpush.bf16.msra.mxu1 %v5059_v1  ;;  %1724 = vmatpush.bf16.msra.mxu2 %v5060_v36 }
 0x9bc   :  { %v1522_v10 = vpop.f32.mrf.mxu3 }
 0x9bd   :  { %v1523_v28 = vadd.f32 %v5061_v11, %v1522_v10 }
 0x9bf   :  { %v1526_v53 = vmul.f32 %v1523_v28, %v1523_v28 }
 0x9c0   :  { %v1546_v0 = vpop.f32.mrf.mxu0  ;;  %v1559_v60 = vpop.f32.mrf.mxu1 }
 0x9c1   :  { %v1527_v40 = vmul.f32 %v1526_v53, %v1523_v28  ;;  %v1576_v8 = vadd.f32 %v1546_v0, %v5038_v16  ;;  %v1577_v14 = vadd.f32 %v1559_v60, %v5039_v27 }
 0x9c3   :  { %v1528_v39 = vmul.f32 0.044715, %v1527_v40  ;;  %v1578_v52 = vmax.f32 %v1576_v8, %v1577_v14 }
 0x9c4   :  { %v1524_v58 = vpop.f32.mrf.mxu3 }
 0x9c5   :  { %v1529_v23 = vadd.f32 %v1528_v39, %v1523_v28  ;;  %1579 = vmax.xlane.f32.xlu0 %v1578_v52 }
 0x9c7   :  { %v1530_v41 = vmul.f32 0.7978846, %v1529_v23  ;;  %v4302_v1 = vpop.f32.mrf.mxu2 }
 0x9c8   :  { %v1548_v36 = vpop.f32.mrf.mxu0  ;;  %v1561_v32 = vpop.f32.mrf.mxu1 }
 0x9c9   :  { %3028 = vtanh.f32 %v1530_v41 }
 0x9cf   :  { %v3029_v10 = vpop.eup %3028  ;;  %v1574_v11 = vpop.f32.mrf.mxu2 }
 0x9d0   :  { %v1532_v18 = vadd.f32 1.0, %v3029_v10 }
 0x9d2   :  { %v1533_v15 = vmul.f32 0.5, %v1532_v18 }
 0x9d4   :  { %v1534_v53 = vmul.f32 %v1533_v15, %v1523_v28 }
 0x9d6   :  { %v4305_v0 = vadd.f32 %v1534_v53, %v4179_v35 }
 0xa38   :  { %v1580_v60 = vpop.xlane.xlu0 %1579 }
 0xa39   :  { %vm1581_vm8 = vcmp.eq.f32.partialorder %v1576_v8, %v1580_v60  ;;  %vm1582_vm9 = vcmp.eq.f32.partialorder %v1577_v14, %v1580_v60 }
 0xa3a   :  { %v1583_v40 = vsel %vm1581_vm8, %v3427_v51, 256  ;;  %v1584_v23 = vsel %vm1582_vm9, %v3787_v38, 256 }
 0xa3b   :  { %vm1585_vm10 = vcmp.lt.s32.totalorder %v1583_v40, %v1584_v23 }
 0xa3c   :  { %v1586_v52 = vsel %vm1585_vm10, %v1583_v40, %v1584_v23 }
 0xa3d   :  { %v1588_v39 = vshra.s32 %v1586_v52, 16  ;;  %v1587_v32 = vand.u32 65535, %v1586_v52 }
 0xa3f   :  { %v1590_v58 = vcvt.s32.f32 %v1588_v39  ;;  %v1589_v36 = vcvt.s32.f32 %v1587_v32 }
 0xa41   :  { %1591 = vmin.xlane.f32.xlu1 %v1590_v58 }
 0xab4   :  { %v1592_v41 = vpop.xlane.xlu1 %1591 }
 0xab5   :  { %vm1593_vm11 = vcmp.eq.f32.partialorder %v1590_v58, %v1592_v41  ;;  %v1598_v18 = vcvt.f32.s32 %v1592_v41 }
 0xab6   :  { %v1594_v15 = vsel %vm1593_vm11, %v1589_v36, inf }
 0xab7   :  { %1595 = vmin.xlane.f32.xlu2 %v1594_v15  ;;  %v1599_v11 = vshll.u32 %v1598_v18, 16 }
 0xb2a   :  { %v1596_v35 = vpop.xlane.xlu2 %1595 }
 0xb2b   :  { %v1597_v8 = vcvt.f32.s32 %v1596_v35  ;;  %v5075_v35 = vld [vmem:[#allocation17_spill] sm:$0xff] }
 0xb2d   :  { %v1600_v14 = vadd.s32 %v1599_v11, %v1597_v8  ;;  %v5076_v11 = vld [vmem:[#allocation4_spill] sm:$0xff]  ;;  %v5077_v8 = vld [vmem:[#allocation5_spill] sm:$0xff] }
 0xb2f   :  { %v4311_v28 = vsel %vm1601_vm12, %v1600_v14, %v4185_v34  ;;  %vm1604_vm13 = vcmp.eq.s32.totalorder %v3787_v38, %v1600_v14  ;;  %vm1603_vm14 = vcmp.eq.s32.totalorder %v3427_v51, %v1600_v14  ;;  %v5070_v34 = vld [vmem:[#allocation32_spill] sm:$0xff]  ;;  %v5078_v14 = vld [vmem:[#allocation6_spill] sm:$0xff] }
 0xb30   :  { %vm2777_vm15 = vmpackc.low %vm1604_vm13, %vm1604_vm13 }
 0xb31   :  { %vm2775_vm0 = vmpackc.low %vm1603_vm14, %vm1603_vm14  ;;  %2778 = vmatmul.msk.bf16.vlgmr.msra.gmra.mxu0 %vm2777_vm15, %v5006_v37  ;;  %2782 = vmatmul.msk.bf16.vlgmr.msrb.gmra.mxu2 %vm2777_vm15, %v5006_v37  ;;  %vm1909_vm15 = vcmp.eq.s32.totalorder %v3427_v51, 5 }
 0xb32   :  { %2776 = vmatmul.msk.bf16.vlgmr.msra.gmra.mxu3 %vm2775_vm0, %v5006_v37  ;;  %2780 = vmatmul.msk.bf16.vlgmr.msrb.gmra.mxu1 %vm2775_vm0, %v5006_v37 }
 0xb33   :  { %1765 = vmatpush.bf16.msra.mxu3 %v3794_v57  ;;  %1778 = vmatpush.bf16.msra.mxu0 %v5016_v46  ;;  %v5062_v57 = vld [vmem:[#allocation19_spill] sm:$0xff]  ;;  %v5065_v46 = vld [vmem:[#allocation20_spill] sm:$0xff] }
 0xb34   :  { %1794 = vmatpush.bf16.msrb.mxu1 %v4032_v48  ;;  %1807 = vmatpush.bf16.msrb.mxu2 %v4038_v12 }
 0xb37   :  { %1766 = vmatpush.bf16.msra.mxu3 %v3805_v4  ;;  %1779 = vmatpush.bf16.msra.mxu0 %v5017_v30  ;;  %v5063_v4 = vld [vmem:[#allocation25_spill] sm:$0xff]  ;;  %v5067_v30 = vld [vmem:[#allocation27_spill] sm:$0xff] }
 0xb38   :  { %1795 = vmatpush.bf16.msrb.mxu1 %v4046_v31  ;;  %1808 = vmatpush.bf16.msrb.mxu2 %v4052_v2 }
 0xb3b   :  { %1767 = vmatpush.bf16.msra.mxu3 %v3818_v61  ;;  %1780 = vmatpush.bf16.msra.mxu0 %v5018_v44  ;;  %v5064_v61 = vld [vmem:[#allocation26_spill] sm:$0xff]  ;;  %v5068_v44 = vld [vmem:[#allocation28_spill] sm:$0xff] }
 0xb3c   :  { %1796 = vmatpush.bf16.msrb.mxu1 %v4060_v19  ;;  %1809 = vmatpush.bf16.msrb.mxu2 %v4066_v13 }
 0xb3f   :  { %1768 = vmatpush.bf16.msra.mxu3 %v3831_v20  ;;  %1781 = vmatpush.bf16.msra.mxu0 %v5019_v3  ;;  %v5066_v20 = vld [vmem:[#allocation21_spill] sm:$0xff]  ;;  %v5069_v3 = vld [vmem:[#allocation22_spill] sm:$0xff] }
 0xb40   :  { %1797 = vmatpush.bf16.msrb.mxu1 %v4074_v56  ;;  %1810 = vmatpush.bf16.msrb.mxu2 %v4080_v43 }
 0xb43   :  { %1769 = vmatpush.bf16.msra.mxu3 %v5040_v45  ;;  %1782 = vmatpush.bf16.msra.mxu0 %v5041_v6  ;;  %v5071_v45 = vld [vmem:[#allocation33_spill] sm:$0xff]  ;;  %v5072_v6 = vld [vmem:[#allocation34_spill] sm:$0xff] }
 0xb44   :  { %1798 = vmatpush.bf16.msrb.mxu1 %v5042_v22  ;;  %1811 = vmatpush.bf16.msrb.mxu2 %v5062_v57 }
 0xb47   :  { %1770 = vmatpush.bf16.msra.mxu3 %v5063_v4  ;;  %1783 = vmatpush.bf16.msra.mxu0 %v5064_v61  ;;  %v5079_v4 = vld [vmem:[#allocation18_spill] sm:$0xff]  ;;  %v5080_v61 = vld [vmem:[#allocation7_spill] sm:$0xff] }
 0xb48   :  { %1799 = vmatpush.bf16.msrb.mxu1 %v5065_v46  ;;  %1812 = vmatpush.bf16.msrb.mxu2 %v5066_v20 }
 0xb4b   :  { %1771 = vmatpush.bf16.msra.mxu3 %v5067_v30  ;;  %1784 = vmatpush.bf16.msra.mxu0 %v5068_v44  ;;  %v5081_v30 = vld [vmem:[#allocation8_spill] sm:$0xff]  ;;  %v5082_v44 = vld [vmem:[#allocation9_spill] sm:$0xff] }
 0xb4c   :  { %1800 = vmatpush.bf16.msrb.mxu1 %v5069_v3  ;;  %1813 = vmatpush.bf16.msrb.mxu2 %v5070_v34 }
 0xb4f   :  { %1772 = vmatpush.bf16.msra.mxu3 %v5052_v9  ;;  %1785 = vmatpush.bf16.msra.mxu0 %v5053_v26 }
 0xb50   :  { %1801 = vmatpush.bf16.msrb.mxu1 %v5071_v45  ;;  %1814 = vmatpush.bf16.msrb.mxu2 %v5072_v6 }
 0xbae   :  { %v1633_v10 = vpop.f32.mrf.mxu0 }
 0xbaf   :  { %v1649_v53 = vpop.f32.mrf.mxu1 }
 0xbb4   :  { %v1662_v60 = vpop.f32.mrf.mxu2 }
 0xbb5   :  { %v1620_v40 = vpop.f32.mrf.mxu3  ;;  %v1663_v23 = vadd.f32 %v1662_v60, %v1649_v53  ;;  %v5084_v53 = vld [vmem:[#allocation11_spill] sm:$0xff]  ;;  %v5085_v60 = vld [vmem:[#allocation12_spill] sm:$0xff] }
 0xbb6   :  { %v1634_v52 = vadd.f32 %v1633_v10, %v1620_v40  ;;  %v1635_v39 = vpop.f32.mrf.mxu0  ;;  %v5083_v10 = vld [vmem:[#allocation10_spill] sm:$0xff]  ;;  %v5086_v40 = vld [vmem:[#allocation13_spill] sm:$0xff] }
 0xbb7   :  { %v1666_v58 = vpack.c.bf16 %v1663_v23, %v1663_v23  ;;  %v1651_v32 = vpop.f32.mrf.mxu1  ;;  %v5087_v23 = vld [vmem:[#allocation14_spill] sm:$0xff] }
 0xbb8   :  { %v1637_v41 = vadd.f32 %v1634_v52, %v4302_v1  ;;  %v5074_v1 = vld [vmem:[#allocation3_spill] sm:$0xff] }
 0xbb9   :  { %1675 = vmatmul.bf16.vlgmr.msrb.gmra.mxu3 %v1666_v58  ;;  %v5088_v52 = vld [vmem:[#allocation15_spill] sm:$0xff] }
 0xbba   :  { %v1638_v9 = vadd.f32 %v3964_v55, %v1637_v41  ;;  %1821 = vmatpush.bf16.msrb.mxu3 %v4230_v17  ;;  %v5073_v55 = vld [vmem:[#allocation2_spill] sm:$0xff]  ;;  %v5089_v58 = vld [vmem:[#allocation31_spill] sm:$0xff] }
 0xbbc   :  { %3030 = vtanh.f32 %v1638_v9  ;;  %v1664_v26 = vpop.f32.mrf.mxu2 }
 0xbbd   :  { %v1622_v36 = vpop.f32.mrf.mxu3 }
 0xbbe   :  { %1822 = vmatpush.bf16.msrb.mxu3 %v4236_v21 }
 0xbc2   :  { %v3031_v15 = vpop.eup %3030  ;;  %1823 = vmatpush.bf16.msrb.mxu3 %v4242_v49 }
 0xbc3   :  { %v1690_v18 = vpack.c.bf16 %v3031_v15, %v3031_v15 }
 0xbc5   :  { %1699 = vmatmul.bf16.vlgmr.msrb.gmra.mxu0 %v1690_v18  ;;  %1712 = vmatmul.bf16.vlgmr.msra.gmra.mxu1 %v1690_v18 }
 0xbc6   :  { %1725 = vmatmul.bf16.vlgmr.msra.gmra.mxu2 %v1690_v18  ;;  %1845 = vmatpush.bf16.msrb.mxu0 %v3495_v24 }
 0xbc7   :  { %1858 = vmatpush.bf16.msra.mxu1 %v3500_v25  ;;  %1871 = vmatpush.bf16.msra.mxu2 %v3592_v50 }
 0xbc8   :  { %1824 = vmatpush.bf16.msrb.mxu3 %v4251_v5 }
 0xbca   :  { %1846 = vmatpush.bf16.msrb.mxu0 %v3515_v29 }
 0xbcb   :  { %1859 = vmatpush.bf16.msra.mxu1 %v3526_v47  ;;  %1872 = vmatpush.bf16.msra.mxu2 %v3602_v54 }
 0xbcc   :  { %1825 = vmatpush.bf16.msrb.mxu3 %v4260_v33 }
 0xbce   :  { %1847 = vmatpush.bf16.msrb.mxu0 %v3548_v59 }
 0xbcf   :  { %1860 = vmatpush.bf16.msra.mxu1 %v3551_v63  ;;  %1873 = vmatpush.bf16.msra.mxu2 %v3611_v62 }
 0xbd0   :  { %1826 = vmatpush.bf16.msrb.mxu3 %v4269_v42 }
 0xbd2   :  { %1848 = vmatpush.bf16.msrb.mxu0 %v3623_v7 }
 0xbd3   :  { %1861 = vmatpush.bf16.msra.mxu1 %v5073_v55  ;;  %1874 = vmatpush.bf16.msra.mxu2 %v5074_v1 }
 0xbd4   :  { %1827 = vmatpush.bf16.msrb.mxu3 %v5075_v35 }
 0xbd6   :  { %1849 = vmatpush.bf16.msrb.mxu0 %v5076_v11 }
 0xbd7   :  { %1862 = vmatpush.bf16.msra.mxu1 %v5077_v8  ;;  %1875 = vmatpush.bf16.msra.mxu2 %v5078_v14 }
 0xbd8   :  { %1828 = vmatpush.bf16.msrb.mxu3 %v5079_v4 }
 0xbda   :  { %1850 = vmatpush.bf16.msrb.mxu0 %v5080_v61 }
 0xbdb   :  { %1863 = vmatpush.bf16.msra.mxu1 %v5081_v30  ;;  %1876 = vmatpush.bf16.msra.mxu2 %v5082_v44 }
 0xbde   :  { %1851 = vmatpush.bf16.msrb.mxu0 %v5083_v10 }
 0xbdf   :  { %1864 = vmatpush.bf16.msra.mxu1 %v5084_v53  ;;  %1877 = vmatpush.bf16.msra.mxu2 %v5085_v60 }
 0xbe2   :  { %1852 = vmatpush.bf16.msrb.mxu0 %v5086_v40 }
 0xbe3   :  { %1865 = vmatpush.bf16.msra.mxu1 %v5087_v23  ;;  %1878 = vmatpush.bf16.msra.mxu2 %v5088_v52 }
 0xc3c   :  { %v1676_v39 = vpop.f32.mrf.mxu3 }
 0xc3d   :  { %v1677_v32 = vadd.f32 %v5089_v58, %v1676_v39 }
 0xc3f   :  { %v1680_v41 = vmul.f32 %v1677_v32, %v1677_v32 }
 0xc41   :  { %v1681_v9 = vmul.f32 %v1680_v41, %v1677_v32 }
 0xc42   :  { %v1700_v26 = vpop.f32.mrf.mxu0  ;;  %v1713_v36 = vpop.f32.mrf.mxu1 }
 0xc43   :  { %v1682_v15 = vmul.f32 0.044715, %v1681_v9  ;;  %v1730_v18 = vadd.f32 %v1700_v26, %v5038_v16  ;;  %v1731_v53 = vadd.f32 %v1713_v36, %v5039_v27 }
 0xc44   :  { %v1678_v10 = vpop.f32.mrf.mxu3 }
 0xc45   :  { %v1683_v60 = vadd.f32 %v1682_v15, %v1677_v32  ;;  %v1732_v44 = vmax.f32 %v1730_v18, %v1731_v53 }
 0xc47   :  { %v1684_v40 = vmul.f32 0.7978846, %v1683_v60  ;;  %1733 = vmax.xlane.f32.xlu0 %v1732_v44 }
 0xc49   :  { %3032 = vtanh.f32 %v1684_v40  ;;  %v4388_v23 = vpop.f32.mrf.mxu2 }
 0xc4a   :  { %v1702_v52 = vpop.f32.mrf.mxu0  ;;  %v1715_v30 = vpop.f32.mrf.mxu1 }
 0xc4f   :  { %v3033_v39 = vpop.eup %3032 }
 0xc50   :  { %v1686_v58 = vadd.f32 1.0, %v3033_v39 }
 0xc51   :  { %v1728_v41 = vpop.f32.mrf.mxu2 }
 0xc52   :  { %v1687_v61 = vmul.f32 0.5, %v1686_v58  ;;  %v4408_v58 = vld [vmem:[%s4885_s8 + $0x38] sm:$0xff]  ;;  %v4422_v41 = vld [vmem:[%s4885_s8 + $0x30] sm:$0xff] }
 0xc54   :  { %v1688_v4 = vmul.f32 %v1687_v61, %v1677_v32 }
 0xc56   :  { %v4391_v9 = vadd.f32 %v1688_v4, %v4305_v0 }
 0xcba   :  { %v1734_v26 = vpop.xlane.xlu0 %1733 }
 0xcbb   :  { %vm1735_vm1 = vcmp.eq.f32.partialorder %v1730_v18, %v1734_v26  ;;  %vm1736_vm2 = vcmp.eq.f32.partialorder %v1731_v53, %v1734_v26  ;;  %v4428_v26 = vld [vmem:[%s4885_s8 + $0x70] sm:$0xff] }
 0xcbc   :  { %v1737_v10 = vsel %vm1735_vm1, %v3427_v51, 256  ;;  %v1738_v44 = vsel %vm1736_vm2, %v3787_v38, 256 }
 0xcbd   :  { %vm1739_vm3 = vcmp.lt.s32.totalorder %v1737_v10, %v1738_v44 }
 0xcbe   :  { %v1740_v60 = vsel %vm1739_vm3, %v1737_v10, %v1738_v44 }
 0xcbf   :  { %v1742_v40 = vshra.s32 %v1740_v60, 16  ;;  %v1741_v30 = vand.u32 65535, %v1740_v60 }
 0xcc1   :  { %v1744_v52 = vcvt.s32.f32 %v1742_v40  ;;  %v1743_v15 = vcvt.s32.f32 %v1741_v30 }
 0xcc3   :  { %1745 = vmin.xlane.f32.xlu1 %v1744_v52 }
 0xd36   :  { %v1746_v36 = vpop.xlane.xlu1 %1745 }
 0xd37   :  { %vm1747_vm4 = vcmp.eq.f32.partialorder %v1744_v52, %v1746_v36  ;;  %v1752_v0 = vcvt.f32.s32 %v1746_v36 }
 0xd38   :  { %v1748_v61 = vsel %vm1747_vm4, %v1743_v15, inf }
 0xd39   :  { %1749 = vmin.xlane.f32.xlu2 %v1748_v61  ;;  %v1753_v32 = vshll.u32 %v1752_v0, 16  ;;  %v4521_v61 = vld [vmem:[%s4886_s7] ss:$0 sm:$0xff] }
 0xdac   :  { %v1750_v4 = vpop.xlane.xlu2 %1749 }
 0xdad   :  { %v1751_v18 = vcvt.f32.s32 %v1750_v4 }
 0xdaf   :  { %v1754_v53 = vadd.s32 %v1753_v32, %v1751_v18  ;;  %v5094_v18 = vld [vmem:[#allocation10_spill] sm:$0xff] }
 0xdb1   :  { %v4397_v39 = vsel %vm1755_vm6, %v1754_v53, %v4311_v28  ;;  %vm1758_vm7 = vcmp.eq.s32.totalorder %v3787_v38, %v1754_v53  ;;  %vm1757_vm8 = vcmp.eq.s32.totalorder %v3427_v51, %v1754_v53  ;;  %v4414_v28 = vld [vmem:[%s4885_s8 + $0x78] sm:$0xff]  ;;  %v5095_v53 = vld [vmem:[#allocation11_spill] sm:$0xff] }
 0xdb2   :  { %vm2787_vm9 = vmpackc.low %vm1758_vm7, %vm1758_vm7 }
 0xdb3   :  { %vm2785_vm10 = vmpackc.low %vm1757_vm8, %vm1757_vm8  ;;  %2788 = vmatmul.msk.bf16.vlgmr.msra.gmra.mxu0 %vm2787_vm9, %v5006_v37  ;;  %2792 = vmatmul.msk.bf16.vlgmr.msrb.gmra.mxu2 %vm2787_vm9, %v5006_v37  ;;  %vm2063_vm9 = vcmp.eq.s32.totalorder %v3427_v51, 6 }
 0xdb4   :  { %2786 = vmatmul.msk.bf16.vlgmr.msra.gmra.mxu3 %vm2785_vm10, %v5006_v37  ;;  %2790 = vmatmul.msk.bf16.vlgmr.msrb.gmra.mxu1 %vm2785_vm10, %v5006_v37 }
 0xdb5   :  { %1919 = vmatpush.bf16.msra.mxu3 %v4408_v58  ;;  %1932 = vmatpush.bf16.msra.mxu0 %v4414_v28 }
 0xdb6   :  { %1948 = vmatpush.bf16.msrb.mxu1 %v4032_v48  ;;  %1961 = vmatpush.bf16.msrb.mxu2 %v4038_v12  ;;  %v4436_v48 = vld [vmem:[%s4885_s8 + $0x28] sm:$0xff] }
 0xdb7   :  { %v4442_v12 = vld [vmem:[%s4885_s8 + $0x68] sm:$0xff] }
 0xdb9   :  { %1920 = vmatpush.bf16.msra.mxu3 %v4422_v41  ;;  %1933 = vmatpush.bf16.msra.mxu0 %v4428_v26 }
 0xdba   :  { %1949 = vmatpush.bf16.msrb.mxu1 %v4046_v31  ;;  %1962 = vmatpush.bf16.msrb.mxu2 %v4052_v2  ;;  %v4450_v31 = vld [vmem:[%s4885_s8 + $0x20] sm:$0xff] }
 0xdbb   :  { %v4456_v2 = vld [vmem:[%s4885_s8 + $0x60] sm:$0xff] }
 0xdbd   :  { %1921 = vmatpush.bf16.msra.mxu3 %v4436_v48  ;;  %1934 = vmatpush.bf16.msra.mxu0 %v4442_v12 }
 0xdbe   :  { %1950 = vmatpush.bf16.msrb.mxu1 %v4060_v19  ;;  %1963 = vmatpush.bf16.msrb.mxu2 %v4066_v13  ;;  %v4464_v19 = vld [vmem:[%s4885_s8 + $0x18] sm:$0xff] }
 0xdbf   :  { %v4470_v13 = vld [vmem:[%s4885_s8 + $0x58] sm:$0xff] }
 0xdc1   :  { %1922 = vmatpush.bf16.msra.mxu3 %v4450_v31  ;;  %1935 = vmatpush.bf16.msra.mxu0 %v4456_v2 }
 0xdc2   :  { %1951 = vmatpush.bf16.msrb.mxu1 %v4074_v56  ;;  %1964 = vmatpush.bf16.msrb.mxu2 %v4080_v43  ;;  %v4478_v56 = vld [vmem:[%s4885_s8 + $0x10] sm:$0xff] }
 0xdc3   :  { %v4484_v43 = vld [vmem:[%s4885_s8 + $0x50] sm:$0xff] }
 0xdc5   :  { %1923 = vmatpush.bf16.msra.mxu3 %v4464_v19  ;;  %1936 = vmatpush.bf16.msra.mxu0 %v4470_v13 }
 0xdc6   :  { %1952 = vmatpush.bf16.msrb.mxu1 %v5042_v22  ;;  %1965 = vmatpush.bf16.msrb.mxu2 %v5062_v57  ;;  %v4492_v22 = vld [vmem:[%s4885_s8 + $0x8] sm:$0xff] }
 0xdc7   :  { %v4498_v57 = vld [vmem:[%s4885_s8 + $0x48] sm:$0xff] }
 0xdc9   :  { %1924 = vmatpush.bf16.msra.mxu3 %v4478_v56  ;;  %1937 = vmatpush.bf16.msra.mxu0 %v4484_v43 }
 0xdca   :  { %1953 = vmatpush.bf16.msrb.mxu1 %v5065_v46  ;;  %1966 = vmatpush.bf16.msrb.mxu2 %v5066_v20  ;;  %v4506_v46 = vld [vmem:[%s4885_s8] sm:$0xff] }
 0xdcb   :  { %v4512_v20 = vld [vmem:[%s4885_s8 + $0x40] sm:$0xff] }
 0xdcd   :  { %1925 = vmatpush.bf16.msra.mxu3 %v4492_v22  ;;  %1938 = vmatpush.bf16.msra.mxu0 %v4498_v57 }
 0xdce   :  { %1954 = vmatpush.bf16.msrb.mxu1 %v5069_v3  ;;  %1967 = vmatpush.bf16.msrb.mxu2 %v5070_v34 }
 0xdd1   :  { %1926 = vmatpush.bf16.msra.mxu3 %v4506_v46  ;;  %1939 = vmatpush.bf16.msra.mxu0 %v4512_v20 }
 0xdd2   :  { %1955 = vmatpush.bf16.msrb.mxu1 %v5071_v45  ;;  %1968 = vmatpush.bf16.msrb.mxu2 %v5072_v6 }
 0xe30   :  { %v1787_v3 = vpop.f32.mrf.mxu0 }
 0xe31   :  { %v1803_v34 = vpop.f32.mrf.mxu1 }
 0xe36   :  { %v1816_v10 = vpop.f32.mrf.mxu2 }
 0xe37   :  { %v1774_v44 = vpop.f32.mrf.mxu3  ;;  %v1817_v60 = vadd.f32 %v1816_v10, %v1803_v34  ;;  %v5098_v34 = vld [vmem:[#allocation14_spill] sm:$0xff]  ;;  %v5099_v10 = vld [vmem:[#allocation15_spill] sm:$0xff] }
 0xe38   :  { %v1788_v40 = vadd.f32 %v1787_v3, %v1774_v44  ;;  %v1789_v52 = vpop.f32.mrf.mxu0  ;;  %v5097_v3 = vld [vmem:[#allocation13_spill] sm:$0xff]  ;;  %v4559_v44 = vld [vmem:[%s4883_s11] ss:$0 sm:$0xff] }
 0xe39   :  { %v1820_v30 = vpack.c.bf16 %v1817_v60, %v1817_v60  ;;  %v1805_v36 = vpop.f32.mrf.mxu1  ;;  %5100 = vst [vmem:[#allocation23_spill] sm:$0xff] %v4559_v44 }
 0xe3a   :  { %v1791_v15 = vadd.f32 %v1788_v40, %v4388_v23  ;;  %v5093_v23 = vld [vmem:[#allocation9_spill] sm:$0xff] }
 0xe3b   :  { %1829 = vmatmul.bf16.vlgmr.msrb.gmra.mxu3 %v1820_v30 }
 0xe3c   :  { %v1792_v45 = vadd.f32 %v4521_v61, %v1791_v15  ;;  %1975 = vmatpush.bf16.msrb.mxu3 %v4230_v17 }
 0xe3e   :  { %3034 = vtanh.f32 %v1792_v45  ;;  %v1818_v6 = vpop.f32.mrf.mxu2 }
 0xe3f   :  { %v1776_v0 = vpop.f32.mrf.mxu3 }
 0xe40   :  { %1976 = vmatpush.bf16.msrb.mxu3 %v4236_v21 }
 0xe44   :  { %v3035_v4 = vpop.eup %3034  ;;  %1977 = vmatpush.bf16.msrb.mxu3 %v4242_v49 }
 0xe45   :  { %v1844_v32 = vpack.c.bf16 %v3035_v4, %v3035_v4 }
 0xe47   :  { %1853 = vmatmul.bf16.vlgmr.msrb.gmra.mxu0 %v1844_v32  ;;  %1866 = vmatmul.bf16.vlgmr.msra.gmra.mxu1 %v1844_v32 }
 0xe48   :  { %1879 = vmatmul.bf16.vlgmr.msra.gmra.mxu2 %v1844_v32  ;;  %1999 = vmatpush.bf16.msrb.mxu0 %v3495_v24 }
 0xe49   :  { %2012 = vmatpush.bf16.msra.mxu1 %v3500_v25  ;;  %2025 = vmatpush.bf16.msra.mxu2 %v3592_v50  ;;  %v5090_v50 = vld [vmem:[#allocation18_spill] sm:$0xff] }
 0xe4a   :  { %1978 = vmatpush.bf16.msrb.mxu3 %v4251_v5 }
 0xe4c   :  { %2000 = vmatpush.bf16.msrb.mxu0 %v3515_v29 }
 0xe4d   :  { %2013 = vmatpush.bf16.msra.mxu1 %v3526_v47  ;;  %2026 = vmatpush.bf16.msra.mxu2 %v3602_v54  ;;  %v5091_v54 = vld [vmem:[#allocation7_spill] sm:$0xff] }
 0xe4e   :  { %1979 = vmatpush.bf16.msrb.mxu3 %v4260_v33 }
 0xe50   :  { %2001 = vmatpush.bf16.msrb.mxu0 %v3548_v59 }
 0xe51   :  { %2014 = vmatpush.bf16.msra.mxu1 %v3551_v63  ;;  %2027 = vmatpush.bf16.msra.mxu2 %v3611_v62  ;;  %v5092_v62 = vld [vmem:[#allocation8_spill] sm:$0xff] }
 0xe52   :  { %1980 = vmatpush.bf16.msrb.mxu3 %v4269_v42 }
 0xe54   :  { %2002 = vmatpush.bf16.msrb.mxu0 %v3623_v7 }
 0xe55   :  { %2015 = vmatpush.bf16.msra.mxu1 %v5073_v55  ;;  %2028 = vmatpush.bf16.msra.mxu2 %v5074_v1  ;;  %v5096_v1 = vld [vmem:[#allocation12_spill] sm:$0xff] }
 0xe56   :  { %1981 = vmatpush.bf16.msrb.mxu3 %v5075_v35 }
 0xe58   :  { %2003 = vmatpush.bf16.msrb.mxu0 %v5076_v11 }
 0xe59   :  { %2016 = vmatpush.bf16.msra.mxu1 %v5077_v8  ;;  %2029 = vmatpush.bf16.msra.mxu2 %v5078_v14 }
 0xe5a   :  { %1982 = vmatpush.bf16.msrb.mxu3 %v5090_v50 }
 0xe5c   :  { %2004 = vmatpush.bf16.msrb.mxu0 %v5091_v54 }
 0xe5d   :  { %2017 = vmatpush.bf16.msra.mxu1 %v5092_v62  ;;  %2030 = vmatpush.bf16.msra.mxu2 %v5093_v23 }
 0xe60   :  { %2005 = vmatpush.bf16.msrb.mxu0 %v5094_v18 }
 0xe61   :  { %2018 = vmatpush.bf16.msra.mxu1 %v5095_v53  ;;  %2031 = vmatpush.bf16.msra.mxu2 %v5096_v1 }
 0xe64   :  { %2006 = vmatpush.bf16.msrb.mxu0 %v5097_v3 }
 0xe65   :  { %2019 = vmatpush.bf16.msra.mxu1 %v5098_v34  ;;  %2032 = vmatpush.bf16.msra.mxu2 %v5099_v10 }
 0xebe   :  { %v1830_v14 = vpop.f32.mrf.mxu3 }
 0xebf   :  { %v1831_v60 = vadd.f32 %v4559_v44, %v1830_v14 }
 0xec1   :  { %v1834_v40 = vmul.f32 %v1831_v60, %v1831_v60 }
 0xec3   :  { %v1835_v52 = vmul.f32 %v1834_v40, %v1831_v60 }
 0xec4   :  { %v1854_v30 = vpop.f32.mrf.mxu0  ;;  %v1867_v36 = vpop.f32.mrf.mxu1 }
 0xec5   :  { %v1836_v15 = vmul.f32 0.044715, %v1835_v52  ;;  %v1884_v45 = vadd.f32 %v1854_v30, %v5038_v16  ;;  %v1885_v6 = vadd.f32 %v1867_v36, %v5039_v27 }
 0xec6   :  { %v1832_v0 = vpop.f32.mrf.mxu3 }
 0xec7   :  { %v1837_v4 = vadd.f32 %v1836_v15, %v1831_v60  ;;  %v1886_v32 = vmax.f32 %v1884_v45, %v1885_v6 }
 0xec9   :  { %v1838_v23 = vmul.f32 0.7978846, %v1837_v4  ;;  %1887 = vmax.xlane.f32.xlu0 %v1886_v32 }
 0xecb   :  { %3036 = vtanh.f32 %v1838_v23  ;;  %v4564_v1 = vpop.f32.mrf.mxu2 }
 0xecc   :  { %v1856_v10 = vpop.f32.mrf.mxu0  ;;  %v1869_v34 = vpop.f32.mrf.mxu1 }
 0xed1   :  { %v3037_v14 = vpop.eup %3036 }
 0xed2   :  { %v1840_v44 = vadd.f32 1.0, %v3037_v14  ;;  %v4592_v14 = vld [vmem:[%s4878_s9 + $0x78] sm:$0xff] }
 0xed3   :  { %v1882_v40 = vpop.f32.mrf.mxu2 }
 0xed4   :  { %v1841_v3 = vmul.f32 0.5, %v1840_v44 }
 0xed6   :  { %v1842_v53 = vmul.f32 %v1841_v3, %v1831_v60 }
 0xed8   :  { %v4567_v52 = vadd.f32 %v1842_v53, %v4391_v9 }
 0xf3c   :  { %v1888_v30 = vpop.xlane.xlu0 %1887 }
 0xf3d   :  { %vm1889_vm11 = vcmp.eq.f32.partialorder %v1884_v45, %v1888_v30  ;;  %vm1890_vm12 = vcmp.eq.f32.partialorder %v1885_v6, %v1888_v30 }
 0xf3e   :  { %v1891_v36 = vsel %vm1889_vm11, %v3427_v51, 256  ;;  %v1892_v15 = vsel %vm1890_vm12, %v3787_v38, 256 }
 0xf3f   :  { %vm1893_vm13 = vcmp.lt.s32.totalorder %v1891_v36, %v1892_v15 }
 0xf40   :  { %v1894_v0 = vsel %vm1893_vm13, %v1891_v36, %v1892_v15 }
 0xf41   :  { %v1896_v4 = vshra.s32 %v1894_v0, 16  ;;  %v1895_v34 = vand.u32 65535, %v1894_v0 }
 0xf43   :  { %v1898_v32 = vcvt.s32.f32 %v1896_v4  ;;  %v1897_v10 = vcvt.s32.f32 %v1895_v34 }
 0xf45   :  { %1899 = vmin.xlane.f32.xlu1 %v1898_v32 }
 0xfb8   :  { %v1900_v23 = vpop.xlane.xlu1 %1899 }
 0xfb9   :  { %vm1901_vm14 = vcmp.eq.f32.partialorder %v1898_v32, %v1900_v23  ;;  %v1906_v9 = vcvt.f32.s32 %v1900_v23 }
 0xfba   :  { %v1902_v3 = vsel %vm1901_vm14, %v1897_v10, inf }
 0xfbb   :  { %1903 = vmin.xlane.f32.xlu2 %v1902_v3  ;;  %v1907_v44 = vshll.u32 %v1906_v9, 16 }
0x102e   :  { %v1904_v53 = vpop.xlane.xlu2 %1903 }
0x102f   :  { %v1905_v60 = vcvt.f32.s32 %v1904_v53 }
0x1031   :  { %v1908_v45 = vadd.s32 %v1907_v44, %v1905_v60 }
0x1033   :  { %v4573_v6 = vsel %vm1909_vm15, %v1908_v45, %v4397_v39  ;;  %vm1911_vm0 = vcmp.eq.s32.totalorder %v3427_v51, %v1908_v45  ;;  %vm1912_vm1 = vcmp.eq.s32.totalorder %v3787_v38, %v1908_v45  ;;  %v4586_v39 = vld [vmem:[%s4878_s9 + $0x38] sm:$0xff] }
0x1034   :  { %vm2795_vm2 = vmpackc.low %vm1911_vm0, %vm1911_vm0 }
0x1035   :  { %vm2797_vm3 = vmpackc.low %vm1912_vm1, %vm1912_vm1  ;;  %2796 = vmatmul.msk.bf16.vlgmr.msra.gmra.mxu3 %vm2795_vm2, %v5006_v37  ;;  %2800 = vmatmul.msk.bf16.vlgmr.msrb.gmra.mxu1 %vm2795_vm2, %v5006_v37  ;;  %vm2263_vm2 = vcmask 64512  }
0x1036   :  { %2798 = vmatmul.msk.bf16.vlgmr.msra.gmra.mxu0 %vm2797_vm3, %v5006_v37  ;;  %2802 = vmatmul.msk.bf16.vlgmr.msrb.gmra.mxu2 %vm2797_vm3, %v5006_v37 }
0x1037   :  { %2073 = vmatpush.bf16.msra.mxu3 %v4408_v58  ;;  %2086 = vmatpush.bf16.msra.mxu0 %v4414_v28  ;;  %v4600_v58 = vld [vmem:[%s4878_s9 + $0x30] sm:$0xff] }
0x1038   :  { %2102 = vmatpush.bf16.msrb.mxu1 %v4586_v39  ;;  %2115 = vmatpush.bf16.msrb.mxu2 %v4592_v14  ;;  %v4606_v28 = vld [vmem:[%s4878_s9 + $0x70] sm:$0xff] }
0x103b   :  { %2074 = vmatpush.bf16.msra.mxu3 %v4422_v41  ;;  %2087 = vmatpush.bf16.msra.mxu0 %v4428_v26  ;;  %v4614_v41 = vld [vmem:[%s4878_s9 + $0x28] sm:$0xff] }
0x103c   :  { %2103 = vmatpush.bf16.msrb.mxu1 %v4600_v58  ;;  %2116 = vmatpush.bf16.msrb.mxu2 %v4606_v28  ;;  %v4620_v26 = vld [vmem:[%s4878_s9 + $0x68] sm:$0xff] }
0x103f   :  { %2075 = vmatpush.bf16.msra.mxu3 %v4436_v48  ;;  %2088 = vmatpush.bf16.msra.mxu0 %v4442_v12  ;;  %v4628_v48 = vld [vmem:[%s4878_s9 + $0x20] sm:$0xff] }
0x1040   :  { %2104 = vmatpush.bf16.msrb.mxu1 %v4614_v41  ;;  %2117 = vmatpush.bf16.msrb.mxu2 %v4620_v26  ;;  %v4634_v12 = vld [vmem:[%s4878_s9 + $0x60] sm:$0xff] }
0x1043   :  { %2076 = vmatpush.bf16.msra.mxu3 %v4450_v31  ;;  %2089 = vmatpush.bf16.msra.mxu0 %v4456_v2  ;;  %v3098_v31 = vld [vmem:[%s4878_s9 + $0x18] sm:$0xff] }
0x1044   :  { %2105 = vmatpush.bf16.msrb.mxu1 %v4628_v48  ;;  %2118 = vmatpush.bf16.msrb.mxu2 %v4634_v12  ;;  %v4645_v2 = vld [vmem:[%s4878_s9 + $0x58] sm:$0xff] }
0x1047   :  { %2077 = vmatpush.bf16.msra.mxu3 %v4464_v19  ;;  %2090 = vmatpush.bf16.msra.mxu0 %v4470_v13  ;;  %v3100_v19 = vld [vmem:[%s4878_s9 + $0x10] sm:$0xff] }
0x1048   :  { %2106 = vmatpush.bf16.msrb.mxu1 %v3098_v31  ;;  %2119 = vmatpush.bf16.msrb.mxu2 %v4645_v2  ;;  %v4656_v13 = vld [vmem:[%s4878_s9 + $0x50] sm:$0xff] }
0x104b   :  { %2078 = vmatpush.bf16.msra.mxu3 %v4478_v56  ;;  %2091 = vmatpush.bf16.msra.mxu0 %v4484_v43  ;;  %v3102_v56 = vld [vmem:[%s4878_s9 + $0x8] sm:$0xff] }
0x104c   :  { %2107 = vmatpush.bf16.msrb.mxu1 %v3100_v19  ;;  %2120 = vmatpush.bf16.msrb.mxu2 %v4656_v13  ;;  %v4667_v43 = vld [vmem:[%s4878_s9 + $0x48] sm:$0xff] }
0x104f   :  { %2079 = vmatpush.bf16.msra.mxu3 %v4492_v22  ;;  %2092 = vmatpush.bf16.msra.mxu0 %v4498_v57  ;;  %v3104_v22 = vld [vmem:[%s4878_s9] sm:$0xff] }
0x1050   :  { %2108 = vmatpush.bf16.msrb.mxu1 %v3102_v56  ;;  %2121 = vmatpush.bf16.msrb.mxu2 %v4667_v43  ;;  %v4678_v57 = vld [vmem:[%s4878_s9 + $0x40] sm:$0xff] }
0x1053   :  { %2080 = vmatpush.bf16.msra.mxu3 %v4506_v46  ;;  %2093 = vmatpush.bf16.msra.mxu0 %v4512_v20 }
0x1054   :  { %2109 = vmatpush.bf16.msrb.mxu1 %v3104_v22  ;;  %2122 = vmatpush.bf16.msrb.mxu2 %v4678_v57 }
0x10b2   :  { %v1957_v40 = vpop.f32.mrf.mxu1 }
0x10b3   :  { %v1941_v30 = vpop.f32.mrf.mxu0 }
0x10b8   :  { %v1928_v36 = vpop.f32.mrf.mxu3 }
0x10b9   :  { %v1942_v15 = vadd.f32 %v1941_v30, %v1928_v36  ;;  %v1970_v0 = vpop.f32.mrf.mxu2 }
0x10ba   :  { %v1971_v46 = vadd.f32 %v1970_v0, %v1957_v40  ;;  %v1959_v4 = vpop.f32.mrf.mxu1 }
0x10bb   :  { %v1945_v20 = vadd.f32 %v1942_v15, %v4564_v1  ;;  %v1943_v32 = vpop.f32.mrf.mxu0 }
0x10bc   :  { %v1974_v34 = vpack.c.bf16 %v1971_v46, %v1971_v46 }
0x10bd   :  { %v1946_v23 = vadd.f32 %v4521_v61, %v1945_v20 }
0x10be   :  { %1983 = vmatmul.bf16.vlgmr.msrb.gmra.mxu3 %v1974_v34 }
0x10bf   :  { %3038 = vtanh.f32 %v1946_v23  ;;  %2129 = vmatpush.bf16.msrb.mxu3 %v4230_v17 }
0x10c0   :  { %v1930_v10 = vpop.f32.mrf.mxu3 }
0x10c1   :  { %v1972_v3 = vpop.f32.mrf.mxu2 }
0x10c3   :  { %2130 = vmatpush.bf16.msrb.mxu3 %v4236_v21 }
0x10c5   :  { %v3039_v9 = vpop.eup %3038 }
0x10c6   :  { %v1998_v53 = vpack.c.bf16 %v3039_v9, %v3039_v9 }
0x10c7   :  { %2131 = vmatpush.bf16.msrb.mxu3 %v4242_v49 }
0x10c8   :  { %2007 = vmatmul.bf16.vlgmr.msrb.gmra.mxu0 %v1998_v53  ;;  %2020 = vmatmul.bf16.vlgmr.msra.gmra.mxu1 %v1998_v53 }
0x10c9   :  { %2033 = vmatmul.bf16.vlgmr.msra.gmra.mxu2 %v1998_v53  ;;  %2153 = vmatpush.bf16.msrb.mxu0 %v3495_v24  ;;  %v5101_v24 = vld [vmem:[#allocation11_spill] sm:$0xff] }
0x10ca   :  { %2166 = vmatpush.bf16.msra.mxu1 %v3500_v25  ;;  %2213 = vmatpush.bf16.msra.mxu2 %v4586_v39  ;;  %v5102_v25 = vld [vmem:[#allocation13_spill] sm:$0xff] }
0x10cb   :  { %2132 = vmatpush.bf16.msrb.mxu3 %v4251_v5 }
0x10cd   :  { %2154 = vmatpush.bf16.msrb.mxu0 %v3515_v29  ;;  %v5103_v29 = vld [vmem:[#allocation14_spill] sm:$0xff] }
0x10ce   :  { %2167 = vmatpush.bf16.msra.mxu1 %v3526_v47  ;;  %2214 = vmatpush.bf16.msra.mxu2 %v4600_v58 }
0x10cf   :  { %2133 = vmatpush.bf16.msrb.mxu3 %v4260_v33 }
0x10d1   :  { %2155 = vmatpush.bf16.msrb.mxu0 %v3548_v59  ;;  %v5104_v59 = vld [vmem:[#allocation23_spill] sm:$0xff] }
0x10d2   :  { %2168 = vmatpush.bf16.msra.mxu1 %v3551_v63  ;;  %2215 = vmatpush.bf16.msra.mxu2 %v4614_v41 }
0x10d3   :  { %2134 = vmatpush.bf16.msrb.mxu3 %v4269_v42 }
0x10d5   :  { %2156 = vmatpush.bf16.msrb.mxu0 %v3623_v7 }
0x10d6   :  { %2169 = vmatpush.bf16.msra.mxu1 %v5073_v55  ;;  %2216 = vmatpush.bf16.msra.mxu2 %v4628_v48 }
0x10d7   :  { %2135 = vmatpush.bf16.msrb.mxu3 %v5075_v35 }
0x10d9   :  { %2157 = vmatpush.bf16.msrb.mxu0 %v5076_v11 }
0x10da   :  { %2170 = vmatpush.bf16.msra.mxu1 %v5077_v8  ;;  %2217 = vmatpush.bf16.msra.mxu2 %v3098_v31 }
0x10db   :  { %2136 = vmatpush.bf16.msrb.mxu3 %v5090_v50 }
0x10dd   :  { %2158 = vmatpush.bf16.msrb.mxu0 %v5091_v54 }
0x10de   :  { %2171 = vmatpush.bf16.msra.mxu1 %v5092_v62  ;;  %2218 = vmatpush.bf16.msra.mxu2 %v3100_v19 }
0x10e1   :  { %2159 = vmatpush.bf16.msrb.mxu0 %v5094_v18 }
0x10e2   :  { %2172 = vmatpush.bf16.msra.mxu1 %v5101_v24  ;;  %2219 = vmatpush.bf16.msra.mxu2 %v3102_v56 }
0x10e5   :  { %2160 = vmatpush.bf16.msrb.mxu0 %v5102_v25 }
0x10e6   :  { %2173 = vmatpush.bf16.msra.mxu1 %v5103_v29  ;;  %2220 = vmatpush.bf16.msra.mxu2 %v3104_v22 }
0x1141   :  { %v1984_v47 = vpop.f32.mrf.mxu3 }
0x1142   :  { %v1985_v63 = vadd.f32 %v5104_v59, %v1984_v47 }
0x1144   :  { %v1988_v7 = vmul.f32 %v1985_v63, %v1985_v63 }
0x1145   :  { %v2008_v17 = vpop.f32.mrf.mxu0  ;;  %v2021_v55 = vpop.f32.mrf.mxu1 }
0x1146   :  { %v1989_v11 = vmul.f32 %v1988_v7, %v1985_v63  ;;  %v2038_v8 = vadd.f32 %v2008_v17, %v5038_v16  ;;  %v2039_v54 = vadd.f32 %v2021_v55, %v5039_v27 }
0x1148   :  { %v1990_v62 = vmul.f32 0.044715, %v1989_v11  ;;  %v2040_v18 = vmax.f32 %v2038_v8, %v2039_v54 }
0x1149   :  { %v1986_v1 = vpop.f32.mrf.mxu3 }
0x114a   :  { %v1991_v44 = vadd.f32 %v1990_v62, %v1985_v63  ;;  %2041 = vmax.xlane.f32.xlu0 %v2040_v18 }
0x114c   :  { %v1992_v60 = vmul.f32 0.7978846, %v1991_v44  ;;  %v4714_v45 = vpop.f32.mrf.mxu2 }
0x114d   :  { %v2010_v39 = vpop.f32.mrf.mxu0  ;;  %v2023_v58 = vpop.f32.mrf.mxu1 }
0x114e   :  { %3040 = vtanh.f32 %v1992_v60 }
0x1154   :  { %v3041_v41 = vpop.eup %3040  ;;  %v2036_v48 = vpop.f32.mrf.mxu2 }
0x1155   :  { %v1994_v31 = vadd.f32 1.0, %v3041_v41 }
0x1157   :  { %v1995_v19 = vmul.f32 0.5, %v1994_v31 }
0x1159   :  { %v1996_v56 = vmul.f32 %v1995_v19, %v1985_v63 }
0x115b   :  { %v4717_v22 = vadd.f32 %v1996_v56, %v4567_v52 }
0x11bd   :  { %v2042_v40 = vpop.xlane.xlu0 %2041 }
0x11be   :  { %vm2043_vm4 = vcmp.eq.f32.partialorder %v2038_v8, %v2042_v40  ;;  %vm2044_vm6 = vcmp.eq.f32.partialorder %v2039_v54, %v2042_v40 }
0x11bf   :  { %v2045_v30 = vsel %vm2043_vm4, %v3427_v51, 256  ;;  %v2046_v36 = vsel %vm2044_vm6, %v3787_v38, 256 }
0x11c0   :  { %vm2047_vm7 = vcmp.lt.s32.totalorder %v2045_v30, %v2046_v36 }
0x11c1   :  { %v2048_v15 = vsel %vm2047_vm7, %v2045_v30, %v2046_v36 }
0x11c2   :  { %v2050_v0 = vshra.s32 %v2048_v15, 16  ;;  %v2049_v4 = vand.u32 65535, %v2048_v15 }
0x11c4   :  { %v2052_v46 = vcvt.s32.f32 %v2050_v0  ;;  %v2051_v32 = vcvt.s32.f32 %v2049_v4 }
0x11c6   :  { %2053 = vmin.xlane.f32.xlu1 %v2052_v46 }
0x1239   :  { %v2054_v20 = vpop.xlane.xlu1 %2053 }
0x123a   :  { %vm2055_vm8 = vcmp.eq.f32.partialorder %v2052_v46, %v2054_v20  ;;  %v2060_v52 = vcvt.f32.s32 %v2054_v20 }
0x123b   :  { %v2056_v34 = vsel %vm2055_vm8, %v2051_v32, inf }
0x123c   :  { %2057 = vmin.xlane.f32.xlu2 %v2056_v34  ;;  %v2061_v10 = vshll.u32 %v2060_v52, 16 }
0x12af   :  { %v2058_v23 = vpop.xlane.xlu2 %2057 }
0x12b0   :  { %v2059_v3 = vcvt.f32.s32 %v2058_v23 }
0x12b2   :  { %v2062_v9 = vadd.s32 %v2061_v10, %v2059_v3 }
0x12b4   :  { %v4723_v53 = vsel %vm2063_vm9, %v2062_v9, %v4573_v6  ;;  %vm2065_vm10 = vcmp.eq.s32.totalorder %v3427_v51, %v2062_v9  ;;  %vm2066_vm11 = vcmp.eq.s32.totalorder %v3787_v38, %v2062_v9  ;;  %v3106_v6 = vld [vmem:[%s4881_s10 + $0x38] sm:$0xff]  ;;  %v2877_v9 = vld [vmem:[%s4888_s12 + $0x70] sm:$0xf] }
0x12b5   :  { %vm2805_vm12 = vmpackc.low %vm2065_vm10, %vm2065_vm10 }
0x12b6   :  { %vm2807_vm13 = vmpackc.low %vm2066_vm11, %vm2066_vm11  ;;  %2806 = vmatmul.msk.bf16.vlgmr.msra.gmra.mxu3 %vm2805_vm12, %v5006_v37  ;;  %2810 = vmatmul.msk.bf16.vlgmr.msrb.gmra.mxu1 %vm2805_vm12, %v5006_v37  ;;  %vm2418_vm11 = vcmask 7168  }
0x12b7   :  { %2808 = vmatmul.msk.bf16.vlgmr.msra.gmra.mxu0 %vm2807_vm13, %v5006_v37  ;;  %2812 = vmatmul.msk.bf16.vlgmr.msrb.gmra.mxu2 %vm2807_vm13, %v5006_v37 }
0x12b8   :  { %2226 = vmatpush.bf16.msra.mxu3 %v4592_v14  ;;  %2240 = vmatpush.bf16.msra.mxu0 %v3106_v6  ;;  %v2973_v6 = vld [vmem:[%s4888_s12 + $0x74] sm:$0xf] }
0x12bc   :  { %2227 = vmatpush.bf16.msra.mxu3 %v4606_v28  ;;  %2241 = vmatpush.bf16.msra.mxu0 %v4236_v21 }
0x12c0   :  { %2228 = vmatpush.bf16.msra.mxu3 %v4620_v26  ;;  %2242 = vmatpush.bf16.msra.mxu0 %v4242_v49 }
0x12c4   :  { %2229 = vmatpush.bf16.msra.mxu3 %v4634_v12  ;;  %2243 = vmatpush.bf16.msra.mxu0 %v4251_v5 }
0x12c8   :  { %2230 = vmatpush.bf16.msra.mxu3 %v4645_v2  ;;  %2244 = vmatpush.bf16.msra.mxu0 %v4260_v33 }
0x12cc   :  { %2231 = vmatpush.bf16.msra.mxu3 %v4656_v13  ;;  %2245 = vmatpush.bf16.msra.mxu0 %v4269_v42 }
0x12d0   :  { %2232 = vmatpush.bf16.msra.mxu3 %v4667_v43  ;;  %2246 = vmatpush.bf16.msra.mxu0 %v5075_v35 }
0x12d4   :  { %2233 = vmatpush.bf16.msra.mxu3 %v4678_v57  ;;  %2247 = vmatpush.bf16.msra.mxu0 %v5090_v50 }
0x1333   :  { %v2111_v21 = vpop.f32.mrf.mxu1 }
0x1334   :  { %v2095_v49 = vpop.f32.mrf.mxu0 }
0x1339   :  { %v2082_v14 = vpop.f32.mrf.mxu3 }
0x133a   :  { %v2096_v5 = vadd.f32 %v2095_v49, %v2082_v14  ;;  %v2124_v28 = vpop.f32.mrf.mxu2  ;;  %v2869_v14 = vld [vmem:[%s4888_s12 + $0x60] sm:$0xf] }
0x133b   :  { %v2125_v26 = vadd.f32 %v2124_v28, %v2111_v21  ;;  %v2113_v12 = vpop.f32.mrf.mxu1  ;;  %v2879_v21 = vld [vmem:[%s4888_s12 + $0x78] sm:$0xf0]  ;;  %v2971_v28 = vld [vmem:[%s4888_s12 + $0x64] sm:$0xf] }
0x133c   :  { %v2099_v33 = vadd.f32 %v2096_v5, %v4714_v45  ;;  %v2097_v2 = vpop.f32.mrf.mxu0  ;;  %v2882_v49 = vor.u32 %v2973_v6, %v2879_v21  ;;  %v2972_v5 = vld [vmem:[%s4888_s12 + $0x64] sm:$0xf0]  ;;  %v2871_v12 = vld [vmem:[%s4888_s12 + $0x68] sm:$0xf0] }
0x133d   :  { %v2128_v13 = vpack.c.bf16 %v2125_v26, %v2125_v26  ;;  %v2870_v26 = vor.u32 %v2972_v5, %v2869_v14  ;;  %v2861_v2 = vld [vmem:[%s4888_s12 + $0x50] sm:$0xf] }
0x133e   :  { %v2100_v42 = vadd.f32 %v4521_v61, %v2099_v33  ;;  %2382 = vmatpush.bf16.msrb.mxu2 %v2882_v49  ;;  %v2874_v33 = vor.u32 %v2971_v28, %v2871_v12 }
0x133f   :  { %2137 = vmatmul.bf16.vlgmr.msrb.gmra.mxu3 %v2128_v13  ;;  %v2970_v13 = vld [vmem:[%s4888_s12 + $0x54] sm:$0xf0] }
0x1340   :  { %3042 = vtanh.f32 %v2100_v42  ;;  %v2969_v42 = vld [vmem:[%s4888_s12 + $0x54] sm:$0xf] }
0x1341   :  { %v2084_v35 = vpop.f32.mrf.mxu3 }
0x1342   :  { %v2126_v43 = vpop.f32.mrf.mxu2  ;;  %2383 = vmatpush.bf16.msrb.mxu2 %v2874_v33  ;;  %v2862_v35 = vor.u32 %v2970_v13, %v2861_v2 }
0x1343   :  { %v2863_v43 = vld [vmem:[%s4888_s12 + $0x58] sm:$0xf0] }
0x1346   :  { %v3043_v57 = vpop.eup %3042 }
0x1347   :  { %v2152_v24 = vpack.c.bf16 %v3043_v57, %v3043_v57  ;;  %v2866_v57 = vor.u32 %v2969_v42, %v2863_v43 }
0x1349   :  { %2161 = vmatmul.bf16.vlgmr.msrb.gmra.mxu0 %v2152_v24  ;;  %2174 = vmatmul.bf16.vlgmr.msra.gmra.mxu1 %v2152_v24  ;;  %v2853_v24 = vld [vmem:[%s4888_s12 + $0x40] sm:$0xf] }
0x134a   :  { %2384 = vmatpush.bf16.msrb.mxu2 %v2866_v57 }
0x13c2   :  { %v2138_v50 = vpop.f32.mrf.mxu3 }
0x13c3   :  { %v2139_v25 = vadd.f32 %v5104_v59, %v2138_v50  ;;  %v2968_v50 = vld [vmem:[%s4888_s12 + $0x44] sm:$0xf0] }
0x13c5   :  { %v2142_v29 = vmul.f32 %v2139_v25, %v2139_v25 }
0x13c6   :  { %v2162_v47 = vpop.f32.mrf.mxu0  ;;  %v2175_v63 = vpop.f32.mrf.mxu1 }
0x13c7   :  { %v2143_v7 = vmul.f32 %v2142_v29, %v2139_v25  ;;  %v2179_v17 = vadd.f32 %v2162_v47, %v5038_v16  ;;  %v2180_v55 = vadd.f32 %v2175_v63, %v5039_v27  ;;  %v2854_v29 = vor.u32 %v2968_v50, %v2853_v24  ;;  %v2855_v47 = vld [vmem:[%s4888_s12 + $0x48] sm:$0xf0] }
0x13c9   :  { %v2144_v61 = vmul.f32 0.044715, %v2143_v7  ;;  %v2181_v11 = vmax.f32 %v2179_v17, %v2180_v55  ;;  %v2845_v7 = vld [vmem:[%s4888_s12 + $0x30] sm:$0xf] }
0x13ca   :  { %v2140_v8 = vpop.f32.mrf.mxu3 }
0x13cb   :  { %v2145_v54 = vadd.f32 %v2144_v61, %v2139_v25  ;;  %2182 = vmax.xlane.f32.xlu0 %v2181_v11  ;;  %v2847_v11 = vld [vmem:[%s4888_s12 + $0x38] sm:$0xf0] }
0x13cd   :  { %v2146_v62 = vmul.f32 0.7978846, %v2145_v54  ;;  %v2837_v54 = vld [vmem:[%s4888_s12 + $0x20] sm:$0xf] }
0x13ce   :  { %v2164_v18 = vpop.f32.mrf.mxu0  ;;  %v2177_v1 = vpop.f32.mrf.mxu1 }
0x13cf   :  { %3044 = vtanh.f32 %v2146_v62  ;;  %v2964_v62 = vld [vmem:[%s4888_s12 + $0x24] sm:$0xf0]  ;;  %v2963_v18 = vld [vmem:[%s4888_s12 + $0x24] sm:$0xf] }
0x13d0   :  { %v2838_v1 = vor.u32 %v2964_v62, %v2837_v54 }
0x13d5   :  { %v3045_v44 = vpop.eup %3044 }
0x13d6   :  { %v2148_v60 = vadd.f32 1.0, %v3045_v44  ;;  %v2839_v44 = vld [vmem:[%s4888_s12 + $0x28] sm:$0xf0] }
0x13d8   :  { %v2149_v45 = vmul.f32 0.5, %v2148_v60  ;;  %v2842_v60 = vor.u32 %v2963_v18, %v2839_v44 }
0x13da   :  { %v2150_v39 = vmul.f32 %v2149_v45, %v2139_v25  ;;  %v2967_v25 = vld [vmem:[%s4888_s12 + $0x44] sm:$0xf]  ;;  %v2829_v45 = vld [vmem:[%s4888_s12 + $0x10] sm:$0xf] }
0x13db   :  { %v2858_v63 = vor.u32 %v2967_v25, %v2855_v47 }
0x13dc   :  { %v4755_v58 = vadd.f32 %v2150_v39, %v4717_v22  ;;  %v2962_v39 = vld [vmem:[%s4888_s12 + $0x14] sm:$0xf0] }
0x13dd   :  { %2385 = vmatpush.bf16.msrb.mxu2 %v2858_v63 }
0x143e   :  { %v2183_v41 = vpop.xlane.xlu0 %2182 }
0x143f   :  { %vm2184_vm14 = vcmp.eq.f32.partialorder %v2179_v17, %v2183_v41  ;;  %vm2185_vm15 = vcmp.eq.f32.partialorder %v2180_v55, %v2183_v41  ;;  %v2966_v17 = vld [vmem:[%s4888_s12 + $0x34] sm:$0xf0]  ;;  %v2965_v55 = vld [vmem:[%s4888_s12 + $0x34] sm:$0xf] }
0x1440   :  { %v2186_v16 = vsel %vm2184_vm14, %v3427_v51, 256  ;;  %v2187_v27 = vsel %vm2185_vm15, %v3787_v38, 256  ;;  %v2846_v61 = vor.u32 %v2966_v17, %v2845_v7  ;;  %v2850_v8 = vor.u32 %v2965_v55, %v2847_v11  ;;  %v2961_v41 = vld [vmem:[%s4888_s12 + $0x14] sm:$0xf] }
0x1441   :  { %vm2188_vm0 = vcmp.lt.s32.totalorder %v2186_v16, %v2187_v27 }
0x1442   :  { %v2189_v48 = vsel %vm2188_vm0, %v2186_v16, %v2187_v27  ;;  %2386 = vmatpush.bf16.msrb.mxu2 %v2850_v8  ;;  %v2830_v16 = vor.u32 %v2962_v39, %v2829_v45  ;;  %v2831_v27 = vld [vmem:[%s4888_s12 + $0x18] sm:$0xf0] }
0x1443   :  { %v2191_v31 = vshra.s32 %v2189_v48, 16  ;;  %v2190_v56 = vand.u32 65535, %v2189_v48  ;;  %v2834_v48 = vor.u32 %v2961_v41, %v2831_v27 }
0x1445   :  { %v2193_v19 = vcvt.s32.f32 %v2191_v31  ;;  %v2192_v30 = vcvt.s32.f32 %v2190_v56  ;;  %v2821_v31 = vld [vmem:[%s4888_s12] sm:$0xf]  ;;  %v2959_v56 = vld [vmem:[%s4888_s12 + $0x4] sm:$0xf] }
0x1446   :  { %2387 = vmatpush.bf16.msrb.mxu2 %v2842_v60 }
0x1447   :  { %2194 = vmin.xlane.f32.xlu1 %v2193_v19 }
0x144a   :  { %2388 = vmatpush.bf16.msrb.mxu2 %v2834_v48 }
0x14ba   :  { %v2195_v40 = vpop.xlane.xlu1 %2194 }
0x14bb   :  { %vm2196_vm1 = vcmp.eq.f32.partialorder %v2193_v19, %v2195_v40  ;;  %v2201_v22 = vcvt.f32.s32 %v2195_v40  ;;  %v2960_v19 = vld [vmem:[%s4888_s12 + $0x4] sm:$0xf0] }
0x14bc   :  { %v2197_v36 = vsel %vm2196_vm1, %v2192_v30, inf  ;;  %v2822_v40 = vor.u32 %v2960_v19, %v2821_v31  ;;  %v2823_v30 = vld [vmem:[%s4888_s12 + $0x8] sm:$0xf0] }
0x14bd   :  { %2198 = vmin.xlane.f32.xlu2 %v2197_v36  ;;  %v2202_v0 = vshll.u32 %v2201_v22, 16  ;;  %v2826_v36 = vor.u32 %v2959_v56, %v2823_v30 }
0x14bf   :  { %2389 = vmatpush.bf16.msrb.mxu2 %v2826_v36 }
0x1530   :  { %v2199_v15 = vpop.xlane.xlu2 %2198 }
0x1531   :  { %v2200_v46 = vcvt.f32.s32 %v2199_v15 }
0x1533   :  { %v2203_v4 = vadd.s32 %v2202_v0, %v2200_v46 }
0x1535   :  { %v2204_v20 = vsel %vm649_vm5, %v2203_v4, %v4723_v53  ;;  %vm2205_vm3 = vcmp.eq.s32.totalorder %v3427_v51, %v2203_v4  ;;  %vm2206_vm4 = vcmp.eq.s32.totalorder %v3787_v38, %v2203_v4  ;;  %v2974_v53 = vld [vmem:[%s4888_s12 + $0x74] sm:$0xf0] }
0x1536   :  { %vm2815_vm6 = vmpackc.low %vm2205_vm3, %vm2205_vm3  ;;  %2264 = vst.msk [vmem:[%s4887_s14] sm:$0xff] %vm2263_vm2, %v2204_v20 }
0x1537   :  { %vm2817_vm7 = vmpackc.low %vm2206_vm4, %vm2206_vm4  ;;  %2816 = vmatmul.msk.bf16.vlgmr.msra.gmra.mxu2 %vm2815_vm6, %v5006_v37 }
0x1538   :  { %2818 = vmatmul.msk.bf16.vlgmr.msra.gmra.mxu3 %vm2817_vm7, %v5006_v37  ;;  %v2878_v37 = vor.u32 %v2974_v53, %v2877_v9 }
0x153a   :  { %2369 = vmatpush.bf16.msrb.mxu1 %v2878_v37 }
0x153e   :  { %2370 = vmatpush.bf16.msrb.mxu1 %v2870_v26 }
0x1542   :  { %2371 = vmatpush.bf16.msrb.mxu1 %v2862_v35 }
0x1546   :  { %2372 = vmatpush.bf16.msrb.mxu1 %v2854_v29 }
0x154a   :  { %2373 = vmatpush.bf16.msrb.mxu1 %v2846_v61 }
0x154e   :  { %2374 = vmatpush.bf16.msrb.mxu1 %v2838_v1 }
0x1552   :  { %2375 = vmatpush.bf16.msrb.mxu1 %v2830_v16 }
0x1556   :  { %2376 = vmatpush.bf16.msrb.mxu1 %v2822_v40 }
0x15ba   :  { %v2222_v32 = vpop.f32.mrf.mxu2 }
0x15bb   :  { %v2235_v34 = vpop.f32.mrf.mxu3 }
0x15bc   :  { %v2236_v52 = vadd.f32 %v2235_v34, %v2222_v32 }
0x15be   :  { %v2239_v23 = vpack.c.bf16 %v2236_v52, %v2236_v52 }
0x15c0   :  { %2248 = vmatmul.bf16.vlgmr.msra.gmra.mxu0 %v2239_v23 }
0x15c2   :  { %v2224_v10 = vpop.f32.mrf.mxu2 }
0x15c3   :  { %v2237_v3 = vpop.f32.mrf.mxu3 }
0x163d   :  { %v2249_v22 = vpop.f32.mrf.mxu0 }
0x163e   :  { %v2250_v15 = vadd.f32 %v5104_v59, %v2249_v22  ;;  %v2283_v59 = vld [vmem:[%s4889_s13] sm:$0x3] }
0x163f   :  { %v2285_v21 = vperm.slane %v2283_v59, 0  ;;  %v2286_v49 = vperm.slane %v2283_v59, 1 }
0x1640   :  { %v2253_v0 = vmul.f32 %v2250_v15, %v2250_v15 }
0x1642   :  { %v2254_v46 = vmul.f32 %v2253_v0, %v2250_v15 }
0x1644   :  { %v2255_v4 = vmul.f32 0.044715, %v2254_v46 }
0x1645   :  { %v2251_v20 = vpop.f32.mrf.mxu0 }
0x1646   :  { %v2256_v32 = vadd.f32 %v2255_v4, %v2250_v15 }
0x1648   :  { %v2257_v34 = vmul.f32 0.7978846, %v2256_v32 }
0x164a   :  { %3046 = vtanh.f32 %v2257_v34 }
0x1650   :  { %v3047_v52 = vpop.eup %3046 }
0x1651   :  { %v2259_v23 = vadd.f32 1.0, %v3047_v52 }
0x1653   :  { %v2260_v10 = vmul.f32 0.5, %v2259_v23 }
0x1655   :  { %v2261_v3 = vmul.f32 %v2260_v10, %v2250_v15 }
0x1657   :  { %v2262_v9 = vadd.f32 %v2261_v3, %v4755_v58 }
0x1659   :  { %v2265_v53 = vmul.f32 0.11111111, %v2262_v9 }
0x165b   :  { %v2266_v6 = vpack.c.bf16 %v2265_v53, %v2265_v53 }
0x165d   :  { %2377 = vmatmul.bf16.vlgmr.msrb.gmra.mxu1 %v2266_v6  ;;  %2390 = vmatmul.bf16.vlgmr.msrb.gmra.mxu2 %v2266_v6 }
0x16da   :  { %v2378_v37 = vpop.f32.mrf.mxu1 }
0x16db   :  { %v2379_v5 = vadd.f32 %v2378_v37, %v2285_v21 }
0x16e0   :  { %v2391_v14 = vpop.f32.mrf.mxu2 }
0x16e1   :  { %v2392_v28 = vadd.f32 %v2391_v14, %v2286_v49 }
0x16e2   :  { %v2380_v26 = vpop.f32.mrf.mxu1 }
0x16e3   :  { %v2395_v12 = vmax.f32 %v2379_v5, %v2392_v28 }
0x16e5   :  { %2396 = vmax.xlane.f32.xlu0 %v2395_v12 }
0x16e8   :  { %v2393_v33 = vpop.f32.mrf.mxu2 }
0x1758   :  { %v2397_v2 = vpop.xlane.xlu0 %2396 }
0x1759   :  { %vm2398_vm5 = vcmp.eq.f32.partialorder %v2379_v5, %v2397_v2  ;;  %vm2399_vm8 = vcmp.eq.f32.partialorder %v2392_v28, %v2397_v2 }
0x175a   :  { %v2400_v58 = vsel %vm2398_vm5, %v3427_v51, 256  ;;  %v2401_v13 = vsel %vm2399_vm8, %v3787_v38, 256 }
0x175b   :  { %vm2402_vm9 = vcmp.lt.s32.totalorder %v2400_v58, %v2401_v13 }
0x175c   :  { %v2403_v42 = vsel %vm2402_vm9, %v2400_v58, %v2401_v13 }
0x175d   :  { %v2405_v35 = vshra.s32 %v2403_v42, 16  ;;  %v2404_v57 = vand.u32 65535, %v2403_v42 }
0x175f   :  { %v2407_v43 = vcvt.s32.f32 %v2405_v35  ;;  %v2406_v50 = vcvt.s32.f32 %v2404_v57 }
0x1761   :  { %2408 = vmin.xlane.f32.xlu1 %v2407_v43 }
0x17d4   :  { %v2409_v24 = vpop.xlane.xlu1 %2408 }
0x17d5   :  { %vm2410_vm10 = vcmp.eq.f32.partialorder %v2407_v43, %v2409_v24  ;;  %v2415_v29 = vcvt.f32.s32 %v2409_v24 }
0x17d6   :  { %v2411_v25 = vsel %vm2410_vm10, %v2406_v50, inf }
0x17d7   :  { %2412 = vmin.xlane.f32.xlu2 %v2411_v25  ;;  %v2416_v63 = vshll.u32 %v2415_v29, 16 }
0x184a   :  { %v2413_v47 = vpop.xlane.xlu2 %2412 }
0x184b   :  { %v2414_v7 = vcvt.f32.s32 %v2413_v47 }
0x184d   :  { %v2417_v17 = vadd.s32 %v2416_v63, %v2414_v7 }
0x184f   :  { %2419 = vst.msk [vmem:[%s4890_s15] sm:$0xff] %vm2418_vm11, %v2417_v17 }

</bundles_post_ra>
